<compile_context>
chip_gen: v7x
topology: tpu7x:2x2x1
jax: 0.10.0
libtpu: 0.0.40
codegen_flags: <defaults>
</compile_context>

<pallas_src>
import functools

import jax
import jax.numpy as jnp
from jax.experimental import pallas as pl
from jax.experimental.pallas import tpu as pltpu

_CPAD = 128        # lane-dense channel padding
_BN_EPS = 1e-5


# ----------------------------------------------------------------------------
# Fused Pallas kernel: whole backbone, activations resident in VMEM/vregs.
# ----------------------------------------------------------------------------
def _backbone_kernel(x_ref, w_ref, scale_ref, shift_ref, out_ref, *, blocks):
    """x_ref: (B, L, C) channels-last, C = _CPAD.
    w_ref:      (NL, 3*C, C)   packed im2col weights (taps stacked on rows)
    scale_ref:  (NL, 1, C)     folded BN scale  (0 on padded channels)
    shift_ref:  (NL, 1, C)     folded BN shift + conv bias (0 on padded channels)
    blocks: static tuple of (l1, l2, l3, adapt_idx or -1) per residual block.
    """
    B, L, C = x_ref.shape
    zrow = jnp.zeros((B, 1, C), jnp.float32)          # hoisted: reused by all layers

    def conv_bn(act, li, relu, extra=None):
        # Shifted copies for the K=3 taps; zero-row halo handled per batch
        # in-register (no HBM pad, no cross-batch leakage).
        x_m = jnp.concatenate([zrow, act[:, :L - 1, :]], axis=1)   # x[l-1]
        x_p = jnp.concatenate([act[:, 1:, :], zrow], axis=1)       # x[l+1]
        # im2col: fold the 3 taps into the contraction dim -> one MXU matmul.
        x_cat = jnp.concatenate([x_m, act, x_p], axis=-1)          # (B, L, 3C)
        y = jax.lax.dot_general(
            x_cat, w_ref[li],
            dimension_numbers=(((2,), (0,)), ((), ())),
            preferred_element_type=jnp.float32)                    # (B, L, C)
        y = y * scale_ref[li] + shift_ref[li]                      # folded BN (+bias)
        if extra is not None:
            y = y + extra                                          # residual add
        if relu:
            y = jnp.maximum(y, 0.0)
        return y

    act = x_ref[...].astype(jnp.float32)
    # stem: conv + bn + relu (+ dropout = identity at inference)
    act = conv_bn(act, 0, relu=True)
    # residual blocks (statically unrolled)
    for (l1, l2, l3, la) in blocks:
        identity = act
        act = conv_bn(act, l1, relu=True)                          # layer1
        act = conv_bn(act, l2, relu=True)                          # layer2
        # channel_adapt (1x1 conv, packed as center tap) or identity
        res = conv_bn(identity, la, relu=False) if la >= 0 else identity
        act = conv_bn(act, l3, relu=True, extra=res)               # conv3+bn3+res+relu
    out_ref[...] = act.astype(out_ref.dtype)                       # lane-dense store


# ----------------------------------------------------------------------------
# One-time parameter packing: fold BN, transpose + zero-pad weights to 128
# channels, stack all layers into single (NL, 3C, C)/(NL, 1, C) tensors.
# ----------------------------------------------------------------------------
def _pack_conv_bn(w, b, bn, cpad, eps=_BN_EPS):
    cout, cin, k = w.shape
    if bn is None:                                    # plain conv (channel_adapt)
        scale_c = jnp.ones((cout,), jnp.float32)
        shift_c = b.astype(jnp.float32)
    else:                                             # conv + BN folded
        scale_c = bn["gamma"] / jnp.sqrt(bn["rvar"] + eps)
        shift_c = (b - bn["rmean"]) * scale_c + bn["beta"]

    wk = jnp.transpose(w, (2, 1, 0)).astype(jnp.float32)    # (K, Cin, Cout)
    wp = jnp.zeros((3, cpad, cpad), jnp.float32)
    if k == 1:
        wp = wp.at[1, :cin, :cout].set(wk[0])               # 1x1 conv = center tap
    else:
        wp = wp.at[:, :cin, :cout].set(wk)                  # taps 0..2
    wp = wp.reshape(3 * cpad, cpad)

    scale = jnp.zeros((cpad,), jnp.float32).at[:cout].set(scale_c)
    shift = jnp.zeros((cpad,), jnp.float32).at[:cout].set(shift_c)
    return wp, scale, shift


def pack_backbone_params(params, cpad=_CPAD):
    layers = []

    def add(conv, bn):
        layers.append(_pack_conv_bn(conv["w"], conv["b"], bn, cpad))
        return len(layers) - 1

    add(params["conv"], params["bn"])                        # stem = layer 0
    blocks = []
    for name in ("block1", "block2", "block3"):
        bp = params[name]
        l1 = add(bp["conv1"], bp["bn1"])
        l2 = add(bp["conv2"], bp["bn2"])
        l3 = add(bp["conv3"], bp["bn3"])
        la = add(bp["adapt"], None) if "adapt" in bp else -1
        blocks.append((l1, l2, l3, la))

    nl = len(layers)
    return {
        "w": jnp.stack([l[0] for l in layers]),                        # (NL, 3C, C)
        "scale": jnp.stack([l[1] for l in layers]).reshape(nl, 1, cpad),
        "shift": jnp.stack([l[2] for l in layers]).reshape(nl, 1, cpad),
        "blocks": tuple(blocks),
        "cpad": cpad,
        "c_out": int(params["block3"]["conv3"]["w"].shape[0]),
    }


# ----------------------------------------------------------------------------
# Forward: one pallas_call; only the input/output layout glue stays in XLA.
# ----------------------------------------------------------------------------
def backbone_forward(packed, x_ncl):
    B, c_in, L = x_ncl.shape
    C = packed["cpad"]
    # NCL -> channels-last, zero-pad channels to the lane-dense width (once).
    x = jnp.transpose(x_ncl, (0, 2, 1))
    x = jnp.pad(x, ((0, 0), (0, 0), (0, C - c_in)))          # (B, L, 128)

    kernel = functools.partial(_backbone_kernel, blocks=packed["blocks"])
    out = pl.pallas_call(
        kernel,
        grid=(1,),
        in_specs=[
            pl.BlockSpec(x.shape, lambda i: (0, 0, 0)),
            pl.BlockSpec(packed["w"].shape, lambda i: (0, 0, 0)),
            pl.BlockSpec(packed["scale"].shape, lambda i: (0, 0, 0)),
            pl.BlockSpec(packed["shift"].shape, lambda i: (0, 0, 0)),
        ],
        out_specs=pl.BlockSpec((B, L, C), lambda i: (0, 0, 0)),
        out_shape=jax.ShapeDtypeStruct((B, L, C), x_ncl.dtype),
        compiler_params=pltpu.CompilerParams(dimension_semantics=("arbitrary",)),
    )(x, packed["w"], packed["scale"], packed["shift"])

    # Slice off channel padding; match torch nn.Flatten() on (B, C, L).
    out = out[:, :, :packed["c_out"]]
    return jnp.transpose(out, (0, 2, 1)).reshape(B, -1)


# ----------------------------------------------------------------------------
# Parameter construction (deterministic, torch-default-like init shapes)
# ----------------------------------------------------------------------------
def _conv_params(key, cin, cout, k):
    kw, kb = jax.random.split(key)
    bound = 1.0 / jnp.sqrt(jnp.float32(cin * k))
    return {
        "w": jax.random.uniform(kw, (cout, cin, k), jnp.float32, -bound, bound),
        "b": jax.random.uniform(kb, (cout,), jnp.float32, -bound, bound),
    }


def _bn_params(key, c):
    k1, k2, k3, k4 = jax.random.split(key, 4)
    return {
        "gamma": jax.random.uniform(k1, (c,), jnp.float32, 0.5, 1.5),
        "beta": 0.1 * jax.random.normal(k2, (c,), jnp.float32),
        "rmean": 0.1 * jax.random.normal(k3, (c,), jnp.float32),
        "rvar": jax.random.uniform(k4, (c,), jnp.float32, 0.5, 1.5),
    }


def _resblock_params(key, in_c, mid_c, out_c):
    ks = jax.random.split(key, 7)
    p = {
        "conv1": _conv_params(ks[0], in_c, mid_c, 3), "bn1": _bn_params(ks[1], mid_c),
        "conv2": _conv_params(ks[2], mid_c, mid_c, 3), "bn2": _bn_params(ks[3], mid_c),
        "conv3": _conv_params(ks[4], mid_c, out_c, 3), "bn3": _bn_params(ks[5], out_c),
    }
    if mid_c != out_c:
        # Matches the PyTorch spec: channel_adapt has in_channels=mid_channels
        # (applied to `identity`; all backbone call sites have in_c == mid_c).
        p["adapt"] = _conv_params(ks[6], mid_c, out_c, 1)
    return p


def make_backbone_params(key, in_c, mid_c, out_c):
    ks = jax.random.split(key, 5)
    return {
        "conv": _conv_params(ks[0], in_c, mid_c, 3),
        "bn": _bn_params(ks[1], mid_c),
        "block1": _resblock_params(ks[2], mid_c, mid_c, mid_c),
        "block2": _resblock_params(ks[3], mid_c, mid_c, mid_c),
        "block3": _resblock_params(ks[4], mid_c, mid_c, out_c),
    }


# ----------------------------------------------------------------------------
# Pure-JAX reference (mirrors the torch forward) for correctness checking.
# ----------------------------------------------------------------------------
def _ref_conv1d(x, w, b, pad):
    out = jax.lax.conv_general_dilated(
        x, w, window_strides=(1,), padding=[(pad, pad)],
        dimension_numbers=("NCH", "OIH", "NCH"))
    return out + b[None, :, None]


def _ref_bn(x, bn, eps=_BN_EPS):
    s = bn["gamma"] / jnp.sqrt(bn["rvar"] + eps)
    return (x - bn["rmean"][None, :, None]) * s[None, :, None] + bn["beta"][None, :, None]


def _ref_block(p, x):
    identity = x
    out = jax.nn.relu(_ref_bn(_ref_conv1d(x, p["conv1"]["w"], p["conv1"]["b"], 1), p["bn1"]))
    out = jax.nn.relu(_ref_bn(_ref_conv1d(out, p["conv2"]["w"], p["conv2"]["b"], 1), p["bn2"]))
    out = _ref_bn(_ref_conv1d(out, p["conv3"]["w"], p["conv3"]["b"], 1), p["bn3"])
    res = (_ref_conv1d(identity, p["adapt"]["w"], p["adapt"]["b"], 0)
           if "adapt" in p else identity)
    return jax.nn.relu(out + res)


def ref_backbone(params, x):
    out = jax.nn.relu(_ref_bn(_ref_conv1d(x, params["conv"]["w"], params["conv"]["b"], 1),
                              params["bn"]))
    out = _ref_block(params["block1"], out)
    out = _ref_block(params["block2"], out)
    out = _ref_block(params["block3"], out)
    return out.reshape(out.shape[0], -1)


if __name__ == "__main__":
    key = jax.random.PRNGKey(0)
    kx, kp = jax.random.split(key)

    B, C_in, C_mid, C_out, L = 2, 4, 8, 16, 16
    x = jax.random.normal(kx, (B, C_in, L), jnp.float32)
    params = make_backbone_params(kp, C_in, C_mid, C_out)
    packed = pack_backbone_params(params)          # one-time weight/BN packing

    fwd = jax.jit(lambda xx: backbone_forward(packed, xx))
    out = fwd(x)
    jax.block_until_ready(out)

    assert out.shape == (B, C_out * L), out.shape
    assert bool(jnp.all(jnp.isfinite(out)))
    ref = ref_backbone(params, x)
    assert jnp.allclose(out, ref, rtol=1e-3, atol=1e-3), \
        float(jnp.max(jnp.abs(out - ref)))
    print("KERNEL_OK")
</pallas_src>

<mosaic_0001>
module attributes {stable_mosaic.version = 11 : i64} {
  func.func @_backbone_kernel(%arg0: i32, %arg1: memref<2x16x128xf32, #tpu.memory_space<vmem>>, %arg2: memref<11x384x128xf32, #tpu.memory_space<vmem>>, %arg3: memref<11x1x128xf32, #tpu.memory_space<vmem>>, %arg4: memref<11x1x128xf32, #tpu.memory_space<vmem>>, %arg5: memref<2x16x128xf32, #tpu.memory_space<vmem>>) attributes {dimension_semantics = [#tpu.dimension_semantics<arbitrary>], iteration_bounds = array<i64: 1>, scalar_prefetch = 0 : i64, scratch_operands = 0 : i64, tpu.core_type = #tpu.core_type<tc>, window_params = [{pipeline_mode = #tpu.pipeline_mode<synchronous>, transform_indices = @transform_0, window_bounds = array<i64: 2, 16, 128>}, {pipeline_mode = #tpu.pipeline_mode<synchronous>, transform_indices = @transform_1, window_bounds = array<i64: 11, 384, 128>}, {pipeline_mode = #tpu.pipeline_mode<synchronous>, transform_indices = @transform_2, window_bounds = array<i64: 11, 1, 128>}, {pipeline_mode = #tpu.pipeline_mode<synchronous>, transform_indices = @transform_3, window_bounds = array<i64: 11, 1, 128>}, {pipeline_mode = #tpu.pipeline_mode<synchronous>, transform_indices = @transform_4, window_bounds = array<i64: 2, 16, 128>}]} {
    %cst = arith.constant 0.000000e+00 : f32
    %0 = vector.broadcast %cst : f32 to vector<2x1x128xf32>
    %c0 = arith.constant 0 : index
    %c0_0 = arith.constant 0 : index
    %c0_1 = arith.constant 0 : index
    %1 = vector.load %arg1[%c0, %c0_0, %c0_1] : memref<2x16x128xf32, #tpu.memory_space<vmem>>, vector<2x16x128xf32>
    %2 = vector.extract_strided_slice %1 {offsets = [0, 0, 0], sizes = [2, 15, 128], strides = [1, 1, 1]} : vector<2x16x128xf32> to vector<2x15x128xf32>
    %3 = tpu.concatenate %0, %2 in 1 : vector<2x1x128xf32>, vector<2x15x128xf32> -> vector<2x16x128xf32>
    %4 = vector.extract_strided_slice %1 {offsets = [0, 1, 0], sizes = [2, 15, 128], strides = [1, 1, 1]} : vector<2x16x128xf32> to vector<2x15x128xf32>
    %5 = tpu.concatenate %4, %0 in 1 : vector<2x15x128xf32>, vector<2x1x128xf32> -> vector<2x16x128xf32>
    %6 = tpu.concatenate %3, %1, %5 in 2 : vector<2x16x128xf32>, vector<2x16x128xf32>, vector<2x16x128xf32> -> vector<2x16x384xf32>
    %c0_2 = arith.constant 0 : index
    %c0_3 = arith.constant 0 : index
    %c0_4 = arith.constant 0 : index
    %7 = vector.load %arg2[%c0_2, %c0_3, %c0_4] : memref<11x384x128xf32, #tpu.memory_space<vmem>>, vector<1x384x128xf32>
    %8 = vector.shape_cast %7 : vector<1x384x128xf32> to vector<384x128xf32>
    %cst_5 = arith.constant dense<0.000000e+00> : vector<2x16x128xf32>
    %9 = tpu.matmul %6, %8, %cst_5 {dimension_numbers = #tpu.dot_dimension_numbers<[2], [0], [0, 1], [1], [0, 0, 0, 1, 1, 1], [], []>} : vector<2x16x384xf32>, vector<384x128xf32>, vector<2x16x128xf32> -> vector<2x16x128xf32>
    %c0_6 = arith.constant 0 : index
    %c0_7 = arith.constant 0 : index
    %c0_8 = arith.constant 0 : index
    %10 = vector.load %arg3[%c0_6, %c0_7, %c0_8] : memref<11x1x128xf32, #tpu.memory_space<vmem>>, vector<1x1x128xf32>
    %11 = vector.shape_cast %10 : vector<1x1x128xf32> to vector<1x128xf32>
    %12 = vector.shape_cast %11 : vector<1x128xf32> to vector<1x1x128xf32>
    %13 = vector.broadcast %12 : vector<1x1x128xf32> to vector<2x16x128xf32>
    %14 = arith.mulf %9, %13 : vector<2x16x128xf32>
    %c0_9 = arith.constant 0 : index
    %c0_10 = arith.constant 0 : index
    %c0_11 = arith.constant 0 : index
    %15 = vector.load %arg4[%c0_9, %c0_10, %c0_11] : memref<11x1x128xf32, #tpu.memory_space<vmem>>, vector<1x1x128xf32>
    %16 = vector.shape_cast %15 : vector<1x1x128xf32> to vector<1x128xf32>
    %17 = vector.shape_cast %16 : vector<1x128xf32> to vector<1x1x128xf32>
    %18 = vector.broadcast %17 : vector<1x1x128xf32> to vector<2x16x128xf32>
    %19 = arith.addf %14, %18 : vector<2x16x128xf32>
    %cst_12 = arith.constant 0.000000e+00 : f32
    %20 = vector.broadcast %cst_12 : f32 to vector<2x16x128xf32>
    %21 = arith.maximumf %19, %20 : vector<2x16x128xf32>
    %22 = vector.extract_strided_slice %21 {offsets = [0, 0, 0], sizes = [2, 15, 128], strides = [1, 1, 1]} : vector<2x16x128xf32> to vector<2x15x128xf32>
    %23 = tpu.concatenate %0, %22 in 1 : vector<2x1x128xf32>, vector<2x15x128xf32> -> vector<2x16x128xf32>
    %24 = vector.extract_strided_slice %21 {offsets = [0, 1, 0], sizes = [2, 15, 128], strides = [1, 1, 1]} : vector<2x16x128xf32> to vector<2x15x128xf32>
    %25 = tpu.concatenate %24, %0 in 1 : vector<2x15x128xf32>, vector<2x1x128xf32> -> vector<2x16x128xf32>
    %26 = tpu.concatenate %23, %21, %25 in 2 : vector<2x16x128xf32>, vector<2x16x128xf32>, vector<2x16x128xf32> -> vector<2x16x384xf32>
    %c1 = arith.constant 1 : index
    %c0_13 = arith.constant 0 : index
    %c0_14 = arith.constant 0 : index
    %27 = vector.load %arg2[%c1, %c0_13, %c0_14] : memref<11x384x128xf32, #tpu.memory_space<vmem>>, vector<1x384x128xf32>
    %28 = vector.shape_cast %27 : vector<1x384x128xf32> to vector<384x128xf32>
    %cst_15 = arith.constant dense<0.000000e+00> : vector<2x16x128xf32>
    %29 = tpu.matmul %26, %28, %cst_15 {dimension_numbers = #tpu.dot_dimension_numbers<[2], [0], [0, 1], [1], [0, 0, 0, 1, 1, 1], [], []>} : vector<2x16x384xf32>, vector<384x128xf32>, vector<2x16x128xf32> -> vector<2x16x128xf32>
    %c1_16 = arith.constant 1 : index
    %c0_17 = arith.constant 0 : index
    %c0_18 = arith.constant 0 : index
    %30 = vector.load %arg3[%c1_16, %c0_17, %c0_18] : memref<11x1x128xf32, #tpu.memory_space<vmem>>, vector<1x1x128xf32>
    %31 = vector.shape_cast %30 : vector<1x1x128xf32> to vector<1x128xf32>
    %32 = vector.shape_cast %31 : vector<1x128xf32> to vector<1x1x128xf32>
    %33 = vector.broadcast %32 : vector<1x1x128xf32> to vector<2x16x128xf32>
    %34 = arith.mulf %29, %33 : vector<2x16x128xf32>
    %c1_19 = arith.constant 1 : index
    %c0_20 = arith.constant 0 : index
    %c0_21 = arith.constant 0 : index
    %35 = vector.load %arg4[%c1_19, %c0_20, %c0_21] : memref<11x1x128xf32, #tpu.memory_space<vmem>>, vector<1x1x128xf32>
    %36 = vector.shape_cast %35 : vector<1x1x128xf32> to vector<1x128xf32>
    %37 = vector.shape_cast %36 : vector<1x128xf32> to vector<1x1x128xf32>
    %38 = vector.broadcast %37 : vector<1x1x128xf32> to vector<2x16x128xf32>
    %39 = arith.addf %34, %38 : vector<2x16x128xf32>
    %cst_22 = arith.constant 0.000000e+00 : f32
    %40 = vector.broadcast %cst_22 : f32 to vector<2x16x128xf32>
    %41 = arith.maximumf %39, %40 : vector<2x16x128xf32>
    %42 = vector.extract_strided_slice %41 {offsets = [0, 0, 0], sizes = [2, 15, 128], strides = [1, 1, 1]} : vector<2x16x128xf32> to vector<2x15x128xf32>
    %43 = tpu.concatenate %0, %42 in 1 : vector<2x1x128xf32>, vector<2x15x128xf32> -> vector<2x16x128xf32>
    %44 = vector.extract_strided_slice %41 {offsets = [0, 1, 0], sizes = [2, 15, 128], strides = [1, 1, 1]} : vector<2x16x128xf32> to vector<2x15x128xf32>
    %45 = tpu.concatenate %44, %0 in 1 : vector<2x15x128xf32>, vector<2x1x128xf32> -> vector<2x16x128xf32>
    %46 = tpu.concatenate %43, %41, %45 in 2 : vector<2x16x128xf32>, vector<2x16x128xf32>, vector<2x16x128xf32> -> vector<2x16x384xf32>
    %c2 = arith.constant 2 : index
    %c0_23 = arith.constant 0 : index
    %c0_24 = arith.constant 0 : index
    %47 = vector.load %arg2[%c2, %c0_23, %c0_24] : memref<11x384x128xf32, #tpu.memory_space<vmem>>, vector<1x384x128xf32>
    %48 = vector.shape_cast %47 : vector<1x384x128xf32> to vector<384x128xf32>
    %cst_25 = arith.constant dense<0.000000e+00> : vector<2x16x128xf32>
    %49 = tpu.matmul %46, %48, %cst_25 {dimension_numbers = #tpu.dot_dimension_numbers<[2], [0], [0, 1], [1], [0, 0, 0, 1, 1, 1], [], []>} : vector<2x16x384xf32>, vector<384x128xf32>, vector<2x16x128xf32> -> vector<2x16x128xf32>
    %c2_26 = arith.constant 2 : index
    %c0_27 = arith.constant 0 : index
    %c0_28 = arith.constant 0 : index
    %50 = vector.load %arg3[%c2_26, %c0_27, %c0_28] : memref<11x1x128xf32, #tpu.memory_space<vmem>>, vector<1x1x128xf32>
    %51 = vector.shape_cast %50 : vector<1x1x128xf32> to vector<1x128xf32>
    %52 = vector.shape_cast %51 : vector<1x128xf32> to vector<1x1x128xf32>
    %53 = vector.broadcast %52 : vector<1x1x128xf32> to vector<2x16x128xf32>
    %54 = arith.mulf %49, %53 : vector<2x16x128xf32>
    %c2_29 = arith.constant 2 : index
    %c0_30 = arith.constant 0 : index
    %c0_31 = arith.constant 0 : index
    %55 = vector.load %arg4[%c2_29, %c0_30, %c0_31] : memref<11x1x128xf32, #tpu.memory_space<vmem>>, vector<1x1x128xf32>
    %56 = vector.shape_cast %55 : vector<1x1x128xf32> to vector<1x128xf32>
    %57 = vector.shape_cast %56 : vector<1x128xf32> to vector<1x1x128xf32>
    %58 = vector.broadcast %57 : vector<1x1x128xf32> to vector<2x16x128xf32>
    %59 = arith.addf %54, %58 : vector<2x16x128xf32>
    %cst_32 = arith.constant 0.000000e+00 : f32
    %60 = vector.broadcast %cst_32 : f32 to vector<2x16x128xf32>
    %61 = arith.maximumf %59, %60 : vector<2x16x128xf32>
    %62 = vector.extract_strided_slice %61 {offsets = [0, 0, 0], sizes = [2, 15, 128], strides = [1, 1, 1]} : vector<2x16x128xf32> to vector<2x15x128xf32>
    %63 = tpu.concatenate %0, %62 in 1 : vector<2x1x128xf32>, vector<2x15x128xf32> -> vector<2x16x128xf32>
    %64 = vector.extract_strided_slice %61 {offsets = [0, 1, 0], sizes = [2, 15, 128], strides = [1, 1, 1]} : vector<2x16x128xf32> to vector<2x15x128xf32>
    %65 = tpu.concatenate %64, %0 in 1 : vector<2x15x128xf32>, vector<2x1x128xf32> -> vector<2x16x128xf32>
    %66 = tpu.concatenate %63, %61, %65 in 2 : vector<2x16x128xf32>, vector<2x16x128xf32>, vector<2x16x128xf32> -> vector<2x16x384xf32>
    %c3 = arith.constant 3 : index
    %c0_33 = arith.constant 0 : index
    %c0_34 = arith.constant 0 : index
    %67 = vector.load %arg2[%c3, %c0_33, %c0_34] : memref<11x384x128xf32, #tpu.memory_space<vmem>>, vector<1x384x128xf32>
    %68 = vector.shape_cast %67 : vector<1x384x128xf32> to vector<384x128xf32>
    %cst_35 = arith.constant dense<0.000000e+00> : vector<2x16x128xf32>
    %69 = tpu.matmul %66, %68, %cst_35 {dimension_numbers = #tpu.dot_dimension_numbers<[2], [0], [0, 1], [1], [0, 0, 0, 1, 1, 1], [], []>} : vector<2x16x384xf32>, vector<384x128xf32>, vector<2x16x128xf32> -> vector<2x16x128xf32>
    %c3_36 = arith.constant 3 : index
    %c0_37 = arith.constant 0 : index
    %c0_38 = arith.constant 0 : index
    %70 = vector.load %arg3[%c3_36, %c0_37, %c0_38] : memref<11x1x128xf32, #tpu.memory_space<vmem>>, vector<1x1x128xf32>
    %71 = vector.shape_cast %70 : vector<1x1x128xf32> to vector<1x128xf32>
    %72 = vector.shape_cast %71 : vector<1x128xf32> to vector<1x1x128xf32>
    %73 = vector.broadcast %72 : vector<1x1x128xf32> to vector<2x16x128xf32>
    %74 = arith.mulf %69, %73 : vector<2x16x128xf32>
    %c3_39 = arith.constant 3 : index
    %c0_40 = arith.constant 0 : index
    %c0_41 = arith.constant 0 : index
    %75 = vector.load %arg4[%c3_39, %c0_40, %c0_41] : memref<11x1x128xf32, #tpu.memory_space<vmem>>, vector<1x1x128xf32>
    %76 = vector.shape_cast %75 : vector<1x1x128xf32> to vector<1x128xf32>
    %77 = vector.shape_cast %76 : vector<1x128xf32> to vector<1x1x128xf32>
    %78 = vector.broadcast %77 : vector<1x1x128xf32> to vector<2x16x128xf32>
    %79 = arith.addf %74, %78 : vector<2x16x128xf32>
    %80 = arith.addf %79, %21 : vector<2x16x128xf32>
    %cst_42 = arith.constant 0.000000e+00 : f32
    %81 = vector.broadcast %cst_42 : f32 to vector<2x16x128xf32>
    %82 = arith.maximumf %80, %81 : vector<2x16x128xf32>
    %83 = vector.extract_strided_slice %82 {offsets = [0, 0, 0], sizes = [2, 15, 128], strides = [1, 1, 1]} : vector<2x16x128xf32> to vector<2x15x128xf32>
    %84 = tpu.concatenate %0, %83 in 1 : vector<2x1x128xf32>, vector<2x15x128xf32> -> vector<2x16x128xf32>
    %85 = vector.extract_strided_slice %82 {offsets = [0, 1, 0], sizes = [2, 15, 128], strides = [1, 1, 1]} : vector<2x16x128xf32> to vector<2x15x128xf32>
    %86 = tpu.concatenate %85, %0 in 1 : vector<2x15x128xf32>, vector<2x1x128xf32> -> vector<2x16x128xf32>
    %87 = tpu.concatenate %84, %82, %86 in 2 : vector<2x16x128xf32>, vector<2x16x128xf32>, vector<2x16x128xf32> -> vector<2x16x384xf32>
    %c4 = arith.constant 4 : index
    %c0_43 = arith.constant 0 : index
    %c0_44 = arith.constant 0 : index
    %88 = vector.load %arg2[%c4, %c0_43, %c0_44] : memref<11x384x128xf32, #tpu.memory_space<vmem>>, vector<1x384x128xf32>
    %89 = vector.shape_cast %88 : vector<1x384x128xf32> to vector<384x128xf32>
    %cst_45 = arith.constant dense<0.000000e+00> : vector<2x16x128xf32>
    %90 = tpu.matmul %87, %89, %cst_45 {dimension_numbers = #tpu.dot_dimension_numbers<[2], [0], [0, 1], [1], [0, 0, 0, 1, 1, 1], [], []>} : vector<2x16x384xf32>, vector<384x128xf32>, vector<2x16x128xf32> -> vector<2x16x128xf32>
    %c4_46 = arith.constant 4 : index
    %c0_47 = arith.constant 0 : index
    %c0_48 = arith.constant 0 : index
    %91 = vector.load %arg3[%c4_46, %c0_47, %c0_48] : memref<11x1x128xf32, #tpu.memory_space<vmem>>, vector<1x1x128xf32>
    %92 = vector.shape_cast %91 : vector<1x1x128xf32> to vector<1x128xf32>
    %93 = vector.shape_cast %92 : vector<1x128xf32> to vector<1x1x128xf32>
    %94 = vector.broadcast %93 : vector<1x1x128xf32> to vector<2x16x128xf32>
    %95 = arith.mulf %90, %94 : vector<2x16x128xf32>
    %c4_49 = arith.constant 4 : index
    %c0_50 = arith.constant 0 : index
    %c0_51 = arith.constant 0 : index
    %96 = vector.load %arg4[%c4_49, %c0_50, %c0_51] : memref<11x1x128xf32, #tpu.memory_space<vmem>>, vector<1x1x128xf32>
    %97 = vector.shape_cast %96 : vector<1x1x128xf32> to vector<1x128xf32>
    %98 = vector.shape_cast %97 : vector<1x128xf32> to vector<1x1x128xf32>
    %99 = vector.broadcast %98 : vector<1x1x128xf32> to vector<2x16x128xf32>
    %100 = arith.addf %95, %99 : vector<2x16x128xf32>
    %cst_52 = arith.constant 0.000000e+00 : f32
    %101 = vector.broadcast %cst_52 : f32 to vector<2x16x128xf32>
    %102 = arith.maximumf %100, %101 : vector<2x16x128xf32>
    %103 = vector.extract_strided_slice %102 {offsets = [0, 0, 0], sizes = [2, 15, 128], strides = [1, 1, 1]} : vector<2x16x128xf32> to vector<2x15x128xf32>
    %104 = tpu.concatenate %0, %103 in 1 : vector<2x1x128xf32>, vector<2x15x128xf32> -> vector<2x16x128xf32>
    %105 = vector.extract_strided_slice %102 {offsets = [0, 1, 0], sizes = [2, 15, 128], strides = [1, 1, 1]} : vector<2x16x128xf32> to vector<2x15x128xf32>
    %106 = tpu.concatenate %105, %0 in 1 : vector<2x15x128xf32>, vector<2x1x128xf32> -> vector<2x16x128xf32>
    %107 = tpu.concatenate %104, %102, %106 in 2 : vector<2x16x128xf32>, vector<2x16x128xf32>, vector<2x16x128xf32> -> vector<2x16x384xf32>
    %c5 = arith.constant 5 : index
    %c0_53 = arith.constant 0 : index
    %c0_54 = arith.constant 0 : index
    %108 = vector.load %arg2[%c5, %c0_53, %c0_54] : memref<11x384x128xf32, #tpu.memory_space<vmem>>, vector<1x384x128xf32>
    %109 = vector.shape_cast %108 : vector<1x384x128xf32> to vector<384x128xf32>
    %cst_55 = arith.constant dense<0.000000e+00> : vector<2x16x128xf32>
    %110 = tpu.matmul %107, %109, %cst_55 {dimension_numbers = #tpu.dot_dimension_numbers<[2], [0], [0, 1], [1], [0, 0, 0, 1, 1, 1], [], []>} : vector<2x16x384xf32>, vector<384x128xf32>, vector<2x16x128xf32> -> vector<2x16x128xf32>
    %c5_56 = arith.constant 5 : index
    %c0_57 = arith.constant 0 : index
    %c0_58 = arith.constant 0 : index
    %111 = vector.load %arg3[%c5_56, %c0_57, %c0_58] : memref<11x1x128xf32, #tpu.memory_space<vmem>>, vector<1x1x128xf32>
    %112 = vector.shape_cast %111 : vector<1x1x128xf32> to vector<1x128xf32>
    %113 = vector.shape_cast %112 : vector<1x128xf32> to vector<1x1x128xf32>
    %114 = vector.broadcast %113 : vector<1x1x128xf32> to vector<2x16x128xf32>
    %115 = arith.mulf %110, %114 : vector<2x16x128xf32>
    %c5_59 = arith.constant 5 : index
    %c0_60 = arith.constant 0 : index
    %c0_61 = arith.constant 0 : index
    %116 = vector.load %arg4[%c5_59, %c0_60, %c0_61] : memref<11x1x128xf32, #tpu.memory_space<vmem>>, vector<1x1x128xf32>
    %117 = vector.shape_cast %116 : vector<1x1x128xf32> to vector<1x128xf32>
    %118 = vector.shape_cast %117 : vector<1x128xf32> to vector<1x1x128xf32>
    %119 = vector.broadcast %118 : vector<1x1x128xf32> to vector<2x16x128xf32>
    %120 = arith.addf %115, %119 : vector<2x16x128xf32>
    %cst_62 = arith.constant 0.000000e+00 : f32
    %121 = vector.broadcast %cst_62 : f32 to vector<2x16x128xf32>
    %122 = arith.maximumf %120, %121 : vector<2x16x128xf32>
    %123 = vector.extract_strided_slice %122 {offsets = [0, 0, 0], sizes = [2, 15, 128], strides = [1, 1, 1]} : vector<2x16x128xf32> to vector<2x15x128xf32>
    %124 = tpu.concatenate %0, %123 in 1 : vector<2x1x128xf32>, vector<2x15x128xf32> -> vector<2x16x128xf32>
    %125 = vector.extract_strided_slice %122 {offsets = [0, 1, 0], sizes = [2, 15, 128], strides = [1, 1, 1]} : vector<2x16x128xf32> to vector<2x15x128xf32>
    %126 = tpu.concatenate %125, %0 in 1 : vector<2x15x128xf32>, vector<2x1x128xf32> -> vector<2x16x128xf32>
    %127 = tpu.concatenate %124, %122, %126 in 2 : vector<2x16x128xf32>, vector<2x16x128xf32>, vector<2x16x128xf32> -> vector<2x16x384xf32>
    %c6 = arith.constant 6 : index
    %c0_63 = arith.constant 0 : index
    %c0_64 = arith.constant 0 : index
    %128 = vector.load %arg2[%c6, %c0_63, %c0_64] : memref<11x384x128xf32, #tpu.memory_space<vmem>>, vector<1x384x128xf32>
    %129 = vector.shape_cast %128 : vector<1x384x128xf32> to vector<384x128xf32>
    %cst_65 = arith.constant dense<0.000000e+00> : vector<2x16x128xf32>
    %130 = tpu.matmul %127, %129, %cst_65 {dimension_numbers = #tpu.dot_dimension_numbers<[2], [0], [0, 1], [1], [0, 0, 0, 1, 1, 1], [], []>} : vector<2x16x384xf32>, vector<384x128xf32>, vector<2x16x128xf32> -> vector<2x16x128xf32>
    %c6_66 = arith.constant 6 : index
    %c0_67 = arith.constant 0 : index
    %c0_68 = arith.constant 0 : index
    %131 = vector.load %arg3[%c6_66, %c0_67, %c0_68] : memref<11x1x128xf32, #tpu.memory_space<vmem>>, vector<1x1x128xf32>
    %132 = vector.shape_cast %131 : vector<1x1x128xf32> to vector<1x128xf32>
    %133 = vector.shape_cast %132 : vector<1x128xf32> to vector<1x1x128xf32>
    %134 = vector.broadcast %133 : vector<1x1x128xf32> to vector<2x16x128xf32>
    %135 = arith.mulf %130, %134 : vector<2x16x128xf32>
    %c6_69 = arith.constant 6 : index
    %c0_70 = arith.constant 0 : index
    %c0_71 = arith.constant 0 : index
    %136 = vector.load %arg4[%c6_69, %c0_70, %c0_71] : memref<11x1x128xf32, #tpu.memory_space<vmem>>, vector<1x1x128xf32>
    %137 = vector.shape_cast %136 : vector<1x1x128xf32> to vector<1x128xf32>
    %138 = vector.shape_cast %137 : vector<1x128xf32> to vector<1x1x128xf32>
    %139 = vector.broadcast %138 : vector<1x1x128xf32> to vector<2x16x128xf32>
    %140 = arith.addf %135, %139 : vector<2x16x128xf32>
    %141 = arith.addf %140, %82 : vector<2x16x128xf32>
    %cst_72 = arith.constant 0.000000e+00 : f32
    %142 = vector.broadcast %cst_72 : f32 to vector<2x16x128xf32>
    %143 = arith.maximumf %141, %142 : vector<2x16x128xf32>
    %144 = vector.extract_strided_slice %143 {offsets = [0, 0, 0], sizes = [2, 15, 128], strides = [1, 1, 1]} : vector<2x16x128xf32> to vector<2x15x128xf32>
    %145 = tpu.concatenate %0, %144 in 1 : vector<2x1x128xf32>, vector<2x15x128xf32> -> vector<2x16x128xf32>
    %146 = vector.extract_strided_slice %143 {offsets = [0, 1, 0], sizes = [2, 15, 128], strides = [1, 1, 1]} : vector<2x16x128xf32> to vector<2x15x128xf32>
    %147 = tpu.concatenate %146, %0 in 1 : vector<2x15x128xf32>, vector<2x1x128xf32> -> vector<2x16x128xf32>
    %148 = tpu.concatenate %145, %143, %147 in 2 : vector<2x16x128xf32>, vector<2x16x128xf32>, vector<2x16x128xf32> -> vector<2x16x384xf32>
    %c7 = arith.constant 7 : index
    %c0_73 = arith.constant 0 : index
    %c0_74 = arith.constant 0 : index
    %149 = vector.load %arg2[%c7, %c0_73, %c0_74] : memref<11x384x128xf32, #tpu.memory_space<vmem>>, vector<1x384x128xf32>
    %150 = vector.shape_cast %149 : vector<1x384x128xf32> to vector<384x128xf32>
    %cst_75 = arith.constant dense<0.000000e+00> : vector<2x16x128xf32>
    %151 = tpu.matmul %148, %150, %cst_75 {dimension_numbers = #tpu.dot_dimension_numbers<[2], [0], [0, 1], [1], [0, 0, 0, 1, 1, 1], [], []>} : vector<2x16x384xf32>, vector<384x128xf32>, vector<2x16x128xf32> -> vector<2x16x128xf32>
    %c7_76 = arith.constant 7 : index
    %c0_77 = arith.constant 0 : index
    %c0_78 = arith.constant 0 : index
    %152 = vector.load %arg3[%c7_76, %c0_77, %c0_78] : memref<11x1x128xf32, #tpu.memory_space<vmem>>, vector<1x1x128xf32>
    %153 = vector.shape_cast %152 : vector<1x1x128xf32> to vector<1x128xf32>
    %154 = vector.shape_cast %153 : vector<1x128xf32> to vector<1x1x128xf32>
    %155 = vector.broadcast %154 : vector<1x1x128xf32> to vector<2x16x128xf32>
    %156 = arith.mulf %151, %155 : vector<2x16x128xf32>
    %c7_79 = arith.constant 7 : index
    %c0_80 = arith.constant 0 : index
    %c0_81 = arith.constant 0 : index
    %157 = vector.load %arg4[%c7_79, %c0_80, %c0_81] : memref<11x1x128xf32, #tpu.memory_space<vmem>>, vector<1x1x128xf32>
    %158 = vector.shape_cast %157 : vector<1x1x128xf32> to vector<1x128xf32>
    %159 = vector.shape_cast %158 : vector<1x128xf32> to vector<1x1x128xf32>
    %160 = vector.broadcast %159 : vector<1x1x128xf32> to vector<2x16x128xf32>
    %161 = arith.addf %156, %160 : vector<2x16x128xf32>
    %cst_82 = arith.constant 0.000000e+00 : f32
    %162 = vector.broadcast %cst_82 : f32 to vector<2x16x128xf32>
    %163 = arith.maximumf %161, %162 : vector<2x16x128xf32>
    %164 = vector.extract_strided_slice %163 {offsets = [0, 0, 0], sizes = [2, 15, 128], strides = [1, 1, 1]} : vector<2x16x128xf32> to vector<2x15x128xf32>
    %165 = tpu.concatenate %0, %164 in 1 : vector<2x1x128xf32>, vector<2x15x128xf32> -> vector<2x16x128xf32>
    %166 = vector.extract_strided_slice %163 {offsets = [0, 1, 0], sizes = [2, 15, 128], strides = [1, 1, 1]} : vector<2x16x128xf32> to vector<2x15x128xf32>
    %167 = tpu.concatenate %166, %0 in 1 : vector<2x15x128xf32>, vector<2x1x128xf32> -> vector<2x16x128xf32>
    %168 = tpu.concatenate %165, %163, %167 in 2 : vector<2x16x128xf32>, vector<2x16x128xf32>, vector<2x16x128xf32> -> vector<2x16x384xf32>
    %c8 = arith.constant 8 : index
    %c0_83 = arith.constant 0 : index
    %c0_84 = arith.constant 0 : index
    %169 = vector.load %arg2[%c8, %c0_83, %c0_84] : memref<11x384x128xf32, #tpu.memory_space<vmem>>, vector<1x384x128xf32>
    %170 = vector.shape_cast %169 : vector<1x384x128xf32> to vector<384x128xf32>
    %cst_85 = arith.constant dense<0.000000e+00> : vector<2x16x128xf32>
    %171 = tpu.matmul %168, %170, %cst_85 {dimension_numbers = #tpu.dot_dimension_numbers<[2], [0], [0, 1], [1], [0, 0, 0, 1, 1, 1], [], []>} : vector<2x16x384xf32>, vector<384x128xf32>, vector<2x16x128xf32> -> vector<2x16x128xf32>
    %c8_86 = arith.constant 8 : index
    %c0_87 = arith.constant 0 : index
    %c0_88 = arith.constant 0 : index
    %172 = vector.load %arg3[%c8_86, %c0_87, %c0_88] : memref<11x1x128xf32, #tpu.memory_space<vmem>>, vector<1x1x128xf32>
    %173 = vector.shape_cast %172 : vector<1x1x128xf32> to vector<1x128xf32>
    %174 = vector.shape_cast %173 : vector<1x128xf32> to vector<1x1x128xf32>
    %175 = vector.broadcast %174 : vector<1x1x128xf32> to vector<2x16x128xf32>
    %176 = arith.mulf %171, %175 : vector<2x16x128xf32>
    %c8_89 = arith.constant 8 : index
    %c0_90 = arith.constant 0 : index
    %c0_91 = arith.constant 0 : index
    %177 = vector.load %arg4[%c8_89, %c0_90, %c0_91] : memref<11x1x128xf32, #tpu.memory_space<vmem>>, vector<1x1x128xf32>
    %178 = vector.shape_cast %177 : vector<1x1x128xf32> to vector<1x128xf32>
    %179 = vector.shape_cast %178 : vector<1x128xf32> to vector<1x1x128xf32>
    %180 = vector.broadcast %179 : vector<1x1x128xf32> to vector<2x16x128xf32>
    %181 = arith.addf %176, %180 : vector<2x16x128xf32>
    %cst_92 = arith.constant 0.000000e+00 : f32
    %182 = vector.broadcast %cst_92 : f32 to vector<2x16x128xf32>
    %183 = arith.maximumf %181, %182 : vector<2x16x128xf32>
    %184 = vector.extract_strided_slice %143 {offsets = [0, 0, 0], sizes = [2, 15, 128], strides = [1, 1, 1]} : vector<2x16x128xf32> to vector<2x15x128xf32>
    %185 = tpu.concatenate %0, %184 in 1 : vector<2x1x128xf32>, vector<2x15x128xf32> -> vector<2x16x128xf32>
    %186 = vector.extract_strided_slice %143 {offsets = [0, 1, 0], sizes = [2, 15, 128], strides = [1, 1, 1]} : vector<2x16x128xf32> to vector<2x15x128xf32>
    %187 = tpu.concatenate %186, %0 in 1 : vector<2x15x128xf32>, vector<2x1x128xf32> -> vector<2x16x128xf32>
    %188 = tpu.concatenate %185, %143, %187 in 2 : vector<2x16x128xf32>, vector<2x16x128xf32>, vector<2x16x128xf32> -> vector<2x16x384xf32>
    %c10 = arith.constant 10 : index
    %c0_93 = arith.constant 0 : index
    %c0_94 = arith.constant 0 : index
    %189 = vector.load %arg2[%c10, %c0_93, %c0_94] : memref<11x384x128xf32, #tpu.memory_space<vmem>>, vector<1x384x128xf32>
    %190 = vector.shape_cast %189 : vector<1x384x128xf32> to vector<384x128xf32>
    %cst_95 = arith.constant dense<0.000000e+00> : vector<2x16x128xf32>
    %191 = tpu.matmul %188, %190, %cst_95 {dimension_numbers = #tpu.dot_dimension_numbers<[2], [0], [0, 1], [1], [0, 0, 0, 1, 1, 1], [], []>} : vector<2x16x384xf32>, vector<384x128xf32>, vector<2x16x128xf32> -> vector<2x16x128xf32>
    %c10_96 = arith.constant 10 : index
    %c0_97 = arith.constant 0 : index
    %c0_98 = arith.constant 0 : index
    %192 = vector.load %arg3[%c10_96, %c0_97, %c0_98] : memref<11x1x128xf32, #tpu.memory_space<vmem>>, vector<1x1x128xf32>
    %193 = vector.shape_cast %192 : vector<1x1x128xf32> to vector<1x128xf32>
    %194 = vector.shape_cast %193 : vector<1x128xf32> to vector<1x1x128xf32>
    %195 = vector.broadcast %194 : vector<1x1x128xf32> to vector<2x16x128xf32>
    %196 = arith.mulf %191, %195 : vector<2x16x128xf32>
    %c10_99 = arith.constant 10 : index
    %c0_100 = arith.constant 0 : index
    %c0_101 = arith.constant 0 : index
    %197 = vector.load %arg4[%c10_99, %c0_100, %c0_101] : memref<11x1x128xf32, #tpu.memory_space<vmem>>, vector<1x1x128xf32>
    %198 = vector.shape_cast %197 : vector<1x1x128xf32> to vector<1x128xf32>
    %199 = vector.shape_cast %198 : vector<1x128xf32> to vector<1x1x128xf32>
    %200 = vector.broadcast %199 : vector<1x1x128xf32> to vector<2x16x128xf32>
    %201 = arith.addf %196, %200 : vector<2x16x128xf32>
    %202 = vector.extract_strided_slice %183 {offsets = [0, 0, 0], sizes = [2, 15, 128], strides = [1, 1, 1]} : vector<2x16x128xf32> to vector<2x15x128xf32>
    %203 = tpu.concatenate %0, %202 in 1 : vector<2x1x128xf32>, vector<2x15x128xf32> -> vector<2x16x128xf32>
    %204 = vector.extract_strided_slice %183 {offsets = [0, 1, 0], sizes = [2, 15, 128], strides = [1, 1, 1]} : vector<2x16x128xf32> to vector<2x15x128xf32>
    %205 = tpu.concatenate %204, %0 in 1 : vector<2x15x128xf32>, vector<2x1x128xf32> -> vector<2x16x128xf32>
    %206 = tpu.concatenate %203, %183, %205 in 2 : vector<2x16x128xf32>, vector<2x16x128xf32>, vector<2x16x128xf32> -> vector<2x16x384xf32>
    %c9 = arith.constant 9 : index
    %c0_102 = arith.constant 0 : index
    %c0_103 = arith.constant 0 : index
    %207 = vector.load %arg2[%c9, %c0_102, %c0_103] : memref<11x384x128xf32, #tpu.memory_space<vmem>>, vector<1x384x128xf32>
    %208 = vector.shape_cast %207 : vector<1x384x128xf32> to vector<384x128xf32>
    %cst_104 = arith.constant dense<0.000000e+00> : vector<2x16x128xf32>
    %209 = tpu.matmul %206, %208, %cst_104 {dimension_numbers = #tpu.dot_dimension_numbers<[2], [0], [0, 1], [1], [0, 0, 0, 1, 1, 1], [], []>} : vector<2x16x384xf32>, vector<384x128xf32>, vector<2x16x128xf32> -> vector<2x16x128xf32>
    %c9_105 = arith.constant 9 : index
    %c0_106 = arith.constant 0 : index
    %c0_107 = arith.constant 0 : index
    %210 = vector.load %arg3[%c9_105, %c0_106, %c0_107] : memref<11x1x128xf32, #tpu.memory_space<vmem>>, vector<1x1x128xf32>
    %211 = vector.shape_cast %210 : vector<1x1x128xf32> to vector<1x128xf32>
    %212 = vector.shape_cast %211 : vector<1x128xf32> to vector<1x1x128xf32>
    %213 = vector.broadcast %212 : vector<1x1x128xf32> to vector<2x16x128xf32>
    %214 = arith.mulf %209, %213 : vector<2x16x128xf32>
    %c9_108 = arith.constant 9 : index
    %c0_109 = arith.constant 0 : index
    %c0_110 = arith.constant 0 : index
    %215 = vector.load %arg4[%c9_108, %c0_109, %c0_110] : memref<11x1x128xf32, #tpu.memory_space<vmem>>, vector<1x1x128xf32>
    %216 = vector.shape_cast %215 : vector<1x1x128xf32> to vector<1x128xf32>
    %217 = vector.shape_cast %216 : vector<1x128xf32> to vector<1x1x128xf32>
    %218 = vector.broadcast %217 : vector<1x1x128xf32> to vector<2x16x128xf32>
    %219 = arith.addf %214, %218 : vector<2x16x128xf32>
    %220 = arith.addf %219, %201 : vector<2x16x128xf32>
    %cst_111 = arith.constant 0.000000e+00 : f32
    %221 = vector.broadcast %cst_111 : f32 to vector<2x16x128xf32>
    %222 = arith.maximumf %220, %221 : vector<2x16x128xf32>
    %c0_112 = arith.constant 0 : index
    %c0_113 = arith.constant 0 : index
    %c0_114 = arith.constant 0 : index
    %223 = vector.load %arg5[%c0_112, %c0_113, %c0_114] : memref<2x16x128xf32, #tpu.memory_space<vmem>>, vector<2x16x128xf32>
    tpu.vector_store %arg5[%c0_112, %c0_113, %c0_114], %222 {strides = array<i32>} : memref<2x16x128xf32, #tpu.memory_space<vmem>>, vector<2x16x128xf32>,
    return
  }
  func.func @transform_0(%arg0: i32) -> (i32, i32, i32) {
    %c0_i32 = arith.constant 0 : i32
    %c0_i32_0 = arith.constant 0 : i32
    %c0_i32_1 = arith.constant 0 : i32
    %c0_i32_2 = arith.constant 0 : i32
    return %c0_i32, %c0_i32_0, %c0_i32_1 : i32, i32, i32
  }
  func.func @transform_1(%arg0: i32) -> (i32, i32, i32) {
    %c0_i32 = arith.constant 0 : i32
    %c0_i32_0 = arith.constant 0 : i32
    %c0_i32_1 = arith.constant 0 : i32
    %c0_i32_2 = arith.constant 0 : i32
    return %c0_i32, %c0_i32_0, %c0_i32_1 : i32, i32, i32
  }
  func.func @transform_2(%arg0: i32) -> (i32, i32, i32) {
    %c0_i32 = arith.constant 0 : i32
    %c0_i32_0 = arith.constant 0 : i32
    %c0_i32_1 = arith.constant 0 : i32
    %c0_i32_2 = arith.constant 0 : i32
    return %c0_i32, %c0_i32_0, %c0_i32_1 : i32, i32, i32
  }
  func.func @transform_3(%arg0: i32) -> (i32, i32, i32) {
    %c0_i32 = arith.constant 0 : i32
    %c0_i32_0 = arith.constant 0 : i32
    %c0_i32_1 = arith.constant 0 : i32
    %c0_i32_2 = arith.constant 0 : i32
    return %c0_i32, %c0_i32_0, %c0_i32_1 : i32, i32, i32
  }
  func.func @transform_4(%arg0: i32) -> (i32, i32, i32) {
    %c0_i32 = arith.constant 0 : i32
    %c0_i32_0 = arith.constant 0 : i32
    %c0_i32_1 = arith.constant 0 : i32
    %c0_i32_2 = arith.constant 0 : i32
    return %c0_i32, %c0_i32_0, %c0_i32_1 : i32, i32, i32
  }
}

</mosaic_0001>

<bundles_post_ra>
// kernel: _lambda_.1
= control target key start
LH: loop header
LB: loop body
LE: loop exit
PB: predicated region body
PF: predicated region fallthrough
CT: control target
= control target key end

     0   :  { %9 = vsyncpa [#allocation3], 0  ;;  %s5440_s0 = inlined_call_operand.vmem [shape: f32[2,16,128], index: 0, kind: input, shape index: {}]   ;;  %s5441_s1 = inlined_call_operand.hbm [shape: f32[11,384,128], index: 1, kind: input, shape index: {}]   ;;  %s5442_s2 = inlined_call_operand.hbm [shape: f32[11,1,128], index: 2, kind: input, shape index: {}]   ;;  %s5443_s3 = inlined_call_operand.hbm [shape: f32[11,1,128], index: 3, kind: input, shape index: {}]   ;;  %s5444_s4 = inlined_call_operand.vmem [shape: f32[2,16,128], index: 4, kind: output, shape index: {}]  }
   0x1   :  { %10 = vsyncpa [#allocation5], 0  ;;  %s5067_s15 = smov [#allocation4]   ;;  %s4997_s19 = scalar_lea.hbm %s5442_s2, 176 }
   0x2   :  { %s30_s16 = sshll.u32 %s5067_s15, 4  ;;  %p4998_p0 = scmp.ne.s32.totalorder %s5442_s2, %s4997_s19  ;;  %s31_s16 = int_to_ptr.vmem [resolvable:$true] %s30_s16 }
   0x3   :  { %p5001_p1 = scmp.lt.u32.totalorder %s4997_s19, %s5442_s2 }
   0x5   :  { %p5003_p2 = pnand %p5001_p1, %p4998_p0 }
   0x7   :  { %5006 = shalt.err (!%p5003_p2)
}
   0x8   :  { %s5007_s24 = scalar_lea.vmem %s31_s16, 176  ;;  %s5011_s25 = scalar_lea.vmem %s31_s16, 192 }
   0x9   :  { %p5008_p3 = scmp.ne.s32.totalorder %s31_s16, %s5007_s24  ;;  %p5012_p4 = scmp.lt.s32.totalorder %s31_s16, %s31_s16 }
   0xa   :  { %p5013_p5 = scmp.lt.s32.totalorder %s5011_s25, %s5007_s24 }
   0xc   :  { %p5014_p6 = por %p5013_p5, %p5012_p4 }
   0xe   :  { %p5015_p7 = pnand %p5014_p6, %p5008_p3 }
  0x10   :  { %5018 = shalt.err (!%p5015_p7)
}
  0x11   :  { %s5068_s26 = smov 16   ;;  %s5069_s27 = smov 1  }
  0x12   :  { %36 = dma.hbm_to_vmem [thread:$0]  %s5442_s2, 176, %s31_s16, [#allocation5], %s5068_s26, %s5068_s26, %s5069_s27  }
  0x13   :  { %s5070_s30 = smov [#allocation2]   ;;  %s5019_s8 = scalar_lea.hbm %s5441_s1, 67584 }
  0x14   :  { %s18_s5 = sshll.u32 %s5070_s30, 4  ;;  %p5020_p8 = scmp.ne.s32.totalorder %s5441_s1, %s5019_s8  ;;  %s19_s5 = int_to_ptr.vmem [resolvable:$true] %s18_s5 }
  0x15   :  { %p5023_p9 = scmp.lt.u32.totalorder %s5019_s8, %s5441_s1 }
  0x17   :  { %p5025_p10 = pnand %p5023_p9, %p5020_p8 }
  0x19   :  { %5028 = shalt.err (!%p5025_p10)
}
  0x1a   :  { %s5029_s13 = scalar_lea.vmem %s19_s5, 67584  ;;  %p5034_p12 = scmp.lt.s32.totalorder %s19_s5, %s19_s5 }
  0x1b   :  { %p5030_p11 = scmp.ne.s32.totalorder %s19_s5, %s5029_s13  ;;  %p5035_p13 = scmp.lt.s32.totalorder %s5029_s13, %s5029_s13 }
  0x1d   :  { %p5036_p0 = por %p5035_p13, %p5034_p12 }
  0x1f   :  { %p5037_p1 = pnand %p5036_p0, %p5030_p11 }
  0x21   :  { %5040 = shalt.err (!%p5037_p1)
}
  0x22   :  { %s5071_s2 = smov 128   ;;  %s5072_s14 = smov 8  }
  0x23   :  { %24 = dma.hbm_to_vmem [thread:$0]  %s5441_s1, 67584, %s19_s5, [#allocation3], %s5071_s2, %s5071_s2, %s5072_s14  }
  0x24   :  { %s5073_s17 = smov [#allocation6]   ;;  %s5041_s21 = scalar_lea.hbm %s5443_s3, 176 }
  0x25   :  { %s42_s18 = sshll.u32 %s5073_s17, 4  ;;  %p5042_p2 = scmp.ne.s32.totalorder %s5443_s3, %s5041_s21  ;;  %s43_s18 = int_to_ptr.vmem [resolvable:$true] %s42_s18 }
  0x26   :  { %p5045_p3 = scmp.lt.u32.totalorder %s5041_s21, %s5443_s3 }
  0x28   :  { %p5047_p4 = pnand %p5045_p3, %p5042_p2 }
  0x2a   :  { %5050 = shalt.err (!%p5047_p4)
}
  0x2b   :  { %s5051_s28 = scalar_lea.vmem %s43_s18, 176  ;;  %s5055_s1 = scalar_lea.vmem %s43_s18, 192 }
  0x2c   :  { %p5052_p5 = scmp.ne.s32.totalorder %s43_s18, %s5051_s28  ;;  %p5056_p6 = scmp.lt.s32.totalorder %s43_s18, %s43_s18 }
  0x2d   :  { %p5057_p7 = scmp.lt.s32.totalorder %s5055_s1, %s5051_s28 }
  0x2f   :  { %p5058_p8 = por %p5057_p7, %p5056_p6 }
  0x31   :  { %p5059_p9 = pnand %p5058_p8, %p5052_p5 }
  0x33   :  { %5062 = shalt.err (!%p5059_p9)
}
  0x34   :  { %48 = dma.hbm_to_vmem [thread:$0]  %s5443_s3, 176, %s43_s18, [#allocation5], %s5068_s26, %s5068_s26, %s5069_s27  }
  0x35   :  { %5063 = dma.done.wait [#allocation3], 67584  }
  0x36   :  { %5064 = vsyncadd [#allocation3], 4294899712 }
  0x37   :  { %5065 = dma.done.wait [#allocation5], 352  }
  0x38   :  { %5066 = vsyncadd [#allocation5], 4294966944  ;;  %v108_v0 = vld [vmem:[#allocation2 + $0x80] sm:$0xff]  ;;  %v109_v1 = vld [vmem:[#allocation2 + $0x88] sm:$0xff]  ;;  %vm79_vm0 = vcmask 1046528   ;;  %vm66_vm1 = vcmask 1040384  }
  0x39   :  { %v92_v2 = vld [vmem:[#allocation2] sm:$0xff]  ;;  %v4286_v3 = vpack.c.bf16 %v109_v1, %v108_v0  ;;  %v93_v4 = vld [vmem:[#allocation2 + $0x8] sm:$0xff]  ;;  %v110_v9 = vld [vmem:[#allocation2 + $0x90] sm:$0xff] }
  0x3a   :  { %v124_v5 = vld [vmem:[#allocation2 + $0x100] sm:$0xff]  ;;  %v125_v6 = vld [vmem:[#allocation2 + $0x108] sm:$0xff]  ;;  %v4288_v7 = vpack.c.bf16 %v93_v4, %v92_v2  ;;  %v111_v10 = vld [vmem:[#allocation2 + $0x98] sm:$0xff] }
  0x3b   :  { %v4318_v8 = vpack.c.bf16 %v125_v6, %v124_v5  ;;  %v94_v11 = vld [vmem:[#allocation2 + $0x10] sm:$0xff]  ;;  %4287 = vmatprep.subr.bf16.mxu0 %v4286_v3  ;;  %v4290_v12 = vpack.c.bf16 %v111_v10, %v110_v9  ;;  %v95_v13 = vld [vmem:[#allocation2 + $0x18] sm:$0xff]  ;;  %v112_v18 = vld [vmem:[#allocation2 + $0xa0] sm:$0xff] }
  0x3c   :  { %v126_v14 = vld [vmem:[#allocation2 + $0x110] sm:$0xff]  ;;  %v127_v15 = vld [vmem:[#allocation2 + $0x118] sm:$0xff]  ;;  %4289 = vmatpush3.bf16.msra.mxu0 %v4288_v7  ;;  %v4292_v16 = vpack.c.bf16 %v95_v13, %v94_v11  ;;  %v113_v19 = vld [vmem:[#allocation2 + $0xa8] sm:$0xff] }
  0x3d   :  { %4319 = vmatprep.subr.bf16.mxu1 %v4318_v8  ;;  %v4322_v17 = vpack.c.bf16 %v127_v15, %v126_v14  ;;  %v96_v20 = vld [vmem:[#allocation2 + $0x20] sm:$0xff]  ;;  %4291 = vmatprep.subr.bf16.mxu0 %v4290_v12  ;;  %v4294_v21 = vpack.c.bf16 %v113_v19, %v112_v18  ;;  %v97_v22 = vld [vmem:[#allocation2 + $0x28] sm:$0xff]  ;;  %v114_v26 = vld [vmem:[#allocation2 + $0xb0] sm:$0xff] }
  0x3e   :  { %4321 = vmatpush3.bf16.msra.mxu1 %v4318_v8  ;;  %v128_v23 = vld [vmem:[#allocation2 + $0x120] sm:$0xff]  ;;  %v129_v24 = vld [vmem:[#allocation2 + $0x128] sm:$0xff]  ;;  %v115_v27 = vld [vmem:[#allocation2 + $0xb8] sm:$0xff]  ;;  %v4296_v30 = vpack.c.bf16 %v97_v22, %v96_v20 }
  0x3f   :  { %4323 = vmatprep.subr.bf16.mxu1 %v4322_v17  ;;  %v4326_v25 = vpack.c.bf16 %v129_v24, %v128_v23  ;;  %v130_v28 = vld [vmem:[#allocation2 + $0x130] sm:$0xff]  ;;  %v131_v29 = vld [vmem:[#allocation2 + $0x138] sm:$0xff]  ;;  %v4298_v31 = vpack.c.bf16 %v115_v27, %v114_v26  ;;  %v116_v35 = vld [vmem:[#allocation2 + $0xc0] sm:$0xff] }
  0x40   :  { %4293 = vmatpush3.bf16.msra.mxu0 %v4292_v16  ;;  %v98_v32 = vld [vmem:[#allocation2 + $0x30] sm:$0xff]  ;;  %v99_v33 = vld [vmem:[#allocation2 + $0x38] sm:$0xff]  ;;  %v4330_v34 = vpack.c.bf16 %v131_v29, %v130_v28  ;;  %v117_v36 = vld [vmem:[#allocation2 + $0xc8] sm:$0xff] }
  0x41   :  { %4295 = vmatprep.subr.bf16.mxu0 %v4294_v21  ;;  %v132_v37 = vld [vmem:[#allocation2 + $0x140] sm:$0xff]  ;;  %v133_v38 = vld [vmem:[#allocation2 + $0x148] sm:$0xff]  ;;  %v4300_v39 = vpack.c.bf16 %v99_v33, %v98_v32  ;;  %v4302_v40 = vpack.c.bf16 %v117_v36, %v116_v35  ;;  %v118_v44 = vld [vmem:[#allocation2 + $0xd0] sm:$0xff] }
  0x42   :  { %4325 = vmatpush3.bf16.msra.mxu1 %v4322_v17  ;;  %v100_v41 = vld [vmem:[#allocation2 + $0x40] sm:$0xff]  ;;  %v101_v42 = vld [vmem:[#allocation2 + $0x48] sm:$0xff]  ;;  %v4334_v43 = vpack.c.bf16 %v133_v38, %v132_v37  ;;  %v119_v45 = vld [vmem:[#allocation2 + $0xd8] sm:$0xff] }
  0x43   :  { %4327 = vmatprep.subr.bf16.mxu1 %v4326_v25  ;;  %v134_v46 = vld [vmem:[#allocation2 + $0x150] sm:$0xff]  ;;  %v135_v47 = vld [vmem:[#allocation2 + $0x158] sm:$0xff]  ;;  %v4304_v48 = vpack.c.bf16 %v101_v42, %v100_v41  ;;  %v5144_v49 = vld [vmem:[%s5440_s0] sm:$0xff]  ;;  %v4306_v51 = vpack.c.bf16 %v119_v45, %v118_v44 }
  0x44   :  { %4297 = vmatpush3.bf16.msra.mxu0 %v4296_v30  ;;  %v5149_v50 = vld [vmem:[%s5440_s0 + $0x8] sm:$0xff]  ;;  %v102_v52 = vld [vmem:[#allocation2 + $0x50] sm:$0xff]  ;;  %v103_v53 = vld [vmem:[#allocation2 + $0x58] sm:$0xff]  ;;  %v80_v54 = vrot.slane %v5144_v49, 1  ;;  %v4338_v56 = vpack.c.bf16 %v135_v47, %v134_v46  ;;  %204 = vmatprep.mubr.f32.mxu0 %v5144_v49 }
  0x45   :  { %4299 = vmatprep.subr.bf16.mxu0 %v4298_v31  ;;  %v81_v55 = vrot.slane %v5149_v50, 1  ;;  %v120_v57 = vld [vmem:[#allocation2 + $0xe0] sm:$0xff]  ;;  %v121_v58 = vld [vmem:[#allocation2 + $0xe8] sm:$0xff]  ;;  %v4308_v62 = vpack.c.bf16 %v103_v53, %v102_v52  ;;  %v122_v3 = vld [vmem:[#allocation2 + $0xf0] sm:$0xff]  ;;  %v68_v29 = vrot.slane %v5149_v50, 7 }
  0x46   :  { %4329 = vmatpush3.bf16.msra.mxu1 %v4326_v25  ;;  %v136_v59 = vld [vmem:[#allocation2 + $0x160] sm:$0xff]  ;;  %v137_v60 = vld [vmem:[#allocation2 + $0x168] sm:$0xff]  ;;  %v4310_v63 = vpack.c.bf16 %v121_v58, %v120_v57  ;;  %v123_v4 = vld [vmem:[#allocation2 + $0xf8] sm:$0xff]  ;;  %v67_v25 = vrot.slane %v5144_v49, 7 }
  0x47   :  { %4331 = vmatprep.subr.bf16.mxu1 %v4330_v34  ;;  %v82_v61 = vsel %vm79_vm0, %v80_v54, %v81_v55  ;;  %v104_v0 = vld [vmem:[#allocation2 + $0x60] sm:$0xff]  ;;  %v105_v1 = vld [vmem:[#allocation2 + $0x68] sm:$0xff]  ;;  %v4342_v2 = vpack.c.bf16 %v137_v60, %v136_v59  ;;  %v138_v5 = vld [vmem:[#allocation2 + $0x170] sm:$0xff]  ;;  %v4314_v8 = vpack.c.bf16 %v123_v4, %v122_v3 }
  0x48   :  { %4301 = vmatpush3.bf16.msra.mxu0 %v4300_v39  ;;  %3900 = vmatprep.mubr.f32.mxu1 %v82_v61  ;;  %v139_v6 = vld [vmem:[#allocation2 + $0x178] sm:$0xff]  ;;  %v4312_v7 = vpack.c.bf16 %v105_v1, %v104_v0  ;;  %v106_v9 = vld [vmem:[#allocation2 + $0x70] sm:$0xff]  ;;  %v381_v13 = vld [vmem:[#allocation2 + $0x200] sm:$0xff] }
  0x49   :  { %4303 = vmatprep.subr.bf16.mxu0 %v4302_v40  ;;  %v107_v10 = vld [vmem:[#allocation2 + $0x78] sm:$0xff]  ;;  %v4346_v11 = vpack.c.bf16 %v139_v6, %v138_v5  ;;  %v5160_v12 = vld [vmem:[%s5440_s0 + $0x10] sm:$0xff]  ;;  %v382_v14 = vld [vmem:[#allocation2 + $0x208] sm:$0xff]  ;;  %v69_v40 = vsel %vm66_vm1, %v67_v25, %v68_v29 }
  0x4a   :  { %4333 = vmatpush3.bf16.msra.mxu1 %v4330_v34  ;;  %v5165_v15 = vld [vmem:[%s5440_s0 + $0x18] sm:$0xff]  ;;  %v397_v16 = vld [vmem:[#allocation2 + $0x280] sm:$0xff]  ;;  %v398_v17 = vld [vmem:[#allocation2 + $0x288] sm:$0xff]  ;;  %v4316_v18 = vpack.c.bf16 %v107_v10, %v106_v9  ;;  %v4350_v19 = vpack.c.bf16 %v382_v14, %v381_v13  ;;  %v83_v20 = vrot.slane %v5160_v12, 1  ;;  %v70_v47 = vrot.slane %v5160_v12, 7 }
  0x4b   :  { %4335 = vmatprep.subr.bf16.mxu1 %v4334_v43  ;;  %v84_v21 = vrot.slane %v5165_v15, 1  ;;  %v365_v22 = vld [vmem:[#allocation2 + $0x180] sm:$0xff]  ;;  %v366_v23 = vld [vmem:[#allocation2 + $0x188] sm:$0xff]  ;;  %v4382_v24 = vpack.c.bf16 %v398_v17, %v397_v16  ;;  %v383_v26 = vld [vmem:[#allocation2 + $0x210] sm:$0xff] }
  0x4c   :  { %4305 = vmatpush3.bf16.msra.mxu0 %v4304_v48  ;;  %v384_v27 = vld [vmem:[#allocation2 + $0x218] sm:$0xff]  ;;  %vm5171_vm2 = vmneg %vm66_vm1  ;;  %v399_v30 = vld [vmem:[#allocation2 + $0x290] sm:$0xff]  ;;  %v4352_v32 = vpack.c.bf16 %v366_v23, %v365_v22 }
  0x4d   :  { %4307 = vmatprep.subr.bf16.mxu0 %v4306_v51  ;;  %v400_v31 = vld [vmem:[#allocation2 + $0x298] sm:$0xff]  ;;  %v85_v33 = vsel %vm79_vm0, %v83_v20, %v84_v21  ;;  %v4354_v34 = vpack.c.bf16 %v384_v27, %v383_v26  ;;  %v367_v35 = vld [vmem:[#allocation2 + $0x190] sm:$0xff]  ;;  %v385_v37 = vld [vmem:[#allocation2 + $0x220] sm:$0xff] }
  0x4e   :  { %4337 = vmatpush3.bf16.msra.mxu1 %v4334_v43  ;;  %v368_v36 = vld [vmem:[#allocation2 + $0x198] sm:$0xff]  ;;  %v386_v38 = vld [vmem:[#allocation2 + $0x228] sm:$0xff]  ;;  %v4386_v39 = vpack.c.bf16 %v400_v31, %v399_v30  ;;  %v401_v41 = vld [vmem:[#allocation2 + $0x2a0] sm:$0xff] }
  0x4f   :  { %4339 = vmatprep.subr.bf16.mxu1 %v4338_v56  ;;  %v402_v42 = vld [vmem:[#allocation2 + $0x2a8] sm:$0xff]  ;;  %v4356_v43 = vpack.c.bf16 %v368_v36, %v367_v35  ;;  %v4358_v44 = vpack.c.bf16 %v386_v38, %v385_v37  ;;  %v369_v45 = vld [vmem:[#allocation2 + $0x1a0] sm:$0xff]  ;;  %v387_v48 = vld [vmem:[#allocation2 + $0x230] sm:$0xff] }
  0x50   :  { %4309 = vmatpush3.bf16.msra.mxu0 %v4308_v62  ;;  %v370_v46 = vld [vmem:[#allocation2 + $0x1a8] sm:$0xff]  ;;  %v388_v49 = vld [vmem:[#allocation2 + $0x238] sm:$0xff]  ;;  %v4390_v51 = vpack.c.bf16 %v402_v42, %v401_v41  ;;  %v371_v54 = vld [vmem:[#allocation2 + $0x1b0] sm:$0xff] }
  0x51   :  { %4311 = vmatprep.subr.bf16.mxu0 %v4310_v63  ;;  %v4360_v52 = vpack.c.bf16 %v370_v46, %v369_v45  ;;  %v4362_v53 = vpack.c.bf16 %v388_v49, %v387_v48  ;;  %v390_v57 = vld [vmem:[#allocation2 + $0x248] sm:$0xff]  ;;  %v373_v61 = vld [vmem:[#allocation2 + $0x1c0] sm:$0xff]  ;;  %v403_v0 = vld [vmem:[#allocation2 + $0x2b0] sm:$0xff] }
  0x52   :  { %4341 = vmatpush3.bf16.msra.mxu1 %v4338_v56  ;;  %v389_v56 = vld [vmem:[#allocation2 + $0x240] sm:$0xff]  ;;  %v374_v62 = vld [vmem:[#allocation2 + $0x1c8] sm:$0xff]  ;;  %v404_v1 = vld [vmem:[#allocation2 + $0x2b8] sm:$0xff] }
  0x53   :  { %4343 = vmatprep.subr.bf16.mxu1 %v4342_v2  ;;  %v4366_v60 = vpack.c.bf16 %v390_v57, %v389_v56  ;;  %v4368_v63 = vpack.c.bf16 %v374_v62, %v373_v61  ;;  %v391_v3 = vld [vmem:[#allocation2 + $0x250] sm:$0xff]  ;;  %v392_v4 = vld [vmem:[#allocation2 + $0x258] sm:$0xff]  ;;  %v405_v9 = vld [vmem:[#allocation2 + $0x2c0] sm:$0xff] }
  0x54   :  { %4313 = vmatpush3.bf16.msra.mxu0 %v4312_v7  ;;  %v4370_v5 = vpack.c.bf16 %v392_v4, %v391_v3  ;;  %v375_v6 = vld [vmem:[#allocation2 + $0x1d0] sm:$0xff]  ;;  %v376_v7 = vld [vmem:[#allocation2 + $0x1d8] sm:$0xff]  ;;  %v406_v10 = vld [vmem:[#allocation2 + $0x2c8] sm:$0xff] }
  0x55   :  { %4315 = vmatprep.subr.bf16.mxu0 %v4314_v8  ;;  %v4372_v8 = vpack.c.bf16 %v376_v7, %v375_v6  ;;  %v394_v13 = vld [vmem:[#allocation2 + $0x268] sm:$0xff]  ;;  %v396_v22 = vld [vmem:[#allocation2 + $0x278] sm:$0xff]  ;;  %v409_v27 = vld [vmem:[#allocation2 + $0x2e0] sm:$0xff] }
  0x56   :  { %4345 = vmatpush3.bf16.msra.mxu1 %v4342_v2  ;;  %v4394_v2 = vpack.c.bf16 %v404_v1, %v403_v0  ;;  %v378_v16 = vld [vmem:[#allocation2 + $0x1e8] sm:$0xff]  ;;  %v411_v31 = vld [vmem:[#allocation2 + $0x2f0] sm:$0xff]  ;;  %v672_v37 = vld [vmem:[#allocation2 + $0x400] sm:$0xff] }
  0x57   :  { %4347 = vmatprep.subr.bf16.mxu1 %v4346_v11  ;;  %v410_v29 = vld [vmem:[#allocation2 + $0x2e8] sm:$0xff]  ;;  %v3082_v45 = vld [vmem:[#allocation4] ss:$0 sm:$0xff]  ;;  %v659_v61 = vld [vmem:[#allocation2 + $0x398] sm:$0xff] }
  0x58   :  { %4317 = vmatpush3.bf16.msra.mxu0 %v4316_v18  ;;  %v407_v18 = vld [vmem:[#allocation2 + $0x2d0] sm:$0xff]  ;;  %v4406_v30 = vpack.c.bf16 %v410_v29, %v409_v27  ;;  %v657_v35 = vld [vmem:[#allocation2 + $0x388] sm:$0xff]  ;;  %v640_v57 = vld [vmem:[#allocation2 + $0x300] sm:$0xff] }
  0x59   :  { %4351 = vmatprep.subr.bf16.mxu0 %v4350_v19  ;;  %v408_v19 = vld [vmem:[#allocation2 + $0x2d8] sm:$0xff]  ;;  %v673_v38 = vld [vmem:[#allocation2 + $0x408] sm:$0xff] }
  0x5a   :  { %4349 = vmatpush3.bf16.msra.mxu1 %v4346_v11  ;;  %v4398_v11 = vpack.c.bf16 %v406_v10, %v405_v9  ;;  %v4402_v20 = vpack.c.bf16 %v408_v19, %v407_v18  ;;  %v3083_v48 = vld [vmem:[#allocation6] ss:$0 sm:$0xff]  ;;  %v643_v9 = vld [vmem:[#allocation2 + $0x318] sm:$0xff]  ;;  %v674_v10 = vld [vmem:[#allocation2 + $0x410] sm:$0xff] }
  0x5b   :  { %4383 = vmatprep.subr.bf16.mxu1 %v4382_v24  ;;  %3077 = vmatmul.mubr.msk.f32.vlgmr.msra.gmra.mrb[0].mxu0 %vm5171_vm2, %v67_v25  ;;  %v380_v25 = vld [vmem:[#allocation2 + $0x1f8] sm:$0xff] }
  0x5c   :  { %209 = vmatprep.mubr.f32.mxu0 %v5149_v50  ;;  %4353 = vmatpush3.bf16.msra.mxu0 %v4352_v32  ;;  %v71_v50 = vrot.slane %v5165_v15, 7  ;;  %v412_v32 = vld [vmem:[#allocation2 + $0x2f8] sm:$0xff] }
  0x5d   :  { %3901 = vmatmul.mubr.msk.f32.vlgmr.msra.gmra.mrb[0].mxu1 %vm79_vm0, %v81_v55  ;;  %4355 = vmatprep.subr.bf16.mxu0 %v4354_v34  ;;  %v372_v55 = vld [vmem:[#allocation2 + $0x1b8] sm:$0xff]  ;;  %v656_v34 = vld [vmem:[#allocation2 + $0x380] sm:$0xff] }
  0x5e   :  { %3903 = vmatprep.mubr.f32.mxu1 %v85_v33  ;;  %4385 = vmatpush3.bf16.msra.mxu1 %v4382_v24  ;;  %v72_v58 = vsel %vm66_vm1, %v70_v47, %v71_v50  ;;  %v4364_v59 = vpack.c.bf16 %v372_v55, %v371_v54  ;;  %v379_v24 = vld [vmem:[#allocation2 + $0x1f0] sm:$0xff]  ;;  %v4410_v33 = vpack.c.bf16 %v412_v32, %v411_v31  ;;  %v645_v31 = vld [vmem:[#allocation2 + $0x328] sm:$0xff]  ;;  %v676_v32 = vld [vmem:[#allocation2 + $0x420] sm:$0xff] }
  0x5f   :  { %210 = vmatmul.mubr.f32.gmra.mrb[2].mxu0 %v69_v40  ;;  %4387 = vmatprep.subr.bf16.mxu1 %v4386_v39  ;;  %v4380_v26 = vpack.c.bf16 %v380_v25, %v379_v24  ;;  %v4414_v36 = vpack.c.bf16 %v657_v35, %v656_v34  ;;  %v662_v34 = vld [vmem:[#allocation2 + $0x3b0] sm:$0xff]  ;;  %v663_v35 = vld [vmem:[#allocation2 + $0x3b8] sm:$0xff] }
  0x60   :  { %214 = vmatprep.mubr.f32.mxu0 %v5160_v12  ;;  %4357 = vmatpush3.bf16.msra.mxu0 %v4356_v43  ;;  %v393_v12 = vld [vmem:[#allocation2 + $0x260] sm:$0xff] }
  0x61   :  { %3904 = vmatmul.mubr.msk.f32.gmra.mrb[2].mxu1 %vm79_vm0, %v84_v21  ;;  %4359 = vmatprep.subr.bf16.mxu0 %v4358_v44  ;;  %v4374_v14 = vpack.c.bf16 %v394_v13, %v393_v12  ;;  %v395_v21 = vld [vmem:[#allocation2 + $0x270] sm:$0xff] }
  0x62   :  { %4389 = vmatpush3.bf16.msra.mxu1 %v4386_v39  ;;  %v4378_v23 = vpack.c.bf16 %v396_v22, %v395_v21  ;;  %v5192_v39 = vpack.c.bf16 %v673_v38, %v672_v37 }
  0x63   :  { %3079 = vmatmul.mubr.msk.f32.gmra.mrb[4].mxu0 %vm5171_vm2, %v70_v47  ;;  %4391 = vmatprep.subr.bf16.mxu1 %v4390_v51 }
  0x64   :  { %219 = vmatprep.mubr.f32.mxu0 %v5165_v15  ;;  %4361 = vmatpush3.bf16.msra.mxu0 %v4360_v52  ;;  %v377_v15 = vld [vmem:[#allocation2 + $0x1e0] sm:$0xff] }
  0x65   :  { %4363 = vmatprep.subr.bf16.mxu0 %v4362_v53  ;;  %v4376_v17 = vpack.c.bf16 %v378_v16, %v377_v15  ;;  %v660_v15 = vld [vmem:[#allocation2 + $0x3a0] sm:$0xff]  ;;  %v661_v16 = vld [vmem:[#allocation2 + $0x3a8] sm:$0xff] }
  0x66   :  { %4393 = vmatpush3.bf16.msra.mxu1 %v4390_v51  ;;  %v4422_v24 = vpack.c.bf16 %v661_v16, %v660_v15  ;;  %v684_v15 = vld [vmem:[#allocation2 + $0x460] sm:$0xff]  ;;  %v685_v16 = vld [vmem:[#allocation2 + $0x468] sm:$0xff] }
  0x67   :  { %220 = vmatmul.mubr.f32.gmra.mrb[6].mxu0 %v72_v58  ;;  %4395 = vmatprep.subr.bf16.mxu1 %v4394_v2  ;;  %v641_v58 = vld [vmem:[#allocation2 + $0x308] sm:$0xff] }
  0x68   :  { %4365 = vmatpush3.bf16.msra.mxu0 %v4364_v59  ;;  %v4416_v1 = vpack.c.bf16 %v641_v58, %v640_v57  ;;  %v649_v57 = vld [vmem:[#allocation2 + $0x348] sm:$0xff] }
  0x69   :  { %4367 = vmatprep.subr.bf16.mxu0 %v4366_v60  ;;  %v658_v60 = vld [vmem:[#allocation2 + $0x390] sm:$0xff] }
  0x6a   :  { %4397 = vmatpush3.bf16.msra.mxu1 %v4394_v2  ;;  %v4418_v6 = vpack.c.bf16 %v659_v61, %v658_v60  ;;  %v681_v60 = vld [vmem:[#allocation2 + $0x448] sm:$0xff] }
  0x6b   :  { %4399 = vmatprep.subr.bf16.mxu1 %v4398_v11 }
  0x6c   :  { %4369 = vmatpush3.bf16.msra.mxu0 %v4368_v63 }
  0x6d   :  { %4371 = vmatprep.subr.bf16.mxu0 %v4370_v5 }
  0x6e   :  { %4401 = vmatpush3.bf16.msra.mxu1 %v4398_v11 }
  0x6f   :  { %4403 = vmatprep.subr.bf16.mxu1 %v4402_v20 }
  0x70   :  { %4373 = vmatpush3.bf16.msra.mxu0 %v4372_v8  ;;  %v642_v8 = vld [vmem:[#allocation2 + $0x310] sm:$0xff] }
  0x71   :  { %4375 = vmatprep.subr.bf16.mxu0 %v4374_v14  ;;  %v675_v14 = vld [vmem:[#allocation2 + $0x418] sm:$0xff]  ;;  %v4420_v22 = vpack.c.bf16 %v643_v9, %v642_v8  ;;  %v668_v8 = vld [vmem:[#allocation2 + $0x3e0] sm:$0xff]  ;;  %v669_v9 = vld [vmem:[#allocation2 + $0x3e8] sm:$0xff] }
  0x72   :  { %4405 = vmatpush3.bf16.msra.mxu1 %v4402_v20 }
  0x73   :  { %4407 = vmatprep.subr.bf16.mxu1 %v4406_v30 }
  0x74   :  { %4377 = vmatpush3.bf16.msra.mxu0 %v4376_v17 }
  0x75   :  { %4379 = vmatprep.subr.bf16.mxu0 %v4378_v23  ;;  %v4450_v23 = vpack.c.bf16 %v675_v14, %v674_v10  ;;  %v4438_v10 = vpack.c.bf16 %v669_v9, %v668_v8 }
  0x76   :  { %4409 = vmatpush3.bf16.msra.mxu1 %v4406_v30  ;;  %v644_v30 = vld [vmem:[#allocation2 + $0x320] sm:$0xff] }
  0x77   :  { %4411 = vmatprep.subr.bf16.mxu1 %v4410_v33  ;;  %v4424_v38 = vpack.c.bf16 %v645_v31, %v644_v30  ;;  %v932_v30 = vld [vmem:[#allocation2 + $0x508] sm:$0xff] }
  0x78   :  { %4381 = vmatpush3.bf16.msra.mxu0 %v4380_v26 }
  0x79   :  { %4415 = vmatprep.subr.bf16.mxu0 %v4414_v36 }
  0x7a   :  { %4413 = vmatpush3.bf16.msra.mxu1 %v4410_v33  ;;  %v677_v33 = vld [vmem:[#allocation2 + $0x428] sm:$0xff] }
  0x7b   :  { %4447 = vmatprep.subr.bf16.mxu1 %v5192_v39 }
 0x12e   :  { %v3196_v40 = vpop.f32.mrb[0].mxu0 }
 0x12f   :  { %v3197_v41 = vpop.f32.mrb[1].mxu0 }
 0x130   :  { %v3902_v42 = vpop.f32.mrb[0].mxu1  ;;  %v3198_v43 = vadd.f32 %v3197_v41, %v3196_v40  ;;  %v4454_v41 = vpack.c.bf16 %v677_v33, %v676_v32  ;;  %v947_v32 = vld [vmem:[#allocation2 + $0x580] sm:$0xff]  ;;  %v948_v33 = vld [vmem:[#allocation2 + $0x588] sm:$0xff] }
 0x131   :  { %v291_v44 = vpop.f32.mrb[1].mxu1 }
 0x132   :  { %v292_v46 = vadd.f32 %v3198_v43, %v291_v44  ;;  %v3199_v47 = vpop.f32.mrb[2].mxu0  ;;  %v646_v43 = vld [vmem:[#allocation2 + $0x330] sm:$0xff]  ;;  %v647_v44 = vld [vmem:[#allocation2 + $0x338] sm:$0xff] }
 0x133   :  { %v3200_v49 = vpop.f32.mrb[3].mxu0 }
 0x134   :  { %v3905_v51 = vpop.f32.mrb[2].mxu1  ;;  %v317_v50 = vmul.f32 %v3082_v45, %v292_v46  ;;  %v3201_v52 = vadd.f32 %v3200_v49, %v3199_v47  ;;  %v4428_v47 = vpack.c.bf16 %v647_v44, %v646_v43  ;;  %v3090_v44 = vld [vmem:[#allocation4 + $0x1] ss:$0 sm:$0xff] }
 0x135   :  { %v301_v53 = vpop.f32.mrb[3].mxu1 }
 0x136   :  { %v328_v54 = vadd.f32 %v3083_v48, %v317_v50  ;;  %v297_v55 = vadd.f32 %v3902_v42, %v3201_v52  ;;  %v3202_v56 = vpop.f32.mrb[4].mxu0  ;;  %v4426_v42 = vpack.c.bf16 %v663_v35, %v662_v34  ;;  %v679_v50 = vld [vmem:[#allocation2 + $0x438] sm:$0xff]  ;;  %v5226_v34 = vpack.c.bf16 %v948_v33, %v947_v32 }
 0x137   :  { %v3203_v59 = vpop.f32.mrb[5].mxu0  ;;  %v938_v32 = vld [vmem:[#allocation2 + $0x538] sm:$0xff] }
 0x138   :  { %v5195_v62 = vmax.f32 %v328_v54, 0.0  ;;  %v318_v63 = vmul.f32 %v3082_v45, %v297_v55  ;;  %v3204_v0 = vadd.f32 %v3203_v59, %v3202_v56  ;;  %v665_v54 = vld [vmem:[#allocation2 + $0x3c8] sm:$0xff]  ;;  %v648_v56 = vld [vmem:[#allocation2 + $0x340] sm:$0xff] }
 0x139   :  { %v4432_v58 = vpack.c.bf16 %v649_v57, %v648_v56  ;;  %v680_v59 = vld [vmem:[#allocation2 + $0x440] sm:$0xff] }
 0x13a   :  { %v340_v2 = vrot.slane %v5195_v62, 7  ;;  %v329_v3 = vadd.f32 %v3083_v48, %v318_v63  ;;  %v302_v4 = vadd.f32 %v3204_v0, %v301_v53  ;;  %v3205_v5 = vpop.f32.mrb[6].mxu0  ;;  %477 = vmatprep.mubr.f32.mxu0 %v5195_v62  ;;  %v352_v17 = vrot.slane %v5195_v62, 1  ;;  %v664_v53 = vld [vmem:[#allocation2 + $0x3c0] sm:$0xff]  ;;  %v666_v63 = vld [vmem:[#allocation2 + $0x3d0] sm:$0xff]  ;;  %v667_v0 = vld [vmem:[#allocation2 + $0x3d8] sm:$0xff] }
 0x13b   :  { %v3206_v7 = vpop.f32.mrb[7].mxu0  ;;  %v4430_v55 = vpack.c.bf16 %v665_v54, %v664_v53  ;;  %v4462_v61 = vpack.c.bf16 %v681_v60, %v680_v59  ;;  %v915_v54 = vld [vmem:[#allocation2 + $0x480] sm:$0xff]  ;;  %v934_v59 = vld [vmem:[#allocation2 + $0x518] sm:$0xff] }
 0x13c   :  { %v5199_v11 = vmax.f32 %v329_v3, 0.0  ;;  %v319_v12 = vmul.f32 %v3082_v45, %v302_v4  ;;  %v3207_v13 = vadd.f32 %v3206_v7, %v3205_v5  ;;  %3085 = vmatmul.mubr.msk.f32.vlgmr.msra.gmra.mrb[8].mxu0 %vm5171_vm2, %v340_v2  ;;  %v651_v3 = vld [vmem:[#allocation2 + $0x358] sm:$0xff]  ;;  %v682_v5 = vld [vmem:[#allocation2 + $0x450] sm:$0xff] }
 0x13d   :  { %4417 = vmatpush3.bf16.msra.mxu0 %v4416_v1  ;;  %v4434_v1 = vpack.c.bf16 %v667_v0, %v666_v63  ;;  %v917_v0 = vld [vmem:[#allocation2 + $0x490] sm:$0xff] }
 0x13e   :  { %v330_v18 = vadd.f32 %v3083_v48, %v319_v12  ;;  %v307_v19 = vadd.f32 %v3905_v51, %v3207_v13  ;;  %482 = vmatprep.mubr.f32.mxu0 %v5199_v11  ;;  %v341_v20 = vrot.slane %v5199_v11, 7  ;;  %v353_v21 = vrot.slane %v5199_v11, 1  ;;  %4419 = vmatprep.subr.bf16.mxu0 %v4418_v6  ;;  %v678_v51 = vld [vmem:[#allocation2 + $0x430] sm:$0xff]  ;;  %v683_v6 = vld [vmem:[#allocation2 + $0x458] sm:$0xff]  ;;  %v652_v12 = vld [vmem:[#allocation2 + $0x360] sm:$0xff] }
 0x13f   :  { %v4458_v52 = vpack.c.bf16 %v679_v50, %v678_v51  ;;  %v4466_v7 = vpack.c.bf16 %v683_v6, %v682_v5  ;;  %v653_v13 = vld [vmem:[#allocation2 + $0x368] sm:$0xff]  ;;  %v918_v5 = vld [vmem:[#allocation2 + $0x498] sm:$0xff]  ;;  %v949_v6 = vld [vmem:[#allocation2 + $0x590] sm:$0xff] }
 0x140   :  { %v5207_v25 = vmax.f32 %v330_v18, 0.0  ;;  %v320_v26 = vmul.f32 %v3082_v45, %v307_v19  ;;  %v342_v27 = vsel %vm66_vm1, %v340_v2, %v341_v20  ;;  %v354_v29 = vsel %vm79_vm0, %v352_v17, %v353_v21  ;;  %v650_v2 = vld [vmem:[#allocation2 + $0x350] sm:$0xff]  ;;  %v671_v19 = vld [vmem:[#allocation2 + $0x3f8] sm:$0xff] }
 0x141   :  { %483 = vmatmul.mubr.f32.gmra.mrb[10].mxu0 %v342_v27  ;;  %3938 = vmatprep.mubr.f32.mxu1 %v354_v29  ;;  %v4436_v4 = vpack.c.bf16 %v651_v3, %v650_v2  ;;  %v4440_v14 = vpack.c.bf16 %v653_v13, %v652_v12  ;;  %v4470_v17 = vpack.c.bf16 %v685_v16, %v684_v15  ;;  %v670_v18 = vld [vmem:[#allocation2 + $0x3f0] sm:$0xff]  ;;  %v931_v29 = vld [vmem:[#allocation2 + $0x500] sm:$0xff] }
 0x142   :  { %v331_v36 = vadd.f32 %v3083_v48, %v320_v26  ;;  %487 = vmatprep.mubr.f32.mxu0 %v5207_v25  ;;  %3939 = vmatmul.mubr.msk.f32.vlgmr.msra.gmra.mrb[4].mxu1 %vm79_vm0, %v353_v21  ;;  %v343_v37 = vrot.slane %v5207_v25, 7  ;;  %v355_v46 = vrot.slane %v5207_v25, 1  ;;  %v4442_v20 = vpack.c.bf16 %v671_v19, %v670_v18  ;;  %v654_v21 = vld [vmem:[#allocation2 + $0x370] sm:$0xff]  ;;  %v687_v26 = vld [vmem:[#allocation2 + $0x478] sm:$0xff]  ;;  %v935_v16 = vld [vmem:[#allocation2 + $0x520] sm:$0xff] }
 0x143   :  { %4449 = vmatpush3.bf16.msra.mxu1 %v5192_v39  ;;  %4421 = vmatpush3.bf16.msra.mxu0 %v4420_v22  ;;  %v655_v22 = vld [vmem:[#allocation2 + $0x378] sm:$0xff]  ;;  %v4478_v31 = vpack.c.bf16 %v932_v30, %v931_v29  ;;  %v4484_v19 = vpack.c.bf16 %v918_v5, %v917_v0  ;;  %v920_v29 = vld [vmem:[#allocation2 + $0x4a8] sm:$0xff]  ;;  %v943_v5 = vld [vmem:[#allocation2 + $0x560] sm:$0xff] }
 0x144   :  { %v5215_v40 = vmax.f32 %v331_v36, 0.0  ;;  %4451 = vmatprep.subr.bf16.mxu1 %v4450_v23  ;;  %4423 = vmatprep.subr.bf16.mxu0 %v4422_v24  ;;  %v686_v24 = vld [vmem:[#allocation2 + $0x470] sm:$0xff]  ;;  %v926_v0 = vld [vmem:[#allocation2 + $0x4d8] sm:$0xff] }
 0x145   :  { %3087 = vmatmul.mubr.msk.f32.gmra.mrb[12].mxu0 %vm5171_vm2, %v343_v37  ;;  %v4474_v27 = vpack.c.bf16 %v687_v26, %v686_v24 }
 0x146   :  { %492 = vmatprep.mubr.f32.mxu0 %v5215_v40  ;;  %v344_v45 = vrot.slane %v5215_v40, 7  ;;  %v356_v39 = vrot.slane %v5215_v40, 1 }
 0x147   :  { %4453 = vmatpush3.bf16.msra.mxu1 %v4450_v23  ;;  %4425 = vmatpush3.bf16.msra.mxu0 %v4424_v38  ;;  %v4444_v23 = vpack.c.bf16 %v655_v22, %v654_v21 }
 0x148   :  { %v345_v48 = vsel %vm66_vm1, %v343_v37, %v344_v45  ;;  %v357_v49 = vsel %vm79_vm0, %v355_v46, %v356_v39  ;;  %4455 = vmatprep.subr.bf16.mxu1 %v4454_v41  ;;  %4427 = vmatprep.subr.bf16.mxu0 %v4426_v42 }
 0x149   :  { %493 = vmatmul.mubr.f32.gmra.mrb[14].mxu0 %v345_v48  ;;  %3941 = vmatprep.mubr.f32.mxu1 %v357_v49  ;;  %v3091_v48 = vld [vmem:[#allocation6 + $0x1] ss:$0 sm:$0xff] }
 0x14a   :  { %3942 = vmatmul.mubr.msk.f32.gmra.mrb[6].mxu1 %vm79_vm0, %v356_v39 }
 0x14b   :  { %4457 = vmatpush3.bf16.msra.mxu1 %v4454_v41  ;;  %4429 = vmatpush3.bf16.msra.mxu0 %v4428_v47 }
 0x14c   :  { %4459 = vmatprep.subr.bf16.mxu1 %v4458_v52  ;;  %4431 = vmatprep.subr.bf16.mxu0 %v4430_v55  ;;  %v916_v55 = vld [vmem:[#allocation2 + $0x488] sm:$0xff] }
 0x14f   :  { %4461 = vmatpush3.bf16.msra.mxu1 %v4458_v52  ;;  %4433 = vmatpush3.bf16.msra.mxu0 %v4432_v58  ;;  %v933_v58 = vld [vmem:[#allocation2 + $0x510] sm:$0xff] }
 0x150   :  { %4463 = vmatprep.subr.bf16.mxu1 %v4462_v61  ;;  %4435 = vmatprep.subr.bf16.mxu0 %v4434_v1  ;;  %v4482_v12 = vpack.c.bf16 %v934_v59, %v933_v58  ;;  %v941_v59 = vld [vmem:[#allocation2 + $0x550] sm:$0xff] }
 0x153   :  { %4465 = vmatpush3.bf16.msra.mxu1 %v4462_v61  ;;  %4437 = vmatpush3.bf16.msra.mxu0 %v4436_v4  ;;  %v4480_v4 = vpack.c.bf16 %v916_v55, %v915_v54  ;;  %v924_v54 = vld [vmem:[#allocation2 + $0x4c8] sm:$0xff]  ;;  %v953_v55 = vld [vmem:[#allocation2 + $0x5b0] sm:$0xff] }
 0x154   :  { %4467 = vmatprep.subr.bf16.mxu1 %v4466_v7  ;;  %4439 = vmatprep.subr.bf16.mxu0 %v4438_v10 }
 0x157   :  { %4469 = vmatpush3.bf16.msra.mxu1 %v4466_v7  ;;  %4441 = vmatpush3.bf16.msra.mxu0 %v4440_v14  ;;  %v950_v7 = vld [vmem:[#allocation2 + $0x598] sm:$0xff] }
 0x158   :  { %4471 = vmatprep.subr.bf16.mxu1 %v4470_v17  ;;  %4443 = vmatprep.subr.bf16.mxu0 %v4442_v20  ;;  %v4514_v20 = vpack.c.bf16 %v950_v7, %v949_v6  ;;  %v944_v6 = vld [vmem:[#allocation2 + $0x568] sm:$0xff] }
 0x159   :  { %v4502_v7 = vpack.c.bf16 %v944_v6, %v943_v5 }
 0x15b   :  { %4473 = vmatpush3.bf16.msra.mxu1 %v4470_v17  ;;  %4445 = vmatpush3.bf16.msra.mxu0 %v4444_v23  ;;  %v936_v17 = vld [vmem:[#allocation2 + $0x528] sm:$0xff] }
 0x15c   :  { %4475 = vmatprep.subr.bf16.mxu1 %v4474_v27  ;;  %4479 = vmatprep.subr.bf16.mxu0 %v4478_v31  ;;  %v4486_v26 = vpack.c.bf16 %v936_v17, %v935_v16  ;;  %v937_v31 = vld [vmem:[#allocation2 + $0x530] sm:$0xff]  ;;  %v946_v16 = vld [vmem:[#allocation2 + $0x578] sm:$0xff] }
 0x15f   :  { %4477 = vmatpush3.bf16.msra.mxu1 %v4474_v27  ;;  %v919_v27 = vld [vmem:[#allocation2 + $0x4a0] sm:$0xff] }
 0x160   :  { %4511 = vmatprep.subr.bf16.mxu1 %v5226_v34 }
 0x20f   :  { %v3260_v35 = vpop.f32.mrb[8].mxu0 }
 0x210   :  { %v3261_v36 = vpop.f32.mrb[9].mxu0 }
 0x211   :  { %v3262_v37 = vadd.f32 %v3261_v36, %v3260_v35  ;;  %v951_v35 = vld [vmem:[#allocation2 + $0x5a0] sm:$0xff]  ;;  %v952_v36 = vld [vmem:[#allocation2 + $0x5a8] sm:$0xff] }
 0x214   :  { %v3263_v38 = vpop.f32.mrb[10].mxu0 }
 0x215   :  { %v3264_v41 = vpop.f32.mrb[11].mxu0  ;;  %v3940_v42 = vpop.f32.mrb[4].mxu1 }
 0x216   :  { %v3265_v43 = vadd.f32 %v3264_v41, %v3263_v38  ;;  %v564_v45 = vpop.f32.mrb[5].mxu1  ;;  %v4488_v38 = vpack.c.bf16 %v920_v29, %v919_v27  ;;  %v1210_v29 = vld [vmem:[#allocation2 + $0x680] sm:$0xff] }
 0x217   :  { %v565_v46 = vadd.f32 %v3262_v37, %v564_v45  ;;  %v922_v45 = vld [vmem:[#allocation2 + $0x4b8] sm:$0xff] }
 0x218   :  { %v570_v39 = vadd.f32 %v3940_v42, %v3265_v43  ;;  %v3266_v47 = vpop.f32.mrb[12].mxu0  ;;  %v4490_v43 = vpack.c.bf16 %v938_v32, %v937_v31  ;;  %v1226_v32 = vld [vmem:[#allocation2 + $0x700] sm:$0xff] }
 0x219   :  { %v591_v49 = vmul.f32 %v3090_v44, %v565_v46  ;;  %v3267_v51 = vpop.f32.mrb[13].mxu0 }
 0x21a   :  { %v592_v50 = vmul.f32 %v3090_v44, %v570_v39  ;;  %v3268_v52 = vadd.f32 %v3267_v51, %v3266_v47  ;;  %v4518_v47 = vpack.c.bf16 %v952_v36, %v951_v35 }
 0x21b   :  { %v603_v53 = vadd.f32 %v3091_v48, %v591_v49  ;;  %v940_v49 = vld [vmem:[#allocation2 + $0x548] sm:$0xff] }
 0x21c   :  { %v3269_v56 = vpop.f32.mrb[14].mxu0  ;;  %v604_v57 = vadd.f32 %v3091_v48, %v592_v50 }
 0x21d   :  { %v3270_v60 = vpop.f32.mrb[15].mxu0  ;;  %v3943_v61 = vpop.f32.mrb[6].mxu1  ;;  %v607_v63 = vmax.f32 %v603_v53, 0.0  ;;  %v923_v53 = vld [vmem:[#allocation2 + $0x4c0] sm:$0xff] }
 0x21e   :  { %v3271_v1 = vadd.f32 %v3270_v60, %v3269_v56  ;;  %v574_v2 = vpop.f32.mrb[7].mxu1  ;;  %v608_v3 = vmax.f32 %v604_v57, 0.0  ;;  %v4496_v56 = vpack.c.bf16 %v924_v54, %v923_v53  ;;  %v954_v57 = vld [vmem:[#allocation2 + $0x5b8] sm:$0xff]  ;;  %v1195_v53 = vld [vmem:[#allocation2 + $0x608] sm:$0xff] }
 0x21f   :  { %v575_v8 = vadd.f32 %v3268_v52, %v574_v2  ;;  %v615_v9 = vrot.slane %v607_v63, 7  ;;  %752 = vmatprep.mubr.f32.mxu0 %v607_v63  ;;  %v627_v10 = vrot.slane %v607_v63, 1  ;;  %v4522_v58 = vpack.c.bf16 %v954_v57, %v953_v55  ;;  %v942_v60 = vld [vmem:[#allocation2 + $0x558] sm:$0xff]  ;;  %v925_v63 = vld [vmem:[#allocation2 + $0x4d0] sm:$0xff] }
 0x220   :  { %v580_v13 = vadd.f32 %v3943_v61, %v3271_v1  ;;  %v628_v14 = vrot.slane %v608_v3, 1  ;;  %v616_v15 = vrot.slane %v608_v3, 7  ;;  %v4498_v61 = vpack.c.bf16 %v942_v60, %v941_v59  ;;  %v955_v1 = vld [vmem:[#allocation2 + $0x5c0] sm:$0xff]  ;;  %v1213_v57 = vld [vmem:[#allocation2 + $0x698] sm:$0xff] }
 0x221   :  { %v593_v18 = vmul.f32 %v3090_v44, %v575_v8  ;;  %3093 = vmatmul.mubr.msk.f32.vlgmr.msra.gmra.mrb[16].mxu0 %vm5171_vm2, %v615_v9  ;;  %v4500_v2 = vpack.c.bf16 %v926_v0, %v925_v63  ;;  %v927_v8 = vld [vmem:[#allocation2 + $0x4e0] sm:$0xff] }
 0x222   :  { %v594_v21 = vmul.f32 %v3090_v44, %v580_v13  ;;  %757 = vmatprep.mubr.f32.mxu0 %v608_v3  ;;  %v629_v22 = vsel %vm79_vm0, %v627_v10, %v628_v14  ;;  %v617_v23 = vsel %vm66_vm1, %v615_v9, %v616_v15  ;;  %4481 = vmatpush3.bf16.msra.mxu0 %v4480_v4  ;;  %v921_v44 = vld [vmem:[#allocation2 + $0x4b0] sm:$0xff]  ;;  %v956_v3 = vld [vmem:[#allocation2 + $0x5c8] sm:$0xff]  ;;  %v958_v13 = vld [vmem:[#allocation2 + $0x5d8] sm:$0xff] }
 0x223   :  { %3976 = vmatprep.mubr.f32.mxu1 %v629_v22  ;;  %v605_v24 = vadd.f32 %v3091_v48, %v593_v18  ;;  %4483 = vmatprep.subr.bf16.mxu0 %v4482_v12  ;;  %v4492_v50 = vpack.c.bf16 %v922_v45, %v921_v44  ;;  %v4526_v4 = vpack.c.bf16 %v956_v3, %v955_v1  ;;  %v928_v9 = vld [vmem:[#allocation2 + $0x4e8] sm:$0xff]  ;;  %v957_v12 = vld [vmem:[#allocation2 + $0x5d0] sm:$0xff]  ;;  %v3098_v44 = vld [vmem:[#allocation4 + $0x2] ss:$0 sm:$0xff] }
 0x224   :  { %3977 = vmatmul.mubr.msk.f32.vlgmr.msra.gmra.mrb[8].mxu1 %vm79_vm0, %v628_v14  ;;  %v606_v30 = vadd.f32 %v3091_v48, %v594_v21  ;;  %v939_v48 = vld [vmem:[#allocation2 + $0x540] sm:$0xff]  ;;  %v4504_v10 = vpack.c.bf16 %v928_v9, %v927_v8  ;;  %v4530_v14 = vpack.c.bf16 %v958_v13, %v957_v12  ;;  %v945_v15 = vld [vmem:[#allocation2 + $0x570] sm:$0xff]  ;;  %v960_v22 = vld [vmem:[#allocation2 + $0x5e8] sm:$0xff] }
 0x225   :  { %758 = vmatmul.mubr.f32.gmra.mrb[18].mxu0 %v617_v23  ;;  %v609_v33 = vmax.f32 %v605_v24, 0.0  ;;  %4513 = vmatpush3.bf16.msra.mxu1 %v5226_v34  ;;  %v4494_v52 = vpack.c.bf16 %v940_v49, %v939_v48  ;;  %v4506_v17 = vpack.c.bf16 %v946_v16, %v945_v15  ;;  %v929_v18 = vld [vmem:[#allocation2 + $0x4f0] sm:$0xff]  ;;  %v1215_v15 = vld [vmem:[#allocation2 + $0x6a8] sm:$0xff] }
 0x226   :  { %v610_v37 = vmax.f32 %v606_v30, 0.0  ;;  %4485 = vmatpush3.bf16.msra.mxu0 %v4484_v19  ;;  %4515 = vmatprep.subr.bf16.mxu1 %v4514_v20  ;;  %v930_v19 = vld [vmem:[#allocation2 + $0x4f8] sm:$0xff]  ;;  %v961_v24 = vld [vmem:[#allocation2 + $0x5f0] sm:$0xff]  ;;  %v1211_v30 = vld [vmem:[#allocation2 + $0x688] sm:$0xff] }
 0x227   :  { %762 = vmatprep.mubr.f32.mxu0 %v609_v33  ;;  %v618_v41 = vrot.slane %v609_v33, 7  ;;  %v630_v42 = vrot.slane %v609_v33, 1  ;;  %4487 = vmatprep.subr.bf16.mxu0 %v4486_v26  ;;  %v4508_v21 = vpack.c.bf16 %v930_v19, %v929_v18  ;;  %v962_v26 = vld [vmem:[#allocation2 + $0x5f8] sm:$0xff]  ;;  %v4542_v31 = vpack.c.bf16 %v1211_v30, %v1210_v29  ;;  %v1227_v33 = vld [vmem:[#allocation2 + $0x708] sm:$0xff]  ;;  %v1196_v1 = vld [vmem:[#allocation2 + $0x610] sm:$0xff] }
 0x228   :  { %v631_v46 = vrot.slane %v610_v37, 1  ;;  %v619_v39 = vrot.slane %v610_v37, 7  ;;  %v4538_v27 = vpack.c.bf16 %v962_v26, %v961_v24  ;;  %v5240_v35 = vpack.c.bf16 %v1227_v33, %v1226_v32  ;;  %v1228_v9 = vld [vmem:[#allocation2 + $0x710] sm:$0xff]  ;;  %v1230_v33 = vld [vmem:[#allocation2 + $0x720] sm:$0xff] }
 0x229   :  { %3095 = vmatmul.mubr.msk.f32.gmra.mrb[20].mxu0 %vm5171_vm2, %v618_v41  ;;  %4517 = vmatpush3.bf16.msra.mxu1 %v4514_v20  ;;  %v959_v20 = vld [vmem:[#allocation2 + $0x5e0] sm:$0xff]  ;;  %v1216_v30 = vld [vmem:[#allocation2 + $0x6b0] sm:$0xff] }
 0x22a   :  { %767 = vmatprep.mubr.f32.mxu0 %v610_v37  ;;  %v632_v34 = vsel %vm79_vm0, %v630_v42, %v631_v46  ;;  %v620_v51 = vsel %vm66_vm1, %v618_v41, %v619_v39  ;;  %4489 = vmatpush3.bf16.msra.mxu0 %v4488_v38  ;;  %v4534_v23 = vpack.c.bf16 %v960_v22, %v959_v20  ;;  %v1198_v22 = vld [vmem:[#allocation2 + $0x620] sm:$0xff] }
 0x22b   :  { %3979 = vmatprep.mubr.f32.mxu1 %v632_v34  ;;  %4491 = vmatprep.subr.bf16.mxu0 %v4490_v43 }
 0x22c   :  { %3980 = vmatmul.mubr.msk.f32.gmra.mrb[10].mxu1 %vm79_vm0, %v631_v46  ;;  %4519 = vmatprep.subr.bf16.mxu1 %v4518_v47 }
 0x22d   :  { %768 = vmatmul.mubr.f32.gmra.mrb[22].mxu0 %v620_v51  ;;  %4521 = vmatpush3.bf16.msra.mxu1 %v4518_v47  ;;  %v3099_v47 = vld [vmem:[#allocation6 + $0x2] ss:$0 sm:$0xff] }
 0x22e   :  { %4493 = vmatpush3.bf16.msra.mxu0 %v4492_v50  ;;  %4523 = vmatprep.subr.bf16.mxu1 %v4522_v58 }
 0x22f   :  { %4495 = vmatprep.subr.bf16.mxu0 %v4494_v52  ;;  %v1194_v52 = vld [vmem:[#allocation2 + $0x600] sm:$0xff] }
 0x230   :  { %v4544_v0 = vpack.c.bf16 %v1195_v53, %v1194_v52  ;;  %v1218_v53 = vld [vmem:[#allocation2 + $0x6c0] sm:$0xff] }
 0x231   :  { %4525 = vmatpush3.bf16.msra.mxu1 %v4522_v58 }
 0x232   :  { %4497 = vmatpush3.bf16.msra.mxu0 %v4496_v56  ;;  %4527 = vmatprep.subr.bf16.mxu1 %v4526_v4  ;;  %v1212_v56 = vld [vmem:[#allocation2 + $0x690] sm:$0xff] }
 0x233   :  { %4499 = vmatprep.subr.bf16.mxu0 %v4498_v61  ;;  %v4546_v6 = vpack.c.bf16 %v1213_v57, %v1212_v56  ;;  %v1202_v56 = vld [vmem:[#allocation2 + $0x640] sm:$0xff]  ;;  %v1203_v57 = vld [vmem:[#allocation2 + $0x648] sm:$0xff] }
 0x235   :  { %4529 = vmatpush3.bf16.msra.mxu1 %v4526_v4 }
 0x236   :  { %4501 = vmatpush3.bf16.msra.mxu0 %v4500_v2  ;;  %4531 = vmatprep.subr.bf16.mxu1 %v4530_v14  ;;  %v1197_v2 = vld [vmem:[#allocation2 + $0x618] sm:$0xff] }
 0x237   :  { %4503 = vmatprep.subr.bf16.mxu0 %v4502_v7  ;;  %v4548_v13 = vpack.c.bf16 %v1197_v2, %v1196_v1  ;;  %v1204_v2 = vld [vmem:[#allocation2 + $0x650] sm:$0xff] }
 0x239   :  { %4533 = vmatpush3.bf16.msra.mxu1 %v4530_v14  ;;  %v1214_v14 = vld [vmem:[#allocation2 + $0x6a0] sm:$0xff] }
 0x23a   :  { %4505 = vmatpush3.bf16.msra.mxu0 %v4504_v10  ;;  %4535 = vmatprep.subr.bf16.mxu1 %v4534_v23  ;;  %v1229_v10 = vld [vmem:[#allocation2 + $0x718] sm:$0xff]  ;;  %v4550_v29 = vpack.c.bf16 %v1215_v15, %v1214_v14  ;;  %v1238_v15 = vld [vmem:[#allocation2 + $0x760] sm:$0xff] }
 0x23b   :  { %4507 = vmatprep.subr.bf16.mxu0 %v4506_v17 }
 0x23d   :  { %4537 = vmatpush3.bf16.msra.mxu1 %v4534_v23  ;;  %v1199_v23 = vld [vmem:[#allocation2 + $0x628] sm:$0xff] }
 0x23e   :  { %4509 = vmatpush3.bf16.msra.mxu0 %v4508_v21  ;;  %4539 = vmatprep.subr.bf16.mxu1 %v4538_v27  ;;  %v4578_v21 = vpack.c.bf16 %v1229_v10, %v1228_v9  ;;  %v1223_v9 = vld [vmem:[#allocation2 + $0x6e8] sm:$0xff] }
 0x23f   :  { %4543 = vmatprep.subr.bf16.mxu0 %v4542_v31  ;;  %v1217_v31 = vld [vmem:[#allocation2 + $0x6b8] sm:$0xff] }
 0x241   :  { %4541 = vmatpush3.bf16.msra.mxu1 %v4538_v27 }
 0x242   :  { %4575 = vmatprep.subr.bf16.mxu1 %v5240_v35 }
 0x2f4   :  { %v3324_v36 = vpop.f32.mrb[16].mxu0 }
 0x2f5   :  { %v3325_v37 = vpop.f32.mrb[17].mxu0 }
 0x2f6   :  { %v3326_v38 = vadd.f32 %v3325_v37, %v3324_v36  ;;  %v1231_v36 = vld [vmem:[#allocation2 + $0x728] sm:$0xff] }
 0x2f7   :  { %v3978_v41 = vpop.f32.mrb[8].mxu1 }
 0x2f8   :  { %v3327_v42 = vpop.f32.mrb[18].mxu0  ;;  %v839_v43 = vpop.f32.mrb[9].mxu1 }
 0x2f9   :  { %v840_v45 = vadd.f32 %v3326_v38, %v839_v43  ;;  %v3328_v46 = vpop.f32.mrb[19].mxu0  ;;  %v4552_v38 = vpack.c.bf16 %v1199_v23, %v1198_v22  ;;  %v1209_v22 = vld [vmem:[#allocation2 + $0x678] sm:$0xff] }
 0x2fa   :  { %v3329_v39 = vadd.f32 %v3328_v46, %v3327_v42  ;;  %v4554_v42 = vpack.c.bf16 %v1217_v31, %v1216_v30  ;;  %v1486_v30 = vld [vmem:[#allocation2 + $0x808] sm:$0xff] }
 0x2fb   :  { %v866_v48 = vmul.f32 %v3098_v44, %v840_v45 }
 0x2fc   :  { %v845_v49 = vadd.f32 %v3978_v41, %v3329_v39  ;;  %v3330_v34 = vpop.f32.mrb[20].mxu0 }
 0x2fd   :  { %v3331_v51 = vpop.f32.mrb[21].mxu0  ;;  %v878_v50 = vadd.f32 %v3099_v47, %v866_v48 }
 0x2fe   :  { %v867_v54 = vmul.f32 %v3098_v44, %v845_v49  ;;  %v3332_v55 = vadd.f32 %v3331_v51, %v3330_v34  ;;  %v1201_v49 = vld [vmem:[#allocation2 + $0x638] sm:$0xff]  ;;  %v1232_v51 = vld [vmem:[#allocation2 + $0x730] sm:$0xff] }
 0x2ff   :  { %v3981_v58 = vpop.f32.mrb[10].mxu1  ;;  %v882_v59 = vmax.f32 %v878_v50, 0.0  ;;  %v1233_v50 = vld [vmem:[#allocation2 + $0x738] sm:$0xff] }
 0x300   :  { %v3333_v60 = vpop.f32.mrb[22].mxu0  ;;  %v849_v61 = vpop.f32.mrb[11].mxu1  ;;  %v879_v63 = vadd.f32 %v3099_v47, %v867_v54  ;;  %v4586_v52 = vpack.c.bf16 %v1233_v50, %v1232_v51  ;;  %v1219_v54 = vld [vmem:[#allocation2 + $0x6c8] sm:$0xff] }
 0x301   :  { %v850_v3 = vadd.f32 %v3332_v55, %v849_v61  ;;  %v3334_v4 = vpop.f32.mrb[23].mxu0  ;;  %v890_v5 = vrot.slane %v882_v59, 7  ;;  %1027 = vmatprep.mubr.f32.mxu0 %v882_v59  ;;  %v902_v18 = vrot.slane %v882_v59, 1  ;;  %v4558_v55 = vpack.c.bf16 %v1219_v54, %v1218_v53  ;;  %v1234_v59 = vld [vmem:[#allocation2 + $0x740] sm:$0xff] }
 0x302   :  { %v3335_v7 = vadd.f32 %v3334_v4, %v3333_v60  ;;  %v883_v8 = vmax.f32 %v879_v63, 0.0  ;;  %v1235_v60 = vld [vmem:[#allocation2 + $0x748] sm:$0xff]  ;;  %v1220_v63 = vld [vmem:[#allocation2 + $0x6d0] sm:$0xff] }
 0x303   :  { %v868_v12 = vmul.f32 %v3098_v44, %v850_v3  ;;  %3101 = vmatmul.mubr.msk.f32.vlgmr.msra.gmra.mrb[24].mxu0 %vm5171_vm2, %v890_v5  ;;  %v4590_v61 = vpack.c.bf16 %v1235_v60, %v1234_v59  ;;  %v1205_v3 = vld [vmem:[#allocation2 + $0x658] sm:$0xff]  ;;  %v1469_v59 = vld [vmem:[#allocation2 + $0x780] sm:$0xff]  ;;  %v1470_v60 = vld [vmem:[#allocation2 + $0x788] sm:$0xff] }
 0x304   :  { %v855_v16 = vadd.f32 %v3981_v58, %v3335_v7  ;;  %1032 = vmatprep.mubr.f32.mxu0 %v883_v8  ;;  %v891_v17 = vrot.slane %v883_v8, 7  ;;  %v903_v19 = vrot.slane %v883_v8, 1  ;;  %4545 = vmatpush3.bf16.msra.mxu0 %v4544_v0  ;;  %v4560_v58 = vpack.c.bf16 %v1203_v57, %v1202_v56  ;;  %v1221_v0 = vld [vmem:[#allocation2 + $0x6d8] sm:$0xff]  ;;  %v1222_v8 = vld [vmem:[#allocation2 + $0x6e0] sm:$0xff] }
 0x305   :  { %v880_v20 = vadd.f32 %v3099_v47, %v868_v12  ;;  %4547 = vmatprep.subr.bf16.mxu0 %v4546_v6  ;;  %v4562_v1 = vpack.c.bf16 %v1221_v0, %v1220_v63  ;;  %v4564_v4 = vpack.c.bf16 %v1205_v3, %v1204_v2  ;;  %v1237_v6 = vld [vmem:[#allocation2 + $0x758] sm:$0xff]  ;;  %v4566_v10 = vpack.c.bf16 %v1223_v9, %v1222_v8  ;;  %v1206_v12 = vld [vmem:[#allocation2 + $0x660] sm:$0xff]  ;;  %v1471_v8 = vld [vmem:[#allocation2 + $0x790] sm:$0xff] }
 0x306   :  { %v869_v24 = vmul.f32 %v3098_v44, %v855_v16  ;;  %v892_v26 = vsel %vm66_vm1, %v890_v5, %v891_v17  ;;  %v904_v27 = vsel %vm79_vm0, %v902_v18, %v903_v19  ;;  %v4582_v44 = vpack.c.bf16 %v1231_v36, %v1230_v33  ;;  %v1236_v5 = vld [vmem:[#allocation2 + $0x750] sm:$0xff]  ;;  %v1239_v16 = vld [vmem:[#allocation2 + $0x768] sm:$0xff]  ;;  %v1488_v2 = vld [vmem:[#allocation2 + $0x818] sm:$0xff] }
 0x307   :  { %1033 = vmatmul.mubr.f32.gmra.mrb[26].mxu0 %v892_v26  ;;  %4014 = vmatprep.mubr.f32.mxu1 %v904_v27  ;;  %v884_v32 = vmax.f32 %v880_v20, 0.0  ;;  %v4594_v7 = vpack.c.bf16 %v1237_v6, %v1236_v5  ;;  %v4598_v17 = vpack.c.bf16 %v1239_v16, %v1238_v15  ;;  %v1224_v18 = vld [vmem:[#allocation2 + $0x6f0] sm:$0xff]  ;;  %v1241_v26 = vld [vmem:[#allocation2 + $0x778] sm:$0xff]  ;;  %v1502_v33 = vld [vmem:[#allocation2 + $0x888] sm:$0xff] }
 0x308   :  { %4015 = vmatmul.mubr.msk.f32.vlgmr.msra.gmra.mrb[12].mxu1 %vm79_vm0, %v903_v19  ;;  %v881_v37 = vadd.f32 %v3099_v47, %v869_v24  ;;  %4549 = vmatpush3.bf16.msra.mxu0 %v4548_v13  ;;  %v1207_v13 = vld [vmem:[#allocation2 + $0x668] sm:$0xff]  ;;  %v1225_v19 = vld [vmem:[#allocation2 + $0x6f8] sm:$0xff]  ;;  %v1240_v24 = vld [vmem:[#allocation2 + $0x770] sm:$0xff] }
 0x309   :  { %1037 = vmatprep.mubr.f32.mxu0 %v884_v32  ;;  %v893_v41 = vrot.slane %v884_v32, 7  ;;  %4577 = vmatpush3.bf16.msra.mxu1 %v5240_v35  ;;  %v905_v46 = vrot.slane %v884_v32, 1  ;;  %v1200_v35 = vld [vmem:[#allocation2 + $0x630] sm:$0xff]  ;;  %v4568_v14 = vpack.c.bf16 %v1207_v13, %v1206_v12  ;;  %v4570_v20 = vpack.c.bf16 %v1225_v19, %v1224_v18  ;;  %v1501_v32 = vld [vmem:[#allocation2 + $0x880] sm:$0xff]  ;;  %v1472_v9 = vld [vmem:[#allocation2 + $0x798] sm:$0xff] }
 0x30a   :  { %v885_v43 = vmax.f32 %v881_v37, 0.0  ;;  %4579 = vmatprep.subr.bf16.mxu1 %v4578_v21  ;;  %4551 = vmatprep.subr.bf16.mxu0 %v4550_v29  ;;  %v4556_v34 = vpack.c.bf16 %v1201_v49, %v1200_v35  ;;  %v4602_v27 = vpack.c.bf16 %v1241_v26, %v1240_v24  ;;  %v1485_v29 = vld [vmem:[#allocation2 + $0x800] sm:$0xff]  ;;  %v5254_v36 = vpack.c.bf16 %v1502_v33, %v1501_v32  ;;  %v3107_v35 = vld [vmem:[#allocation6 + $0x3] ss:$0 sm:$0xff]  ;;  %v1503_v13 = vld [vmem:[#allocation2 + $0x890] sm:$0xff] }
 0x30b   :  { %3103 = vmatmul.mubr.msk.f32.gmra.mrb[28].mxu0 %vm5171_vm2, %v893_v41  ;;  %v4606_v31 = vpack.c.bf16 %v1486_v30, %v1485_v29  ;;  %v1489_v18 = vld [vmem:[#allocation2 + $0x820] sm:$0xff]  ;;  %v1490_v19 = vld [vmem:[#allocation2 + $0x828] sm:$0xff]  ;;  %v1491_v33 = vld [vmem:[#allocation2 + $0x830] sm:$0xff] }
 0x30c   :  { %1042 = vmatprep.mubr.f32.mxu0 %v885_v43  ;;  %v894_v45 = vrot.slane %v885_v43, 7  ;;  %v906_v39 = vrot.slane %v885_v43, 1  ;;  %4553 = vmatpush3.bf16.msra.mxu0 %v4552_v38  ;;  %v1473_v29 = vld [vmem:[#allocation2 + $0x7a0] sm:$0xff]  ;;  %v1474_v30 = vld [vmem:[#allocation2 + $0x7a8] sm:$0xff] }
 0x30d   :  { %4581 = vmatpush3.bf16.msra.mxu1 %v4578_v21  ;;  %4555 = vmatprep.subr.bf16.mxu0 %v4554_v42  ;;  %v1208_v21 = vld [vmem:[#allocation2 + $0x670] sm:$0xff] }
 0x30e   :  { %v895_v47 = vsel %vm66_vm1, %v893_v41, %v894_v45  ;;  %v907_v48 = vsel %vm79_vm0, %v905_v46, %v906_v39  ;;  %4583 = vmatprep.subr.bf16.mxu1 %v4582_v44  ;;  %v4572_v23 = vpack.c.bf16 %v1209_v22, %v1208_v21  ;;  %v3106_v46 = vld [vmem:[#allocation4 + $0x3] ss:$0 sm:$0xff]  ;;  %v4612_v21 = vpack.c.bf16 %v1472_v9, %v1471_v8  ;;  %v1498_v8 = vld [vmem:[#allocation2 + $0x868] sm:$0xff] }
 0x30f   :  { %1043 = vmatmul.mubr.f32.gmra.mrb[30].mxu0 %v895_v47  ;;  %4017 = vmatprep.mubr.f32.mxu1 %v907_v48 }
 0x310   :  { %4018 = vmatmul.mubr.msk.f32.gmra.mrb[14].mxu1 %vm79_vm0, %v906_v39  ;;  %4557 = vmatpush3.bf16.msra.mxu0 %v4556_v34 }
 0x311   :  { %4585 = vmatpush3.bf16.msra.mxu1 %v4582_v44  ;;  %4559 = vmatprep.subr.bf16.mxu0 %v4558_v55 }
 0x312   :  { %4587 = vmatprep.subr.bf16.mxu1 %v4586_v52 }
 0x314   :  { %4561 = vmatpush3.bf16.msra.mxu0 %v4560_v58 }
 0x315   :  { %4589 = vmatpush3.bf16.msra.mxu1 %v4586_v52  ;;  %4563 = vmatprep.subr.bf16.mxu0 %v4562_v1  ;;  %v1487_v1 = vld [vmem:[#allocation2 + $0x810] sm:$0xff] }
 0x316   :  { %4591 = vmatprep.subr.bf16.mxu1 %v4590_v61  ;;  %v4610_v12 = vpack.c.bf16 %v1488_v2, %v1487_v1  ;;  %v1509_v1 = vld [vmem:[#allocation2 + $0x8c0] sm:$0xff] }
 0x318   :  { %4565 = vmatpush3.bf16.msra.mxu0 %v4564_v4 }
 0x319   :  { %4593 = vmatpush3.bf16.msra.mxu1 %v4590_v61  ;;  %4567 = vmatprep.subr.bf16.mxu0 %v4566_v10 }
 0x31a   :  { %4595 = vmatprep.subr.bf16.mxu1 %v4594_v7 }
 0x31c   :  { %4569 = vmatpush3.bf16.msra.mxu0 %v4568_v14  ;;  %v1504_v14 = vld [vmem:[#allocation2 + $0x898] sm:$0xff] }
 0x31d   :  { %4597 = vmatpush3.bf16.msra.mxu1 %v4594_v7  ;;  %4571 = vmatprep.subr.bf16.mxu0 %v4570_v20  ;;  %v4608_v7 = vpack.c.bf16 %v1470_v60, %v1469_v59  ;;  %v4642_v24 = vpack.c.bf16 %v1504_v14, %v1503_v13  ;;  %v1495_v59 = vld [vmem:[#allocation2 + $0x850] sm:$0xff]  ;;  %v1496_v60 = vld [vmem:[#allocation2 + $0x858] sm:$0xff] }
 0x31e   :  { %4599 = vmatprep.subr.bf16.mxu1 %v4598_v17  ;;  %v1512_v13 = vld [vmem:[#allocation2 + $0x8d8] sm:$0xff] }
 0x320   :  { %4573 = vmatpush3.bf16.msra.mxu0 %v4572_v23 }
 0x321   :  { %4601 = vmatpush3.bf16.msra.mxu1 %v4598_v17  ;;  %4607 = vmatprep.subr.bf16.mxu0 %v4606_v31 }
 0x322   :  { %4603 = vmatprep.subr.bf16.mxu1 %v4602_v27 }
 0x325   :  { %4605 = vmatpush3.bf16.msra.mxu1 %v4602_v27  ;;  %v4614_v27 = vpack.c.bf16 %v1490_v19, %v1489_v18  ;;  %v1483_v18 = vld [vmem:[#allocation2 + $0x7f0] sm:$0xff]  ;;  %v1484_v19 = vld [vmem:[#allocation2 + $0x7f8] sm:$0xff] }
 0x326   :  { %4639 = vmatprep.subr.bf16.mxu1 %v5254_v36 }
 0x3d6   :  { %v3388_v37 = vpop.f32.mrb[24].mxu0 }
 0x3d7   :  { %v3389_v38 = vpop.f32.mrb[25].mxu0 }
 0x3d8   :  { %v3390_v41 = vadd.f32 %v3389_v38, %v3388_v37  ;;  %v1492_v37 = vld [vmem:[#allocation2 + $0x838] sm:$0xff] }
 0x3da   :  { %v3391_v42 = vpop.f32.mrb[26].mxu0 }
 0x3db   :  { %v3392_v43 = vpop.f32.mrb[27].mxu0  ;;  %v4016_v44 = vpop.f32.mrb[12].mxu1 }
 0x3dc   :  { %v3393_v45 = vadd.f32 %v3392_v43, %v3391_v42  ;;  %v1114_v39 = vpop.f32.mrb[13].mxu1  ;;  %v4616_v43 = vpack.c.bf16 %v1474_v30, %v1473_v29  ;;  %v1760_v29 = vld [vmem:[#allocation2 + $0x980] sm:$0xff]  ;;  %v1761_v30 = vld [vmem:[#allocation2 + $0x988] sm:$0xff] }
 0x3dd   :  { %v1115_v47 = vadd.f32 %v3390_v41, %v1114_v39  ;;  %v1505_v41 = vld [vmem:[#allocation2 + $0x8a0] sm:$0xff]  ;;  %v1476_v39 = vld [vmem:[#allocation2 + $0x7b8] sm:$0xff] }
 0x3de   :  { %v1120_v48 = vadd.f32 %v4016_v44, %v3393_v45  ;;  %v3394_v49 = vpop.f32.mrb[28].mxu0  ;;  %v4618_v45 = vpack.c.bf16 %v1492_v37, %v1491_v33  ;;  %v1777_v33 = vld [vmem:[#allocation2 + $0xa08] sm:$0xff] }
 0x3df   :  { %v1141_v34 = vmul.f32 %v3106_v46, %v1115_v47  ;;  %v3395_v51 = vpop.f32.mrb[29].mxu0 }
 0x3e0   :  { %v1142_v50 = vmul.f32 %v3106_v46, %v1120_v48  ;;  %v3396_v52 = vadd.f32 %v3395_v51, %v3394_v49  ;;  %v1494_v49 = vld [vmem:[#allocation2 + $0x848] sm:$0xff] }
 0x3e1   :  { %v1153_v53 = vadd.f32 %v3107_v35, %v1141_v34 }
 0x3e2   :  { %v1154_v54 = vadd.f32 %v3107_v35, %v1142_v50  ;;  %v3397_v55 = vpop.f32.mrb[30].mxu0 }
 0x3e3   :  { %v1157_v56 = vadd.f32 %v1153_v53, %v5195_v62  ;;  %v3398_v57 = vpop.f32.mrb[31].mxu0  ;;  %v4019_v58 = vpop.f32.mrb[14].mxu1  ;;  %v1477_v53 = vld [vmem:[#allocation2 + $0x7c0] sm:$0xff] }
 0x3e4   :  { %v1158_v61 = vadd.f32 %v1154_v54, %v5199_v11  ;;  %v3399_v63 = vadd.f32 %v3398_v57, %v3397_v55  ;;  %v1124_v0 = vpop.f32.mrb[15].mxu1  ;;  %v1478_v54 = vld [vmem:[#allocation2 + $0x7c8] sm:$0xff]  ;;  %v1507_v55 = vld [vmem:[#allocation2 + $0x8b0] sm:$0xff]  ;;  %v1508_v57 = vld [vmem:[#allocation2 + $0x8b8] sm:$0xff] }
 0x3e5   :  { %v5259_v3 = vmax.f32 %v1157_v56, 0.0  ;;  %v1125_v4 = vadd.f32 %v3396_v52, %v1124_v0  ;;  %v4624_v56 = vpack.c.bf16 %v1478_v54, %v1477_v53  ;;  %v1480_v0 = vld [vmem:[#allocation2 + $0x7d8] sm:$0xff]  ;;  %v1745_v53 = vld [vmem:[#allocation2 + $0x908] sm:$0xff] }
 0x3e6   :  { %v5261_v5 = vmax.f32 %v1158_v61, 0.0  ;;  %v1130_v6 = vadd.f32 %v4019_v58, %v3399_v63  ;;  %v4650_v58 = vpack.c.bf16 %v1508_v57, %v1507_v55  ;;  %v4626_v61 = vpack.c.bf16 %v1496_v60, %v1495_v59  ;;  %v1479_v63 = vld [vmem:[#allocation2 + $0x7d0] sm:$0xff]  ;;  %v1763_v57 = vld [vmem:[#allocation2 + $0x998] sm:$0xff] }
 0x3e7   :  { %v1169_v62 = vrot.slane %v5259_v3, 7  ;;  %v1143_v10 = vmul.f32 %v3106_v46, %v1125_v4  ;;  %1306 = vmatprep.mubr.f32.mxu0 %v5259_v3  ;;  %v1181_v11 = vrot.slane %v5259_v3, 1  ;;  %v4628_v2 = vpack.c.bf16 %v1480_v0, %v1479_v63  ;;  %v1510_v4 = vld [vmem:[#allocation2 + $0x8c8] sm:$0xff] }
 0x3e8   :  { %v1144_v15 = vmul.f32 %v3106_v46, %v1130_v6  ;;  %v1182_v16 = vrot.slane %v5261_v5, 1  ;;  %v1170_v17 = vrot.slane %v5261_v5, 7  ;;  %v1475_v46 = vld [vmem:[#allocation2 + $0x7b0] sm:$0xff]  ;;  %v4654_v6 = vpack.c.bf16 %v1510_v4, %v1509_v1 }
 0x3e9   :  { %v1155_v20 = vadd.f32 %v3107_v35, %v1143_v10  ;;  %3109 = vmatmul.mubr.msk.f32.vlgmr.msra.gmra.mrb[32].mxu0 %vm5171_vm2, %v1169_v62  ;;  %v4620_v51 = vpack.c.bf16 %v1476_v39, %v1475_v46  ;;  %v1482_v10 = vld [vmem:[#allocation2 + $0x7e8] sm:$0xff]  ;;  %v3114_v46 = vld [vmem:[#allocation4 + $0x4] ss:$0 sm:$0xff]  ;;  %v1746_v1 = vld [vmem:[#allocation2 + $0x910] sm:$0xff] }
 0x3ea   :  { %v1156_v22 = vadd.f32 %v3107_v35, %v1144_v15  ;;  %1311 = vmatprep.mubr.f32.mxu0 %v5261_v5  ;;  %v1183_v23 = vsel %vm79_vm0, %v1181_v11, %v1182_v16  ;;  %4609 = vmatpush3.bf16.msra.mxu0 %v4608_v7  ;;  %v1171_v32 = vsel %vm66_vm1, %v1169_v62, %v1170_v17  ;;  %v1493_v35 = vld [vmem:[#allocation2 + $0x840] sm:$0xff]  ;;  %v1499_v15 = vld [vmem:[#allocation2 + $0x870] sm:$0xff] }
 0x3eb   :  { %v1159_v26 = vadd.f32 %v1155_v20, %v5207_v25  ;;  %4052 = vmatprep.mubr.f32.mxu1 %v1183_v23  ;;  %4611 = vmatprep.subr.bf16.mxu0 %v4610_v12  ;;  %v1506_v25 = vld [vmem:[#allocation2 + $0x8a8] sm:$0xff]  ;;  %v4622_v50 = vpack.c.bf16 %v1494_v49, %v1493_v35  ;;  %v1497_v7 = vld [vmem:[#allocation2 + $0x860] sm:$0xff]  ;;  %v1511_v12 = vld [vmem:[#allocation2 + $0x8d0] sm:$0xff] }
 0x3ec   :  { %v1160_v31 = vadd.f32 %v1156_v22, %v5215_v40  ;;  %4053 = vmatmul.mubr.msk.f32.vlgmr.msra.gmra.mrb[16].mxu1 %vm79_vm0, %v1182_v16  ;;  %v4646_v48 = vpack.c.bf16 %v1506_v25, %v1505_v41  ;;  %v4630_v9 = vpack.c.bf16 %v1498_v8, %v1497_v7  ;;  %v1481_v62 = vld [vmem:[#allocation2 + $0x7e0] sm:$0xff]  ;;  %v4658_v14 = vpack.c.bf16 %v1512_v13, %v1511_v12  ;;  %v1500_v16 = vld [vmem:[#allocation2 + $0x878] sm:$0xff]  ;;  %v1514_v22 = vld [vmem:[#allocation2 + $0x8e8] sm:$0xff] }
 0x3ed   :  { %v5276_v38 = vmax.f32 %v1159_v26, 0.0  ;;  %1312 = vmatmul.mubr.f32.gmra.mrb[34].mxu0 %v1171_v32  ;;  %4641 = vmatpush3.bf16.msra.mxu1 %v5254_v36  ;;  %v4632_v11 = vpack.c.bf16 %v1482_v10, %v1481_v62  ;;  %v4634_v17 = vpack.c.bf16 %v1500_v16, %v1499_v15  ;;  %v1513_v20 = vld [vmem:[#allocation2 + $0x8e0] sm:$0xff]  ;;  %v1516_v26 = vld [vmem:[#allocation2 + $0x8f8] sm:$0xff]  ;;  %v1778_v10 = vld [vmem:[#allocation2 + $0xa10] sm:$0xff] }
 0x3ee   :  { %v5279_v42 = vmax.f32 %v1160_v31, 0.0  ;;  %4613 = vmatpush3.bf16.msra.mxu0 %v4612_v21  ;;  %4643 = vmatprep.subr.bf16.mxu1 %v4642_v24  ;;  %v4636_v21 = vpack.c.bf16 %v1484_v19, %v1483_v18  ;;  %v4662_v23 = vpack.c.bf16 %v1514_v22, %v1513_v20  ;;  %v4670_v31 = vpack.c.bf16 %v1761_v30, %v1760_v29  ;;  %v1776_v32 = vld [vmem:[#allocation2 + $0xa00] sm:$0xff]  ;;  %v1765_v15 = vld [vmem:[#allocation2 + $0x9a8] sm:$0xff]  ;;  %v1766_v30 = vld [vmem:[#allocation2 + $0x9b0] sm:$0xff] }
 0x3ef   :  { %1316 = vmatprep.mubr.f32.mxu0 %v5276_v38  ;;  %v1172_v40 = vrot.slane %v5276_v38, 7  ;;  %v1184_v44 = vrot.slane %v5276_v38, 1  ;;  %4615 = vmatprep.subr.bf16.mxu0 %v4614_v27  ;;  %v5292_v37 = vpack.c.bf16 %v1777_v33, %v1776_v32  ;;  %v1748_v22 = vld [vmem:[#allocation2 + $0x920] sm:$0xff] }
 0x3f0   :  { %v1185_v47 = vrot.slane %v5279_v42, 1  ;;  %v1173_v36 = vrot.slane %v5279_v42, 7  ;;  %v1780_v33 = vld [vmem:[#allocation2 + $0xa20] sm:$0xff] }
 0x3f1   :  { %3111 = vmatmul.mubr.msk.f32.gmra.mrb[36].mxu0 %vm5171_vm2, %v1172_v40  ;;  %4645 = vmatpush3.bf16.msra.mxu1 %v4642_v24  ;;  %v1515_v24 = vld [vmem:[#allocation2 + $0x8f0] sm:$0xff] }
 0x3f2   :  { %1321 = vmatprep.mubr.f32.mxu0 %v5279_v42  ;;  %v1186_v34 = vsel %vm79_vm0, %v1184_v44, %v1185_v47  ;;  %4617 = vmatpush3.bf16.msra.mxu0 %v4616_v43  ;;  %v1174_v52 = vsel %vm66_vm1, %v1172_v40, %v1173_v36  ;;  %v4666_v27 = vpack.c.bf16 %v1516_v26, %v1515_v24 }
 0x3f3   :  { %4055 = vmatprep.mubr.f32.mxu1 %v1186_v34  ;;  %4619 = vmatprep.subr.bf16.mxu0 %v4618_v45 }
 0x3f4   :  { %4056 = vmatmul.mubr.msk.f32.gmra.mrb[18].mxu1 %vm79_vm0, %v1185_v47  ;;  %4647 = vmatprep.subr.bf16.mxu1 %v4646_v48 }
 0x3f5   :  { %1322 = vmatmul.mubr.f32.gmra.mrb[38].mxu0 %v1174_v52  ;;  %4649 = vmatpush3.bf16.msra.mxu1 %v4646_v48  ;;  %v3115_v48 = vld [vmem:[#allocation6 + $0x4] ss:$0 sm:$0xff]  ;;  %v1744_v52 = vld [vmem:[#allocation2 + $0x900] sm:$0xff] }
 0x3f6   :  { %4621 = vmatpush3.bf16.msra.mxu0 %v4620_v51  ;;  %4651 = vmatprep.subr.bf16.mxu1 %v4650_v58  ;;  %v4672_v0 = vpack.c.bf16 %v1745_v53, %v1744_v52  ;;  %v1768_v53 = vld [vmem:[#allocation2 + $0x9c0] sm:$0xff] }
 0x3f7   :  { %4623 = vmatprep.subr.bf16.mxu0 %v4622_v50 }
 0x3f9   :  { %4653 = vmatpush3.bf16.msra.mxu1 %v4650_v58 }
 0x3fa   :  { %4625 = vmatpush3.bf16.msra.mxu0 %v4624_v56  ;;  %4655 = vmatprep.subr.bf16.mxu1 %v4654_v6  ;;  %v1762_v56 = vld [vmem:[#allocation2 + $0x990] sm:$0xff] }
 0x3fb   :  { %4627 = vmatprep.subr.bf16.mxu0 %v4626_v61  ;;  %v4674_v8 = vpack.c.bf16 %v1763_v57, %v1762_v56  ;;  %v1752_v56 = vld [vmem:[#allocation2 + $0x940] sm:$0xff]  ;;  %v1753_v57 = vld [vmem:[#allocation2 + $0x948] sm:$0xff] }
 0x3fd   :  { %4657 = vmatpush3.bf16.msra.mxu1 %v4654_v6 }
 0x3fe   :  { %4629 = vmatpush3.bf16.msra.mxu0 %v4628_v2  ;;  %4659 = vmatprep.subr.bf16.mxu1 %v4658_v14  ;;  %v1747_v2 = vld [vmem:[#allocation2 + $0x918] sm:$0xff] }
 0x3ff   :  { %4631 = vmatprep.subr.bf16.mxu0 %v4630_v9  ;;  %v4676_v13 = vpack.c.bf16 %v1747_v2, %v1746_v1  ;;  %v1754_v2 = vld [vmem:[#allocation2 + $0x950] sm:$0xff] }
 0x401   :  { %4661 = vmatpush3.bf16.msra.mxu1 %v4658_v14  ;;  %v1764_v14 = vld [vmem:[#allocation2 + $0x9a0] sm:$0xff] }
 0x402   :  { %4633 = vmatpush3.bf16.msra.mxu0 %v4632_v11  ;;  %4663 = vmatprep.subr.bf16.mxu1 %v4662_v23  ;;  %v1779_v11 = vld [vmem:[#allocation2 + $0xa18] sm:$0xff]  ;;  %v4678_v29 = vpack.c.bf16 %v1765_v15, %v1764_v14  ;;  %v1788_v15 = vld [vmem:[#allocation2 + $0xa60] sm:$0xff] }
 0x403   :  { %4635 = vmatprep.subr.bf16.mxu0 %v4634_v17 }
 0x405   :  { %4665 = vmatpush3.bf16.msra.mxu1 %v4662_v23  ;;  %v1749_v23 = vld [vmem:[#allocation2 + $0x928] sm:$0xff] }
 0x406   :  { %4637 = vmatpush3.bf16.msra.mxu0 %v4636_v21  ;;  %4667 = vmatprep.subr.bf16.mxu1 %v4666_v27  ;;  %v4706_v21 = vpack.c.bf16 %v1779_v11, %v1778_v10  ;;  %v1773_v10 = vld [vmem:[#allocation2 + $0x9e8] sm:$0xff] }
 0x407   :  { %4671 = vmatprep.subr.bf16.mxu0 %v4670_v31  ;;  %v1767_v31 = vld [vmem:[#allocation2 + $0x9b8] sm:$0xff] }
 0x409   :  { %4669 = vmatpush3.bf16.msra.mxu1 %v4666_v27 }
 0x40a   :  { %4703 = vmatprep.subr.bf16.mxu1 %v5292_v37 }
 0x4bc   :  { %v3452_v41 = vpop.f32.mrb[32].mxu0 }
 0x4bd   :  { %v3453_v25 = vpop.f32.mrb[33].mxu0 }
 0x4be   :  { %v3454_v43 = vadd.f32 %v3453_v25, %v3452_v41  ;;  %v1781_v41 = vld [vmem:[#allocation2 + $0xa28] sm:$0xff] }
 0x4bf   :  { %v4054_v40 = vpop.f32.mrb[16].mxu1 }
 0x4c0   :  { %v3455_v44 = vpop.f32.mrb[34].mxu0  ;;  %v1393_v45 = vpop.f32.mrb[17].mxu1 }
 0x4c1   :  { %v1394_v39 = vadd.f32 %v3454_v43, %v1393_v45  ;;  %v3456_v47 = vpop.f32.mrb[35].mxu0  ;;  %v4680_v43 = vpack.c.bf16 %v1749_v23, %v1748_v22  ;;  %v1750_v45 = vld [vmem:[#allocation2 + $0x930] sm:$0xff]  ;;  %v1759_v22 = vld [vmem:[#allocation2 + $0x978] sm:$0xff] }
 0x4c2   :  { %v3457_v36 = vadd.f32 %v3456_v47, %v3455_v44  ;;  %v4682_v44 = vpack.c.bf16 %v1767_v31, %v1766_v30  ;;  %v4710_v47 = vpack.c.bf16 %v1781_v41, %v1780_v33  ;;  %v2040_v30 = vld [vmem:[#allocation2 + $0xb08] sm:$0xff] }
 0x4c3   :  { %v1420_v35 = vmul.f32 %v3114_v46, %v1394_v39  ;;  %v2056_v33 = vld [vmem:[#allocation2 + $0xb88] sm:$0xff] }
 0x4c4   :  { %v1399_v49 = vadd.f32 %v4054_v40, %v3457_v36  ;;  %v3458_v34 = vpop.f32.mrb[36].mxu0 }
 0x4c5   :  { %v3459_v51 = vpop.f32.mrb[37].mxu0  ;;  %v1432_v50 = vadd.f32 %v3115_v48, %v1420_v35 }
 0x4c6   :  { %v1421_v54 = vmul.f32 %v3114_v46, %v1399_v49  ;;  %v3460_v55 = vadd.f32 %v3459_v51, %v3458_v34  ;;  %v1782_v51 = vld [vmem:[#allocation2 + $0xa30] sm:$0xff] }
 0x4c7   :  { %v4057_v58 = vpop.f32.mrb[18].mxu1  ;;  %v1436_v59 = vmax.f32 %v1432_v50, 0.0  ;;  %v1783_v50 = vld [vmem:[#allocation2 + $0xa38] sm:$0xff] }
 0x4c8   :  { %v3461_v60 = vpop.f32.mrb[38].mxu0  ;;  %v1403_v61 = vpop.f32.mrb[19].mxu1  ;;  %v1433_v63 = vadd.f32 %v3115_v48, %v1421_v54  ;;  %v4714_v52 = vpack.c.bf16 %v1783_v50, %v1782_v51  ;;  %v1769_v54 = vld [vmem:[#allocation2 + $0x9c8] sm:$0xff] }
 0x4c9   :  { %v1404_v4 = vadd.f32 %v3460_v55, %v1403_v61  ;;  %v3462_v6 = vpop.f32.mrb[39].mxu0  ;;  %v1444_v7 = vrot.slane %v1436_v59, 7  ;;  %1581 = vmatprep.mubr.f32.mxu0 %v1436_v59  ;;  %v1456_v18 = vrot.slane %v1436_v59, 1  ;;  %v4686_v55 = vpack.c.bf16 %v1769_v54, %v1768_v53  ;;  %v1784_v59 = vld [vmem:[#allocation2 + $0xa40] sm:$0xff] }
 0x4ca   :  { %v3463_v9 = vadd.f32 %v3462_v6, %v3461_v60  ;;  %v1437_v62 = vmax.f32 %v1433_v63, 0.0  ;;  %v1785_v60 = vld [vmem:[#allocation2 + $0xa48] sm:$0xff]  ;;  %v1770_v63 = vld [vmem:[#allocation2 + $0x9d0] sm:$0xff]  ;;  %v2023_v54 = vld [vmem:[#allocation2 + $0xa80] sm:$0xff] }
 0x4cb   :  { %v1422_v12 = vmul.f32 %v3114_v46, %v1404_v4  ;;  %3117 = vmatmul.mubr.msk.f32.vlgmr.msra.gmra.mrb[40].mxu0 %vm5171_vm2, %v1444_v7  ;;  %v4718_v61 = vpack.c.bf16 %v1785_v60, %v1784_v59  ;;  %v1755_v4 = vld [vmem:[#allocation2 + $0x958] sm:$0xff] }
 0x4cc   :  { %v1409_v16 = vadd.f32 %v4057_v58, %v3463_v9  ;;  %1586 = vmatprep.mubr.f32.mxu0 %v1437_v62  ;;  %v1445_v17 = vrot.slane %v1437_v62, 7  ;;  %v1457_v19 = vrot.slane %v1437_v62, 1  ;;  %4673 = vmatpush3.bf16.msra.mxu0 %v4672_v0  ;;  %v4688_v58 = vpack.c.bf16 %v1753_v57, %v1752_v56  ;;  %v1771_v0 = vld [vmem:[#allocation2 + $0x9d8] sm:$0xff]  ;;  %v1772_v62 = vld [vmem:[#allocation2 + $0x9e0] sm:$0xff] }
 0x4cd   :  { %v1434_v20 = vadd.f32 %v3115_v48, %v1422_v12  ;;  %4675 = vmatprep.subr.bf16.mxu0 %v4674_v8  ;;  %v4690_v1 = vpack.c.bf16 %v1771_v0, %v1770_v63  ;;  %v4692_v6 = vpack.c.bf16 %v1755_v4, %v1754_v2  ;;  %v1787_v8 = vld [vmem:[#allocation2 + $0xa58] sm:$0xff]  ;;  %v4694_v11 = vpack.c.bf16 %v1773_v10, %v1772_v62  ;;  %v1756_v12 = vld [vmem:[#allocation2 + $0x960] sm:$0xff]  ;;  %v2025_v0 = vld [vmem:[#allocation2 + $0xa90] sm:$0xff] }
 0x4ce   :  { %v1423_v24 = vmul.f32 %v3114_v46, %v1409_v16  ;;  %v1446_v26 = vsel %vm66_vm1, %v1444_v7, %v1445_v17  ;;  %v1458_v27 = vsel %vm79_vm0, %v1456_v18, %v1457_v19  ;;  %v1751_v46 = vld [vmem:[#allocation2 + $0x938] sm:$0xff]  ;;  %v1786_v7 = vld [vmem:[#allocation2 + $0xa50] sm:$0xff]  ;;  %v1789_v16 = vld [vmem:[#allocation2 + $0xa68] sm:$0xff] }
 0x4cf   :  { %1587 = vmatmul.mubr.f32.gmra.mrb[42].mxu0 %v1446_v26  ;;  %4090 = vmatprep.mubr.f32.mxu1 %v1458_v27  ;;  %v1438_v32 = vmax.f32 %v1434_v20, 0.0  ;;  %v4684_v49 = vpack.c.bf16 %v1751_v46, %v1750_v45  ;;  %v4722_v9 = vpack.c.bf16 %v1787_v8, %v1786_v7  ;;  %v4726_v17 = vpack.c.bf16 %v1789_v16, %v1788_v15  ;;  %v1774_v18 = vld [vmem:[#allocation2 + $0x9f0] sm:$0xff]  ;;  %v1791_v26 = vld [vmem:[#allocation2 + $0xa78] sm:$0xff]  ;;  %v2043_v16 = vld [vmem:[#allocation2 + $0xb20] sm:$0xff] }
 0x4d0   :  { %4091 = vmatmul.mubr.msk.f32.vlgmr.msra.gmra.mrb[20].mxu1 %vm79_vm0, %v1457_v19  ;;  %v1435_v25 = vadd.f32 %v3115_v48, %v1423_v24  ;;  %4677 = vmatpush3.bf16.msra.mxu0 %v4676_v13  ;;  %v1757_v13 = vld [vmem:[#allocation2 + $0x968] sm:$0xff]  ;;  %v1775_v19 = vld [vmem:[#allocation2 + $0x9f8] sm:$0xff]  ;;  %v1790_v24 = vld [vmem:[#allocation2 + $0xa70] sm:$0xff] }
 0x4d1   :  { %1591 = vmatprep.mubr.f32.mxu0 %v1438_v32  ;;  %v1447_v40 = vrot.slane %v1438_v32, 7  ;;  %4705 = vmatpush3.bf16.msra.mxu1 %v5292_v37  ;;  %v1459_v35 = vrot.slane %v1438_v32, 1  ;;  %v4696_v14 = vpack.c.bf16 %v1757_v13, %v1756_v12  ;;  %v4698_v20 = vpack.c.bf16 %v1775_v19, %v1774_v18  ;;  %v2055_v32 = vld [vmem:[#allocation2 + $0xb80] sm:$0xff]  ;;  %v2042_v59 = vld [vmem:[#allocation2 + $0xb18] sm:$0xff]  ;;  %v2057_v8 = vld [vmem:[#allocation2 + $0xb90] sm:$0xff] }
 0x4d2   :  { %v1439_v39 = vmax.f32 %v1435_v25, 0.0  ;;  %4707 = vmatprep.subr.bf16.mxu1 %v4706_v21  ;;  %4679 = vmatprep.subr.bf16.mxu0 %v4678_v29  ;;  %v4730_v27 = vpack.c.bf16 %v1791_v26, %v1790_v24  ;;  %v2039_v29 = vld [vmem:[#allocation2 + $0xb00] sm:$0xff]  ;;  %v5306_v41 = vpack.c.bf16 %v2056_v33, %v2055_v32  ;;  %v2026_v7 = vld [vmem:[#allocation2 + $0xa98] sm:$0xff] }
 0x4d3   :  { %3119 = vmatmul.mubr.msk.f32.gmra.mrb[44].mxu0 %vm5171_vm2, %v1447_v40  ;;  %v4734_v31 = vpack.c.bf16 %v2040_v30, %v2039_v29  ;;  %v4740_v19 = vpack.c.bf16 %v2026_v7, %v2025_v0  ;;  %v2028_v29 = vld [vmem:[#allocation2 + $0xaa8] sm:$0xff]  ;;  %v2046_v32 = vld [vmem:[#allocation2 + $0xb38] sm:$0xff]  ;;  %v2051_v7 = vld [vmem:[#allocation2 + $0xb60] sm:$0xff] }
 0x4d4   :  { %1596 = vmatprep.mubr.f32.mxu0 %v1439_v39  ;;  %v1448_v36 = vrot.slane %v1439_v39, 7  ;;  %v1460_v48 = vrot.slane %v1439_v39, 1  ;;  %4681 = vmatpush3.bf16.msra.mxu0 %v4680_v43  ;;  %v2034_v0 = vld [vmem:[#allocation2 + $0xad8] sm:$0xff] }
 0x4d5   :  { %4709 = vmatpush3.bf16.msra.mxu1 %v4706_v21  ;;  %4683 = vmatprep.subr.bf16.mxu0 %v4682_v44  ;;  %v1758_v21 = vld [vmem:[#allocation2 + $0x970] sm:$0xff] }
 0x4d6   :  { %v1449_v37 = vsel %vm66_vm1, %v1447_v40, %v1448_v36  ;;  %v1461_v34 = vsel %vm79_vm0, %v1459_v35, %v1460_v48  ;;  %4711 = vmatprep.subr.bf16.mxu1 %v4710_v47  ;;  %v4700_v23 = vpack.c.bf16 %v1759_v22, %v1758_v21 }
 0x4d7   :  { %1597 = vmatmul.mubr.f32.gmra.mrb[46].mxu0 %v1449_v37  ;;  %4093 = vmatprep.mubr.f32.mxu1 %v1461_v34  ;;  %v3123_v37 = vld [vmem:[#allocation6 + $0x5] ss:$0 sm:$0xff] }
 0x4d8   :  { %4094 = vmatmul.mubr.msk.f32.gmra.mrb[22].mxu1 %vm79_vm0, %v1460_v48  ;;  %4685 = vmatpush3.bf16.msra.mxu0 %v4684_v49 }
 0x4d9   :  { %4713 = vmatpush3.bf16.msra.mxu1 %v4710_v47  ;;  %4687 = vmatprep.subr.bf16.mxu0 %v4686_v55  ;;  %v3122_v47 = vld [vmem:[#allocation4 + $0x5] ss:$0 sm:$0xff]  ;;  %v2024_v55 = vld [vmem:[#allocation2 + $0xa88] sm:$0xff] }
 0x4da   :  { %4715 = vmatprep.subr.bf16.mxu1 %v4714_v52 }
 0x4dc   :  { %4689 = vmatpush3.bf16.msra.mxu0 %v4688_v58  ;;  %v2041_v58 = vld [vmem:[#allocation2 + $0xb10] sm:$0xff] }
 0x4dd   :  { %4717 = vmatpush3.bf16.msra.mxu1 %v4714_v52  ;;  %4691 = vmatprep.subr.bf16.mxu0 %v4690_v1  ;;  %v4738_v12 = vpack.c.bf16 %v2042_v59, %v2041_v58  ;;  %v2049_v59 = vld [vmem:[#allocation2 + $0xb50] sm:$0xff] }
 0x4de   :  { %4719 = vmatprep.subr.bf16.mxu1 %v4718_v61 }
 0x4e0   :  { %4693 = vmatpush3.bf16.msra.mxu0 %v4692_v6  ;;  %v4736_v6 = vpack.c.bf16 %v2024_v55, %v2023_v54  ;;  %v2032_v54 = vld [vmem:[#allocation2 + $0xac8] sm:$0xff]  ;;  %v2061_v55 = vld [vmem:[#allocation2 + $0xbb0] sm:$0xff] }
 0x4e1   :  { %4721 = vmatpush3.bf16.msra.mxu1 %v4718_v61  ;;  %4695 = vmatprep.subr.bf16.mxu0 %v4694_v11 }
 0x4e2   :  { %4723 = vmatprep.subr.bf16.mxu1 %v4722_v9 }
 0x4e4   :  { %4697 = vmatpush3.bf16.msra.mxu0 %v4696_v14 }
 0x4e5   :  { %4725 = vmatpush3.bf16.msra.mxu1 %v4722_v9  ;;  %4699 = vmatprep.subr.bf16.mxu0 %v4698_v20  ;;  %v2058_v9 = vld [vmem:[#allocation2 + $0xb98] sm:$0xff] }
 0x4e6   :  { %4727 = vmatprep.subr.bf16.mxu1 %v4726_v17  ;;  %v4770_v20 = vpack.c.bf16 %v2058_v9, %v2057_v8  ;;  %v2052_v8 = vld [vmem:[#allocation2 + $0xb68] sm:$0xff] }
 0x4e7   :  { %v4758_v9 = vpack.c.bf16 %v2052_v8, %v2051_v7  ;;  %v2300_v8 = vld [vmem:[#allocation2 + $0xc10] sm:$0xff] }
 0x4e8   :  { %4701 = vmatpush3.bf16.msra.mxu0 %v4700_v23 }
 0x4e9   :  { %4729 = vmatpush3.bf16.msra.mxu1 %v4726_v17  ;;  %4735 = vmatprep.subr.bf16.mxu0 %v4734_v31  ;;  %v2044_v17 = vld [vmem:[#allocation2 + $0xb28] sm:$0xff]  ;;  %v2045_v31 = vld [vmem:[#allocation2 + $0xb30] sm:$0xff] }
 0x4ea   :  { %4731 = vmatprep.subr.bf16.mxu1 %v4730_v27  ;;  %v4742_v26 = vpack.c.bf16 %v2044_v17, %v2043_v16  ;;  %v2054_v16 = vld [vmem:[#allocation2 + $0xb78] sm:$0xff] }
 0x4ed   :  { %4733 = vmatpush3.bf16.msra.mxu1 %v4730_v27  ;;  %v2027_v27 = vld [vmem:[#allocation2 + $0xaa0] sm:$0xff] }
 0x4ee   :  { %4767 = vmatprep.subr.bf16.mxu1 %v5306_v41 }
 0x59e   :  { %v3516_v25 = vpop.f32.mrb[40].mxu0 }
 0x59f   :  { %v3517_v43 = vpop.f32.mrb[41].mxu0 }
 0x5a0   :  { %v3518_v40 = vadd.f32 %v3517_v43, %v3516_v25  ;;  %v2059_v25 = vld [vmem:[#allocation2 + $0xba0] sm:$0xff]  ;;  %v2060_v43 = vld [vmem:[#allocation2 + $0xba8] sm:$0xff] }
 0x5a2   :  { %v3519_v44 = vpop.f32.mrb[42].mxu0 }
 0x5a3   :  { %v3520_v45 = vpop.f32.mrb[43].mxu0  ;;  %v4092_v46 = vpop.f32.mrb[20].mxu1 }
 0x5a4   :  { %v3521_v39 = vadd.f32 %v3520_v45, %v3519_v44  ;;  %v1668_v36 = vpop.f32.mrb[21].mxu1  ;;  %v4744_v44 = vpack.c.bf16 %v2028_v29, %v2027_v27  ;;  %v2314_v29 = vld [vmem:[#allocation2 + $0xc80] sm:$0xff] }
 0x5a5   :  { %v1669_v35 = vadd.f32 %v3518_v40, %v1668_v36  ;;  %v2030_v36 = vld [vmem:[#allocation2 + $0xab8] sm:$0xff] }
 0x5a6   :  { %v1674_v48 = vadd.f32 %v4092_v46, %v3521_v39  ;;  %v3522_v49 = vpop.f32.mrb[44].mxu0  ;;  %v4746_v39 = vpack.c.bf16 %v2046_v32, %v2045_v31  ;;  %v2330_v32 = vld [vmem:[#allocation2 + $0xd00] sm:$0xff] }
 0x5a7   :  { %v1695_v34 = vmul.f32 %v3122_v47, %v1669_v35  ;;  %v3523_v51 = vpop.f32.mrb[45].mxu0 }
 0x5a8   :  { %v1696_v50 = vmul.f32 %v3122_v47, %v1674_v48  ;;  %v3524_v52 = vadd.f32 %v3523_v51, %v3522_v49  ;;  %v4774_v49 = vpack.c.bf16 %v2060_v43, %v2059_v25  ;;  %v2047_v51 = vld [vmem:[#allocation2 + $0xb40] sm:$0xff] }
 0x5a9   :  { %v1707_v53 = vadd.f32 %v3123_v37, %v1695_v34 }
 0x5aa   :  { %v3525_v56 = vpop.f32.mrb[46].mxu0  ;;  %v1708_v57 = vadd.f32 %v3123_v37, %v1696_v50  ;;  %v2048_v50 = vld [vmem:[#allocation2 + $0xb48] sm:$0xff] }
 0x5ab   :  { %v3526_v60 = vpop.f32.mrb[47].mxu0  ;;  %v4095_v61 = vpop.f32.mrb[22].mxu1  ;;  %v1711_v63 = vmax.f32 %v1707_v53, 0.0  ;;  %v2031_v53 = vld [vmem:[#allocation2 + $0xac0] sm:$0xff] }
 0x5ac   :  { %v3527_v1 = vadd.f32 %v3526_v60, %v3525_v56  ;;  %v1678_v2 = vpop.f32.mrb[23].mxu1  ;;  %v1712_v4 = vmax.f32 %v1708_v57, 0.0  ;;  %v4752_v56 = vpack.c.bf16 %v2032_v54, %v2031_v53  ;;  %v2062_v57 = vld [vmem:[#allocation2 + $0xbb8] sm:$0xff] }
 0x5ad   :  { %v1679_v62 = vadd.f32 %v3524_v52, %v1678_v2  ;;  %v1719_v10 = vrot.slane %v1711_v63, 7  ;;  %1856 = vmatprep.mubr.f32.mxu0 %v1711_v63  ;;  %v1731_v11 = vrot.slane %v1711_v63, 1  ;;  %v4750_v52 = vpack.c.bf16 %v2048_v50, %v2047_v51  ;;  %v2050_v60 = vld [vmem:[#allocation2 + $0xb58] sm:$0xff]  ;;  %v2033_v63 = vld [vmem:[#allocation2 + $0xad0] sm:$0xff] }
 0x5ae   :  { %v1684_v13 = vadd.f32 %v4095_v61, %v3527_v1  ;;  %v1732_v14 = vrot.slane %v1712_v4, 1  ;;  %v1720_v15 = vrot.slane %v1712_v4, 7  ;;  %v4778_v58 = vpack.c.bf16 %v2062_v57, %v2061_v55  ;;  %v2063_v1 = vld [vmem:[#allocation2 + $0xbc0] sm:$0xff]  ;;  %v2299_v57 = vld [vmem:[#allocation2 + $0xc08] sm:$0xff] }
 0x5af   :  { %v1697_v18 = vmul.f32 %v3122_v47, %v1679_v62  ;;  %3125 = vmatmul.mubr.msk.f32.vlgmr.msra.gmra.mrb[48].mxu0 %vm5171_vm2, %v1719_v10  ;;  %v4754_v61 = vpack.c.bf16 %v2050_v60, %v2049_v59  ;;  %v4756_v2 = vpack.c.bf16 %v2034_v0, %v2033_v63  ;;  %v2035_v62 = vld [vmem:[#allocation2 + $0xae0] sm:$0xff]  ;;  %v2317_v63 = vld [vmem:[#allocation2 + $0xc98] sm:$0xff] }
 0x5b0   :  { %v1698_v21 = vmul.f32 %v3122_v47, %v1684_v13  ;;  %1861 = vmatprep.mubr.f32.mxu0 %v1712_v4  ;;  %v1733_v22 = vsel %vm79_vm0, %v1731_v11, %v1732_v14  ;;  %v1721_v23 = vsel %vm66_vm1, %v1719_v10, %v1720_v15  ;;  %4737 = vmatpush3.bf16.msra.mxu0 %v4736_v6  ;;  %v2029_v47 = vld [vmem:[#allocation2 + $0xab0] sm:$0xff]  ;;  %v2064_v4 = vld [vmem:[#allocation2 + $0xbc8] sm:$0xff]  ;;  %v2066_v13 = vld [vmem:[#allocation2 + $0xbd8] sm:$0xff] }
 0x5b1   :  { %4128 = vmatprep.mubr.f32.mxu1 %v1733_v22  ;;  %v1709_v24 = vadd.f32 %v3123_v37, %v1697_v18  ;;  %4739 = vmatprep.subr.bf16.mxu0 %v4738_v12  ;;  %v4748_v34 = vpack.c.bf16 %v2030_v36, %v2029_v47  ;;  %v4782_v6 = vpack.c.bf16 %v2064_v4, %v2063_v1  ;;  %v2036_v10 = vld [vmem:[#allocation2 + $0xae8] sm:$0xff]  ;;  %v2065_v12 = vld [vmem:[#allocation2 + $0xbd0] sm:$0xff]  ;;  %v3130_v47 = vld [vmem:[#allocation4 + $0x6] ss:$0 sm:$0xff] }
 0x5b2   :  { %4129 = vmatmul.mubr.msk.f32.vlgmr.msra.gmra.mrb[24].mxu1 %vm79_vm0, %v1732_v14  ;;  %v1710_v30 = vadd.f32 %v3123_v37, %v1698_v21  ;;  %v4760_v11 = vpack.c.bf16 %v2036_v10, %v2035_v62  ;;  %v4786_v14 = vpack.c.bf16 %v2066_v13, %v2065_v12  ;;  %v2053_v15 = vld [vmem:[#allocation2 + $0xb70] sm:$0xff]  ;;  %v2068_v22 = vld [vmem:[#allocation2 + $0xbe8] sm:$0xff] }
 0x5b3   :  { %1862 = vmatmul.mubr.f32.gmra.mrb[50].mxu0 %v1721_v23  ;;  %v1713_v33 = vmax.f32 %v1709_v24, 0.0  ;;  %4769 = vmatpush3.bf16.msra.mxu1 %v5306_v41  ;;  %v4762_v17 = vpack.c.bf16 %v2054_v16, %v2053_v15  ;;  %v2037_v18 = vld [vmem:[#allocation2 + $0xaf0] sm:$0xff]  ;;  %v2318_v16 = vld [vmem:[#allocation2 + $0xca0] sm:$0xff] }
 0x5b4   :  { %v1714_v40 = vmax.f32 %v1710_v30, 0.0  ;;  %4741 = vmatpush3.bf16.msra.mxu0 %v4740_v19  ;;  %4771 = vmatprep.subr.bf16.mxu1 %v4770_v20  ;;  %v2038_v19 = vld [vmem:[#allocation2 + $0xaf8] sm:$0xff]  ;;  %v2069_v24 = vld [vmem:[#allocation2 + $0xbf0] sm:$0xff]  ;;  %v2315_v30 = vld [vmem:[#allocation2 + $0xc88] sm:$0xff] }
 0x5b5   :  { %1866 = vmatprep.mubr.f32.mxu0 %v1713_v33  ;;  %v1722_v45 = vrot.slane %v1713_v33, 7  ;;  %v1734_v46 = vrot.slane %v1713_v33, 1  ;;  %4743 = vmatprep.subr.bf16.mxu0 %v4742_v26  ;;  %v4764_v21 = vpack.c.bf16 %v2038_v19, %v2037_v18  ;;  %v2070_v26 = vld [vmem:[#allocation2 + $0xbf8] sm:$0xff]  ;;  %v4798_v31 = vpack.c.bf16 %v2315_v30, %v2314_v29  ;;  %v2331_v33 = vld [vmem:[#allocation2 + $0xd08] sm:$0xff]  ;;  %v2332_v13 = vld [vmem:[#allocation2 + $0xd10] sm:$0xff] }
 0x5b6   :  { %v1735_v35 = vrot.slane %v1714_v40, 1  ;;  %v1723_v48 = vrot.slane %v1714_v40, 7  ;;  %v4794_v27 = vpack.c.bf16 %v2070_v26, %v2069_v24  ;;  %v5320_v25 = vpack.c.bf16 %v2331_v33, %v2330_v32  ;;  %v2302_v24 = vld [vmem:[#allocation2 + $0xc20] sm:$0xff]  ;;  %v2303_v26 = vld [vmem:[#allocation2 + $0xc28] sm:$0xff]  ;;  %v2320_v32 = vld [vmem:[#allocation2 + $0xcb0] sm:$0xff] }
 0x5b7   :  { %3127 = vmatmul.mubr.msk.f32.gmra.mrb[52].mxu0 %vm5171_vm2, %v1722_v45  ;;  %4773 = vmatpush3.bf16.msra.mxu1 %v4770_v20  ;;  %v2067_v20 = vld [vmem:[#allocation2 + $0xbe0] sm:$0xff]  ;;  %v2321_v33 = vld [vmem:[#allocation2 + $0xcb8] sm:$0xff] }
 0x5b8   :  { %1871 = vmatprep.mubr.f32.mxu0 %v1714_v40  ;;  %v1736_v41 = vsel %vm79_vm0, %v1734_v46, %v1735_v35  ;;  %v1724_v37 = vsel %vm66_vm1, %v1722_v45, %v1723_v48  ;;  %4745 = vmatpush3.bf16.msra.mxu0 %v4744_v44  ;;  %v4790_v23 = vpack.c.bf16 %v2068_v22, %v2067_v20  ;;  %v3131_v48 = vld [vmem:[#allocation6 + $0x6] ss:$0 sm:$0xff] }
 0x5b9   :  { %4131 = vmatprep.mubr.f32.mxu1 %v1736_v41  ;;  %4747 = vmatprep.subr.bf16.mxu0 %v4746_v39 }
 0x5ba   :  { %4132 = vmatmul.mubr.msk.f32.gmra.mrb[26].mxu1 %vm79_vm0, %v1735_v35  ;;  %4775 = vmatprep.subr.bf16.mxu1 %v4774_v49 }
 0x5bb   :  { %1872 = vmatmul.mubr.f32.gmra.mrb[54].mxu0 %v1724_v37  ;;  %4777 = vmatpush3.bf16.msra.mxu1 %v4774_v49 }
 0x5bc   :  { %4749 = vmatpush3.bf16.msra.mxu0 %v4748_v34  ;;  %4779 = vmatprep.subr.bf16.mxu1 %v4778_v58 }
 0x5bd   :  { %4751 = vmatprep.subr.bf16.mxu0 %v4750_v52 }
 0x5bf   :  { %4781 = vmatpush3.bf16.msra.mxu1 %v4778_v58 }
 0x5c0   :  { %4753 = vmatpush3.bf16.msra.mxu0 %v4752_v56  ;;  %4783 = vmatprep.subr.bf16.mxu1 %v4782_v6  ;;  %v2298_v56 = vld [vmem:[#allocation2 + $0xc00] sm:$0xff] }
 0x5c1   :  { %4755 = vmatprep.subr.bf16.mxu0 %v4754_v61  ;;  %v2316_v61 = vld [vmem:[#allocation2 + $0xc90] sm:$0xff]  ;;  %v4800_v7 = vpack.c.bf16 %v2299_v57, %v2298_v56  ;;  %v2306_v56 = vld [vmem:[#allocation2 + $0xc40] sm:$0xff]  ;;  %v2307_v57 = vld [vmem:[#allocation2 + $0xc48] sm:$0xff] }
 0x5c2   :  { %v4802_v10 = vpack.c.bf16 %v2317_v63, %v2316_v61  ;;  %v2324_v63 = vld [vmem:[#allocation2 + $0xcd0] sm:$0xff] }
 0x5c3   :  { %4785 = vmatpush3.bf16.msra.mxu1 %v4782_v6 }
 0x5c4   :  { %4757 = vmatpush3.bf16.msra.mxu0 %v4756_v2  ;;  %4787 = vmatprep.subr.bf16.mxu1 %v4786_v14 }
 0x5c5   :  { %4759 = vmatprep.subr.bf16.mxu0 %v4758_v9  ;;  %v2301_v9 = vld [vmem:[#allocation2 + $0xc18] sm:$0xff] }
 0x5c7   :  { %4789 = vmatpush3.bf16.msra.mxu1 %v4786_v14  ;;  %v2333_v14 = vld [vmem:[#allocation2 + $0xd18] sm:$0xff] }
 0x5c8   :  { %4761 = vmatpush3.bf16.msra.mxu0 %v4760_v11  ;;  %4791 = vmatprep.subr.bf16.mxu1 %v4790_v23 }
 0x5c9   :  { %4763 = vmatprep.subr.bf16.mxu0 %v4762_v17  ;;  %v2319_v17 = vld [vmem:[#allocation2 + $0xca8] sm:$0xff] }
 0x5cb   :  { %4793 = vmatpush3.bf16.msra.mxu1 %v4790_v23  ;;  %v4834_v23 = vpack.c.bf16 %v2333_v14, %v2332_v13  ;;  %v2310_v14 = vld [vmem:[#allocation2 + $0xc60] sm:$0xff] }
 0x5cc   :  { %4765 = vmatpush3.bf16.msra.mxu0 %v4764_v21  ;;  %4795 = vmatprep.subr.bf16.mxu1 %v4794_v27 }
 0x5cd   :  { %4799 = vmatprep.subr.bf16.mxu0 %v4798_v31  ;;  %v4806_v31 = vpack.c.bf16 %v2319_v17, %v2318_v16  ;;  %v2342_v16 = vld [vmem:[#allocation2 + $0xd60] sm:$0xff]  ;;  %v2343_v17 = vld [vmem:[#allocation2 + $0xd68] sm:$0xff] }
 0x5cf   :  { %4797 = vmatpush3.bf16.msra.mxu1 %v4794_v27 }
 0x5d0   :  { %4831 = vmatprep.subr.bf16.mxu1 %v5320_v25 }
 0x682   :  { %v3580_v43 = vpop.f32.mrb[48].mxu0 }
 0x683   :  { %v3581_v40 = vpop.f32.mrb[49].mxu0 }
 0x684   :  { %v3582_v44 = vadd.f32 %v3581_v40, %v3580_v43  ;;  %v2335_v40 = vld [vmem:[#allocation2 + $0xd28] sm:$0xff] }
 0x685   :  { %v4130_v45 = vpop.f32.mrb[24].mxu1 }
 0x686   :  { %v3583_v46 = vpop.f32.mrb[50].mxu0  ;;  %v1943_v39 = vpop.f32.mrb[25].mxu1 }
 0x687   :  { %v1944_v36 = vadd.f32 %v3582_v44, %v1943_v39  ;;  %v3584_v35 = vpop.f32.mrb[51].mxu0  ;;  %v4810_v39 = vpack.c.bf16 %v2321_v33, %v2320_v32  ;;  %v2561_v33 = vld [vmem:[#allocation2 + $0xf80] sm:$0xff] }
 0x688   :  { %v3585_v49 = vadd.f32 %v3584_v35, %v3583_v46 }
 0x689   :  { %v1970_v41 = vmul.f32 %v3130_v47, %v1944_v36  ;;  %v2305_v36 = vld [vmem:[#allocation2 + $0xc38] sm:$0xff] }
 0x68a   :  { %v1949_v37 = vadd.f32 %v4130_v45, %v3585_v49  ;;  %v3586_v34 = vpop.f32.mrb[52].mxu0  ;;  %v4808_v45 = vpack.c.bf16 %v2303_v26, %v2302_v24  ;;  %v2337_v49 = vld [vmem:[#allocation2 + $0xd38] sm:$0xff] }
 0x68b   :  { %v1982_v51 = vadd.f32 %v3131_v48, %v1970_v41  ;;  %v3587_v50 = vpop.f32.mrb[53].mxu0  ;;  %v2313_v24 = vld [vmem:[#allocation2 + $0xc78] sm:$0xff] }
 0x68c   :  { %v1971_v52 = vmul.f32 %v3130_v47, %v1949_v37  ;;  %v3588_v53 = vadd.f32 %v3587_v50, %v3586_v34 }
 0x68d   :  { %v1986_v54 = vadd.f32 %v1982_v51, %v5259_v3  ;;  %v4133_v55 = vpop.f32.mrb[26].mxu1 }
 0x68e   :  { %v1983_v58 = vadd.f32 %v3131_v48, %v1971_v52  ;;  %v3589_v59 = vpop.f32.mrb[54].mxu0  ;;  %v1953_v60 = vpop.f32.mrb[27].mxu1 }
 0x68f   :  { %v5324_v0 = vmax.f32 %v1986_v54, 0.0  ;;  %v1954_v1 = vadd.f32 %v3588_v53, %v1953_v60  ;;  %v3590_v2 = vpop.f32.mrb[55].mxu0  ;;  %v2322_v53 = vld [vmem:[#allocation2 + $0xcc0] sm:$0xff]  ;;  %v2323_v54 = vld [vmem:[#allocation2 + $0xcc8] sm:$0xff] }
 0x690   :  { %v3591_v4 = vadd.f32 %v3590_v2, %v3589_v59  ;;  %v1987_v6 = vadd.f32 %v1983_v58, %v5261_v5  ;;  %v4804_v5 = vpack.c.bf16 %v2301_v9, %v2300_v8  ;;  %v4816_v58 = vpack.c.bf16 %v2307_v57, %v2306_v56  ;;  %v2338_v59 = vld [vmem:[#allocation2 + $0xd40] sm:$0xff]  ;;  %v2339_v60 = vld [vmem:[#allocation2 + $0xd48] sm:$0xff]  ;;  %v2340_v8 = vld [vmem:[#allocation2 + $0xd50] sm:$0xff] }
 0x691   :  { %v5328_v3 = vrot.slane %v5324_v0, 7  ;;  %v1972_v62 = vmul.f32 %v3130_v47, %v1954_v1  ;;  %2135 = vmatprep.mubr.f32.mxu0 %v5324_v0  ;;  %v2010_v20 = vrot.slane %v5324_v0, 1  ;;  %v4846_v61 = vpack.c.bf16 %v2339_v60, %v2338_v59  ;;  %v2325_v1 = vld [vmem:[#allocation2 + $0xcd8] sm:$0xff]  ;;  %v3139_v56 = vld [vmem:[#allocation6 + $0x7] ss:$0 sm:$0xff] }
 0x692   :  { %v1959_v11 = vadd.f32 %v4133_v55, %v3591_v4  ;;  %v5331_v12 = vmax.f32 %v1987_v6, 0.0  ;;  %v4814_v55 = vpack.c.bf16 %v2323_v54, %v2322_v53  ;;  %v4818_v2 = vpack.c.bf16 %v2325_v1, %v2324_v63  ;;  %v2308_v4 = vld [vmem:[#allocation2 + $0xc50] sm:$0xff]  ;;  %v2309_v6 = vld [vmem:[#allocation2 + $0xc58] sm:$0xff]  ;;  %v2545_v63 = vld [vmem:[#allocation2 + $0xf00] sm:$0xff] }
 0x693   :  { %v1984_v15 = vadd.f32 %v3131_v48, %v1972_v62  ;;  %3133 = vmatmul.mubr.msk.f32.vlgmr.msra.gmra.mrb[56].mxu0 %vm5171_vm2, %v5328_v3  ;;  %v2341_v9 = vld [vmem:[#allocation2 + $0xd58] sm:$0xff]  ;;  %v2546_v1 = vld [vmem:[#allocation2 + $0xf08] sm:$0xff] }
 0x694   :  { %v1973_v18 = vmul.f32 %v3130_v47, %v1959_v11  ;;  %2140 = vmatprep.mubr.f32.mxu0 %v5331_v12  ;;  %v1999_v19 = vrot.slane %v5331_v12, 7  ;;  %v5340_v21 = vrot.slane %v5331_v12, 1  ;;  %4801 = vmatpush3.bf16.msra.mxu0 %v4800_v7  ;;  %v2304_v47 = vld [vmem:[#allocation2 + $0xc30] sm:$0xff]  ;;  %v4820_v7 = vpack.c.bf16 %v2309_v6, %v2308_v4  ;;  %v2327_v11 = vld [vmem:[#allocation2 + $0xce8] sm:$0xff] }
 0x695   :  { %v1988_v22 = vadd.f32 %v1984_v15, %v5276_v38  ;;  %4803 = vmatprep.subr.bf16.mxu0 %v4802_v10  ;;  %v2334_v38 = vld [vmem:[#allocation2 + $0xd20] sm:$0xff]  ;;  %v4812_v34 = vpack.c.bf16 %v2305_v36, %v2304_v47  ;;  %v4850_v62 = vpack.c.bf16 %v2341_v9, %v2340_v8  ;;  %v2311_v15 = vld [vmem:[#allocation2 + $0xc68] sm:$0xff]  ;;  %v2563_v6 = vld [vmem:[#allocation2 + $0xf90] sm:$0xff] }
 0x696   :  { %v1985_v27 = vadd.f32 %v3131_v48, %v1973_v18  ;;  %v5345_v29 = vsel %vm66_vm1, %v5328_v3, %v1999_v19  ;;  %v5349_v30 = vsel %vm79_vm0, %v2010_v20, %v5340_v21  ;;  %v4838_v48 = vpack.c.bf16 %v2335_v40, %v2334_v38  ;;  %v2326_v10 = vld [vmem:[#allocation2 + $0xce0] sm:$0xff]  ;;  %v2328_v19 = vld [vmem:[#allocation2 + $0xcf0] sm:$0xff]  ;;  %v2329_v20 = vld [vmem:[#allocation2 + $0xcf8] sm:$0xff] }
 0x697   :  { %v5351_v43 = vmax.f32 %v1988_v22, 0.0  ;;  %2141 = vmatmul.mubr.f32.gmra.mrb[58].mxu0 %v5345_v29  ;;  %4166 = vmatprep.mubr.f32.mxu1 %v5349_v30  ;;  %v4822_v13 = vpack.c.bf16 %v2327_v11, %v2326_v10  ;;  %v4854_v18 = vpack.c.bf16 %v2343_v17, %v2342_v16  ;;  %v4826_v22 = vpack.c.bf16 %v2329_v20, %v2328_v19  ;;  %v2562_v38 = vld [vmem:[#allocation2 + $0xf88] sm:$0xff]  ;;  %v2547_v10 = vld [vmem:[#allocation2 + $0xf10] sm:$0xff]  ;;  %v2580_v17 = vld [vmem:[#allocation2 + $0x1018] sm:$0xff] }
 0x698   :  { %4167 = vmatmul.mubr.msk.f32.vlgmr.msra.gmra.mrb[28].mxu1 %vm79_vm0, %v5340_v21  ;;  %v1989_v44 = vadd.f32 %v1985_v27, %v5279_v42  ;;  %4805 = vmatpush3.bf16.msra.mxu0 %v4804_v5  ;;  %v2336_v42 = vld [vmem:[#allocation2 + $0xd30] sm:$0xff]  ;;  %v4824_v5 = vpack.c.bf16 %v2311_v15, %v2310_v14  ;;  %v4862_v40 = vpack.c.bf16 %v2562_v38, %v2561_v33 }
 0x699   :  { %2145 = vmatprep.mubr.f32.mxu0 %v5351_v43  ;;  %v5360_v46 = vrot.slane %v5351_v43, 7  ;;  %4833 = vmatpush3.bf16.msra.mxu1 %v5320_v25  ;;  %v2013_v25 = vrot.slane %v5351_v43, 1  ;;  %v4842_v52 = vpack.c.bf16 %v2337_v49, %v2336_v42  ;;  %v2344_v27 = vld [vmem:[#allocation2 + $0xd70] sm:$0xff]  ;;  %v4864_v14 = vpack.c.bf16 %v2546_v1, %v2545_v63 }
 0x69a   :  { %v5363_v35 = vmax.f32 %v1989_v44, 0.0  ;;  %4835 = vmatprep.subr.bf16.mxu1 %v4834_v23  ;;  %4807 = vmatprep.subr.bf16.mxu0 %v4806_v31  ;;  %v2345_v31 = vld [vmem:[#allocation2 + $0xd78] sm:$0xff]  ;;  %v2577_v44 = vld [vmem:[#allocation2 + $0x1000] sm:$0xff]  ;;  %v2579_v16 = vld [vmem:[#allocation2 + $0x1010] sm:$0xff] }
 0x69b   :  { %3135 = vmatmul.mubr.msk.f32.gmra.mrb[60].mxu0 %vm5171_vm2, %v5360_v46  ;;  %v4858_v32 = vpack.c.bf16 %v2345_v31, %v2344_v27  ;;  %v2565_v27 = vld [vmem:[#allocation2 + $0xfa0] sm:$0xff]  ;;  %v2566_v31 = vld [vmem:[#allocation2 + $0xfa8] sm:$0xff]  ;;  %v4898_v38 = vpack.c.bf16 %v2580_v17, %v2579_v16  ;;  %v2572_v16 = vld [vmem:[#allocation2 + $0xfd8] sm:$0xff] }
 0x69c   :  { %2150 = vmatprep.mubr.f32.mxu0 %v5363_v35  ;;  %v2002_v41 = vrot.slane %v5363_v35, 7  ;;  %v5372_v37 = vrot.slane %v5363_v35, 1  ;;  %4809 = vmatpush3.bf16.msra.mxu0 %v4808_v45  ;;  %v2578_v45 = vld [vmem:[#allocation2 + $0x1008] sm:$0xff] }
 0x69d   :  { %4837 = vmatpush3.bf16.msra.mxu1 %v4834_v23  ;;  %4811 = vmatprep.subr.bf16.mxu0 %v4810_v39  ;;  %v2312_v23 = vld [vmem:[#allocation2 + $0xc70] sm:$0xff]  ;;  %v5386_v39 = vpack.c.bf16 %v2578_v45, %v2577_v44 }
 0x69e   :  { %v5376_v51 = vsel %vm66_vm1, %v5360_v46, %v2002_v41  ;;  %v5380_v50 = vsel %vm79_vm0, %v2013_v25, %v5372_v37  ;;  %4839 = vmatprep.subr.bf16.mxu1 %v4838_v48  ;;  %v4828_v26 = vpack.c.bf16 %v2313_v24, %v2312_v23 }
 0x69f   :  { %2151 = vmatmul.mubr.f32.gmra.mrb[62].mxu0 %v5376_v51  ;;  %4169 = vmatprep.mubr.f32.mxu1 %v5380_v50 }
 0x6a0   :  { %4170 = vmatmul.mubr.msk.f32.gmra.mrb[30].mxu1 %vm79_vm0, %v5372_v37  ;;  %4813 = vmatpush3.bf16.msra.mxu0 %v4812_v34  ;;  %v3138_v34 = vld [vmem:[#allocation4 + $0x7] ss:$0 sm:$0xff] }
 0x6a1   :  { %4841 = vmatpush3.bf16.msra.mxu1 %v4838_v48  ;;  %4815 = vmatprep.subr.bf16.mxu0 %v4814_v55 }
 0x6a2   :  { %4843 = vmatprep.subr.bf16.mxu1 %v4842_v52 }
 0x6a4   :  { %4817 = vmatpush3.bf16.msra.mxu0 %v4816_v58 }
 0x6a5   :  { %4845 = vmatpush3.bf16.msra.mxu1 %v4842_v52  ;;  %4819 = vmatprep.subr.bf16.mxu0 %v4818_v2 }
 0x6a6   :  { %4847 = vmatprep.subr.bf16.mxu1 %v4846_v61 }
 0x6a8   :  { %4821 = vmatpush3.bf16.msra.mxu0 %v4820_v7  ;;  %v2564_v7 = vld [vmem:[#allocation2 + $0xf98] sm:$0xff] }
 0x6a9   :  { %4849 = vmatpush3.bf16.msra.mxu1 %v4846_v61  ;;  %4823 = vmatprep.subr.bf16.mxu0 %v4822_v13 }
 0x6aa   :  { %4851 = vmatprep.subr.bf16.mxu1 %v4850_v62 }
 0x6ac   :  { %4825 = vmatpush3.bf16.msra.mxu0 %v4824_v5  ;;  %v2548_v5 = vld [vmem:[#allocation2 + $0xf18] sm:$0xff] }
 0x6ad   :  { %4853 = vmatpush3.bf16.msra.mxu1 %v4850_v62  ;;  %4827 = vmatprep.subr.bf16.mxu0 %v4826_v22  ;;  %v4866_v22 = vpack.c.bf16 %v2564_v7, %v2563_v6  ;;  %v4868_v33 = vpack.c.bf16 %v2548_v5, %v2547_v10  ;;  %v2570_v6 = vld [vmem:[#allocation2 + $0xfc8] sm:$0xff]  ;;  %v2571_v5 = vld [vmem:[#allocation2 + $0xfd0] sm:$0xff] }
 0x6ae   :  { %4855 = vmatprep.subr.bf16.mxu1 %v4854_v18 }
 0x6b0   :  { %4829 = vmatpush3.bf16.msra.mxu0 %v4828_v26 }
 0x6b1   :  { %4857 = vmatpush3.bf16.msra.mxu1 %v4854_v18  ;;  %4863 = vmatprep.subr.bf16.mxu0 %v4862_v40 }
 0x6b2   :  { %4859 = vmatprep.subr.bf16.mxu1 %v4858_v32 }
 0x6b5   :  { %4861 = vmatpush3.bf16.msra.mxu1 %v4858_v32 }
 0x6b6   :  { %4895 = vmatprep.subr.bf16.mxu1 %v5386_v39 }
 0x766   :  { %v3644_v47 = vpop.f32.mrb[56].mxu0 }
 0x767   :  { %v3645_v36 = vpop.f32.mrb[57].mxu0 }
 0x768   :  { %v3646_v48 = vadd.f32 %v3645_v36, %v3644_v47  ;;  %v4870_v36 = vpack.c.bf16 %v2566_v31, %v2565_v27  ;;  %v2574_v27 = vld [vmem:[#allocation2 + $0xfe8] sm:$0xff] }
 0x76a   :  { %v3647_v42 = vpop.f32.mrb[58].mxu0 }
 0x76b   :  { %v3648_v49 = vpop.f32.mrb[59].mxu0  ;;  %v4168_v41 = vpop.f32.mrb[28].mxu1 }
 0x76c   :  { %v3649_v25 = vadd.f32 %v3648_v49, %v3647_v42  ;;  %v2222_v52 = vpop.f32.mrb[29].mxu1  ;;  %v2550_v42 = vld [vmem:[#allocation2 + $0xf28] sm:$0xff] }
 0x76d   :  { %v2223_v53 = vadd.f32 %v3646_v48, %v2222_v52  ;;  %v2549_v48 = vld [vmem:[#allocation2 + $0xf20] sm:$0xff]  ;;  %v2567_v52 = vld [vmem:[#allocation2 + $0xfb0] sm:$0xff] }
 0x76e   :  { %v2228_v54 = vadd.f32 %v4168_v41, %v3649_v25  ;;  %v3650_v55 = vpop.f32.mrb[60].mxu0  ;;  %v2581_v41 = vld [vmem:[#allocation2 + $0x1020] sm:$0xff]  ;;  %v2582_v25 = vld [vmem:[#allocation2 + $0x1028] sm:$0xff] }
 0x76f   :  { %v2249_v57 = vmul.f32 %v3138_v34, %v2223_v53  ;;  %v3651_v58 = vpop.f32.mrb[61].mxu0  ;;  %v2568_v53 = vld [vmem:[#allocation2 + $0xfb8] sm:$0xff] }
 0x770   :  { %v2250_v59 = vmul.f32 %v3138_v34, %v2228_v54  ;;  %v3652_v60 = vadd.f32 %v3651_v58, %v3650_v55  ;;  %v4872_v54 = vpack.c.bf16 %v2550_v42, %v2549_v48  ;;  %v4874_v63 = vpack.c.bf16 %v2568_v53, %v2567_v52  ;;  %v2559_v48 = vld [vmem:[#allocation2 + $0xf70] sm:$0xff]  ;;  %v2833_v52 = vld [vmem:[#allocation2 + $0xe08] sm:$0xff] }
 0x771   :  { %v2261_v61 = vadd.f32 %v3139_v56, %v2249_v57 }
 0x772   :  { %v3653_v2 = vpop.f32.mrb[62].mxu0  ;;  %v2262_v4 = vadd.f32 %v3139_v56, %v2250_v59  ;;  %v4902_v59 = vpack.c.bf16 %v2582_v25, %v2581_v41  ;;  %v2591_v41 = vld [vmem:[#allocation2 + $0x1070] sm:$0xff]  ;;  %v2592_v25 = vld [vmem:[#allocation2 + $0x1078] sm:$0xff] }
 0x773   :  { %v3654_v8 = vpop.f32.mrb[63].mxu0  ;;  %v4171_v9 = vpop.f32.mrb[30].mxu1  ;;  %v2265_v62 = vmax.f32 %v2261_v61, 0.0  ;;  %v2552_v61 = vld [vmem:[#allocation2 + $0xf38] sm:$0xff] }
 0x774   :  { %v3655_v11 = vadd.f32 %v3654_v8, %v3653_v2  ;;  %v2232_v13 = vpop.f32.mrb[31].mxu1  ;;  %v2266_v15 = vmax.f32 %v2262_v4, 0.0  ;;  %v2583_v2 = vld [vmem:[#allocation2 + $0x1030] sm:$0xff]  ;;  %v2569_v4 = vld [vmem:[#allocation2 + $0xfc0] sm:$0xff] }
 0x775   :  { %v2233_v18 = vadd.f32 %v3652_v60, %v2232_v13  ;;  %v2273_v19 = vrot.slane %v2265_v62, 7  ;;  %2410 = vmatprep.mubr.f32.mxu0 %v2265_v62  ;;  %v2285_v20 = vrot.slane %v2265_v62, 1  ;;  %v2551_v60 = vld [vmem:[#allocation2 + $0xf30] sm:$0xff]  ;;  %v2553_v62 = vld [vmem:[#allocation2 + $0xf40] sm:$0xff] }
 0x776   :  { %v2238_v23 = vadd.f32 %v4171_v9, %v3655_v11  ;;  %v2286_v24 = vrot.slane %v2266_v15, 1  ;;  %v2274_v26 = vrot.slane %v2266_v15, 7  ;;  %v4876_v9 = vpack.c.bf16 %v2552_v61, %v2551_v60  ;;  %v2554_v11 = vld [vmem:[#allocation2 + $0xf48] sm:$0xff]  ;;  %v2585_v13 = vld [vmem:[#allocation2 + $0x1040] sm:$0xff]  ;;  %v2835_v60 = vld [vmem:[#allocation2 + $0xe18] sm:$0xff] }
 0x777   :  { %v2251_v32 = vmul.f32 %v3138_v34, %v2233_v18  ;;  %3141 = vmatmul.mubr.msk.f32.vlgmr.msra.gmra.mrb[64].mxu0 %vm5171_vm2, %v2273_v19  ;;  %v4880_v17 = vpack.c.bf16 %v2554_v11, %v2553_v62  ;;  %v2848_v61 = vld [vmem:[#allocation2 + $0xe80] sm:$0xff] }
 0x778   :  { %v2252_v40 = vmul.f32 %v3138_v34, %v2238_v23  ;;  %4865 = vmatpush3.bf16.msra.mxu0 %v4864_v14  ;;  %2415 = vmatprep.mubr.f32.mxu0 %v2266_v15  ;;  %v2287_v44 = vsel %vm79_vm0, %v2285_v20, %v2286_v24  ;;  %v2275_v45 = vsel %vm66_vm1, %v2273_v19, %v2274_v26  ;;  %v2586_v14 = vld [vmem:[#allocation2 + $0x1048] sm:$0xff]  ;;  %v2555_v19 = vld [vmem:[#allocation2 + $0xf50] sm:$0xff]  ;;  %v2573_v26 = vld [vmem:[#allocation2 + $0xfe0] sm:$0xff] }
 0x779   :  { %4204 = vmatprep.mubr.f32.mxu1 %v2287_v44  ;;  %4867 = vmatprep.subr.bf16.mxu0 %v4866_v22  ;;  %v2263_v47 = vadd.f32 %v3139_v56, %v2251_v32  ;;  %v4878_v15 = vpack.c.bf16 %v2570_v6, %v2569_v4  ;;  %v4910_v18 = vpack.c.bf16 %v2586_v14, %v2585_v13  ;;  %v2556_v22 = vld [vmem:[#allocation2 + $0xf58] sm:$0xff]  ;;  %v2587_v23 = vld [vmem:[#allocation2 + $0x1050] sm:$0xff]  ;;  %v2590_v44 = vld [vmem:[#allocation2 + $0x1068] sm:$0xff] }
 0x77a   :  { %4205 = vmatmul.mubr.msk.f32.vlgmr.msra.gmra.mrb[32].mxu1 %vm79_vm0, %v2286_v24  ;;  %v2264_v49 = vadd.f32 %v3139_v56, %v2252_v40  ;;  %v4882_v20 = vpack.c.bf16 %v2572_v16, %v2571_v5  ;;  %v2588_v24 = vld [vmem:[#allocation2 + $0x1058] sm:$0xff]  ;;  %v4884_v31 = vpack.c.bf16 %v2556_v22, %v2555_v19  ;;  %v2589_v40 = vld [vmem:[#allocation2 + $0x1060] sm:$0xff]  ;;  %v2821_v13 = vld [vmem:[#allocation2 + $0xda8] sm:$0xff] }
 0x77b   :  { %4897 = vmatpush3.bf16.msra.mxu1 %v5386_v39  ;;  %2416 = vmatmul.mubr.f32.gmra.mrb[66].mxu0 %v2275_v45  ;;  %v2267_v34 = vmax.f32 %v2263_v47, 0.0  ;;  %v2584_v39 = vld [vmem:[#allocation2 + $0x1038] sm:$0xff]  ;;  %v4914_v32 = vpack.c.bf16 %v2588_v24, %v2587_v23  ;;  %v2836_v6 = vld [vmem:[#allocation2 + $0xe20] sm:$0xff]  ;;  %v2853_v16 = vld [vmem:[#allocation2 + $0xea8] sm:$0xff] }
 0x77c   :  { %4869 = vmatpush3.bf16.msra.mxu0 %v4868_v33  ;;  %4899 = vmatprep.subr.bf16.mxu1 %v4898_v38  ;;  %v2268_v55 = vmax.f32 %v2264_v49, 0.0  ;;  %v4906_v10 = vpack.c.bf16 %v2584_v39, %v2583_v2  ;;  %v2557_v33 = vld [vmem:[#allocation2 + $0xf60] sm:$0xff]  ;;  %v2576_v45 = vld [vmem:[#allocation2 + $0xff8] sm:$0xff]  ;;  %v2818_v2 = vld [vmem:[#allocation2 + $0xd90] sm:$0xff] }
 0x77d   :  { %2420 = vmatprep.mubr.f32.mxu0 %v2267_v34  ;;  %4871 = vmatprep.subr.bf16.mxu0 %v4870_v36  ;;  %v2276_v57 = vrot.slane %v2267_v34, 7  ;;  %v2288_v58 = vrot.slane %v2267_v34, 1  ;;  %v4918_v36 = vpack.c.bf16 %v2590_v44, %v2589_v40  ;;  %v2560_v49 = vld [vmem:[#allocation2 + $0xf78] sm:$0xff]  ;;  %v2832_v34 = vld [vmem:[#allocation2 + $0xe00] sm:$0xff]  ;;  %v2825_v22 = vld [vmem:[#allocation2 + $0xdc8] sm:$0xff] }
 0x77e   :  { %v2289_v56 = vrot.slane %v2268_v55, 1  ;;  %v2277_v1 = vrot.slane %v2268_v55, 7  ;;  %v4892_v53 = vpack.c.bf16 %v2560_v49, %v2559_v48  ;;  %v2819_v39 = vld [vmem:[#allocation2 + $0xd98] sm:$0xff]  ;;  %v2820_v11 = vld [vmem:[#allocation2 + $0xda0] sm:$0xff]  ;;  %v2854_v23 = vld [vmem:[#allocation2 + $0xeb0] sm:$0xff] }
 0x77f   :  { %4901 = vmatpush3.bf16.msra.mxu1 %v4898_v38  ;;  %3143 = vmatmul.mubr.msk.f32.gmra.mrb[68].mxu0 %vm5171_vm2, %v2276_v57  ;;  %v2558_v38 = vld [vmem:[#allocation2 + $0xf68] sm:$0xff]  ;;  %v4932_v62 = vpack.c.bf16 %v2819_v39, %v2818_v2  ;;  %v2839_v5 = vld [vmem:[#allocation2 + $0xe38] sm:$0xff]  ;;  %v2844_v44 = vld [vmem:[#allocation2 + $0xe60] sm:$0xff] }
 0x780   :  { %4873 = vmatpush3.bf16.msra.mxu0 %v4872_v54  ;;  %2425 = vmatprep.mubr.f32.mxu0 %v2268_v55  ;;  %v2290_v7 = vsel %vm79_vm0, %v2288_v58, %v2289_v56  ;;  %v2278_v8 = vsel %vm66_vm1, %v2276_v57, %v2277_v1  ;;  %v4888_v47 = vpack.c.bf16 %v2558_v38, %v2557_v33  ;;  %v2816_v57 = vld [vmem:[#allocation2 + $0xd80] sm:$0xff]  ;;  %v2817_v58 = vld [vmem:[#allocation2 + $0xd88] sm:$0xff]  ;;  %v2823_v19 = vld [vmem:[#allocation2 + $0xdb8] sm:$0xff] }
 0x781   :  { %4207 = vmatprep.mubr.f32.mxu1 %v2290_v7  ;;  %4903 = vmatprep.subr.bf16.mxu1 %v4902_v59  ;;  %v4922_v54 = vpack.c.bf16 %v2592_v25, %v2591_v41  ;;  %v4926_v55 = vpack.c.bf16 %v2833_v52, %v2832_v34  ;;  %v2837_v7 = vld [vmem:[#allocation2 + $0xe28] sm:$0xff]  ;;  %v2827_v33 = vld [vmem:[#allocation2 + $0xdd8] sm:$0xff]  ;;  %v2858_v48 = vld [vmem:[#allocation2 + $0xed0] sm:$0xff] }
 0x782   :  { %4208 = vmatmul.mubr.msk.f32.gmra.mrb[34].mxu1 %vm79_vm0, %v2289_v56  ;;  %4875 = vmatprep.subr.bf16.mxu0 %v4874_v63  ;;  %v2849_v56 = vld [vmem:[#allocation2 + $0xe88] sm:$0xff]  ;;  %v4928_v63 = vpack.c.bf16 %v2817_v58, %v2816_v57  ;;  %v2859_v49 = vld [vmem:[#allocation2 + $0xed8] sm:$0xff]  ;;  %v2846_v25 = vld [vmem:[#allocation2 + $0xe70] sm:$0xff] }
 0x783   :  { %4905 = vmatpush3.bf16.msra.mxu1 %v4902_v59  ;;  %2426 = vmatmul.mubr.f32.gmra.mrb[70].mxu0 %v2278_v8  ;;  %v2834_v59 = vld [vmem:[#allocation2 + $0xe10] sm:$0xff]  ;;  %v4958_v4 = vpack.c.bf16 %v2849_v56, %v2848_v61  ;;  %v4978_v41 = vpack.c.bf16 %v2859_v49, %v2858_v48  ;;  %v2847_v34 = vld [vmem:[#allocation2 + $0xe78] sm:$0xff]  ;;  %v2861_v58 = vld [vmem:[#allocation2 + $0xee8] sm:$0xff] }
 0x784   :  { %4877 = vmatpush3.bf16.msra.mxu0 %v4876_v9  ;;  %4242 = vmatprep.mubr.f32.mxu1 %v5349_v30  ;;  %v4886_v30 = vpack.c.bf16 %v2574_v27, %v2573_v26  ;;  %v4930_v1 = vpack.c.bf16 %v2835_v60, %v2834_v59  ;;  %v2850_v8 = vld [vmem:[#allocation2 + $0xe90] sm:$0xff]  ;;  %v2851_v9 = vld [vmem:[#allocation2 + $0xe98] sm:$0xff]  ;;  %v4954_v52 = vpack.c.bf16 %v2847_v34, %v2846_v25 }
 0x785   :  { %2657 = vmatprep.mubr.f32.mxu0 %v5324_v0  ;;  %4907 = vmatprep.subr.bf16.mxu1 %v4906_v10  ;;  %v2575_v0 = vld [vmem:[#allocation2 + $0xff0] sm:$0xff]  ;;  %v4962_v14 = vpack.c.bf16 %v2851_v9, %v2850_v8  ;;  %v2855_v26 = vld [vmem:[#allocation2 + $0xeb8] sm:$0xff] }
 0x786   :  { %4879 = vmatprep.subr.bf16.mxu0 %v4878_v15  ;;  %v4890_v42 = vpack.c.bf16 %v2576_v45, %v2575_v0  ;;  %v2838_v15 = vld [vmem:[#allocation2 + $0xe30] sm:$0xff]  ;;  %v4970_v27 = vpack.c.bf16 %v2855_v26, %v2854_v23  ;;  %v2845_v0 = vld [vmem:[#allocation2 + $0xe68] sm:$0xff]  ;;  %v2863_v61 = vld [vmem:[#allocation2 + $0xef8] sm:$0xff] }
 0x787   :  { %4909 = vmatpush3.bf16.msra.mxu1 %v4906_v10  ;;  %v4934_v10 = vpack.c.bf16 %v2837_v7, %v2836_v6  ;;  %v4950_v45 = vpack.c.bf16 %v2845_v0, %v2844_v44  ;;  %v2862_v60 = vld [vmem:[#allocation2 + $0xef0] sm:$0xff]  ;;  %v3146_v7 = vld [vmem:[#allocation4 + $0x8] ss:$0 sm:$0xff] }
 0x788   :  { %4881 = vmatpush3.bf16.msra.mxu0 %v4880_v17  ;;  %4911 = vmatprep.subr.bf16.mxu1 %v4910_v18  ;;  %v4938_v17 = vpack.c.bf16 %v2839_v5, %v2838_v15  ;;  %v4986_v56 = vpack.c.bf16 %v2863_v61, %v2862_v60 }
 0x789   :  { %4883 = vmatprep.subr.bf16.mxu0 %v4882_v20  ;;  %v2840_v20 = vld [vmem:[#allocation2 + $0xe40] sm:$0xff] }
 0x78b   :  { %4913 = vmatpush3.bf16.msra.mxu1 %v4910_v18  ;;  %v2822_v18 = vld [vmem:[#allocation2 + $0xdb0] sm:$0xff] }
 0x78c   :  { %4885 = vmatpush3.bf16.msra.mxu0 %v4884_v31  ;;  %4915 = vmatprep.subr.bf16.mxu1 %v4914_v32 }
 0x78d   :  { %4887 = vmatprep.subr.bf16.mxu0 %v4886_v30  ;;  %v2856_v30 = vld [vmem:[#allocation2 + $0xec0] sm:$0xff] }
 0x78f   :  { %4917 = vmatpush3.bf16.msra.mxu1 %v4914_v32  ;;  %v2826_v32 = vld [vmem:[#allocation2 + $0xdd0] sm:$0xff] }
 0x790   :  { %4889 = vmatpush3.bf16.msra.mxu0 %v4888_v47  ;;  %4919 = vmatprep.subr.bf16.mxu1 %v4918_v36  ;;  %v4948_v38 = vpack.c.bf16 %v2827_v33, %v2826_v32  ;;  %v2828_v47 = vld [vmem:[#allocation2 + $0xde0] sm:$0xff] }
 0x791   :  { %4891 = vmatprep.subr.bf16.mxu0 %v4890_v42 }
 0x793   :  { %4921 = vmatpush3.bf16.msra.mxu1 %v4918_v36  ;;  %v2829_v36 = vld [vmem:[#allocation2 + $0xde8] sm:$0xff] }
 0x794   :  { %4893 = vmatpush3.bf16.msra.mxu0 %v4892_v53  ;;  %4923 = vmatprep.subr.bf16.mxu1 %v4922_v54  ;;  %v4952_v42 = vpack.c.bf16 %v2829_v36, %v2828_v47  ;;  %v2830_v53 = vld [vmem:[#allocation2 + $0xdf0] sm:$0xff] }
 0x795   :  { %4927 = vmatprep.subr.bf16.mxu0 %v4926_v55  ;;  %v2860_v55 = vld [vmem:[#allocation2 + $0xee0] sm:$0xff] }
 0x796   :  { %v4982_v59 = vpack.c.bf16 %v2861_v58, %v2860_v55 }
 0x797   :  { %3149 = vmatmul.mubr.msk.f32.vlgmr.msra.gmra.mrb[72].mxu0 %vm5171_vm2, %v5328_v3  ;;  %4925 = vmatpush3.bf16.msra.mxu1 %v4922_v54  ;;  %v2852_v3 = vld [vmem:[#allocation2 + $0xea0] sm:$0xff]  ;;  %v2831_v54 = vld [vmem:[#allocation2 + $0xdf8] sm:$0xff] }
 0x798   :  { %2662 = vmatprep.mubr.f32.mxu0 %v5331_v12  ;;  %4929 = vmatpush3.bf16.msra.mxu0 %v4928_v63  ;;  %v4936_v12 = vpack.c.bf16 %v2821_v13, %v2820_v11  ;;  %v4956_v57 = vpack.c.bf16 %v2831_v54, %v2830_v53 }
 0x799   :  { %4931 = vmatprep.subr.bf16.mxu0 %v4930_v1  ;;  %4959 = vmatprep.subr.bf16.mxu1 %v4958_v4 }
 0x79a   :  { %4243 = vmatmul.mubr.msk.f32.vlgmr.msra.gmra.mrb[36].mxu1 %vm79_vm0, %v5340_v21  ;;  %v4966_v21 = vpack.c.bf16 %v2853_v16, %v2852_v3 }
 0x79b   :  { %2663 = vmatmul.mubr.f32.gmra.mrb[74].mxu0 %v5345_v29  ;;  %4245 = vmatprep.mubr.f32.mxu1 %v5380_v50  ;;  %v2841_v29 = vld [vmem:[#allocation2 + $0xe48] sm:$0xff] }
 0x79c   :  { %2667 = vmatprep.mubr.f32.mxu0 %v5351_v43  ;;  %4933 = vmatpush3.bf16.msra.mxu0 %v4932_v62  ;;  %v4940_v43 = vpack.c.bf16 %v2823_v19, %v2822_v18  ;;  %v4942_v50 = vpack.c.bf16 %v2841_v29, %v2840_v20 }
 0x79d   :  { %4961 = vmatpush3.bf16.msra.mxu1 %v4958_v4  ;;  %4935 = vmatprep.subr.bf16.mxu0 %v4934_v10  ;;  %v3147_v10 = vld [vmem:[#allocation6 + $0x8] ss:$0 sm:$0xff] }
 0x79e   :  { %4246 = vmatmul.mubr.msk.f32.gmra.mrb[38].mxu1 %vm79_vm0, %v5372_v37  ;;  %4963 = vmatprep.subr.bf16.mxu1 %v4962_v14  ;;  %v2824_v37 = vld [vmem:[#allocation2 + $0xdc0] sm:$0xff] }
 0x79f   :  { %3151 = vmatmul.mubr.msk.f32.gmra.mrb[76].mxu0 %vm5171_vm2, %v5360_v46  ;;  %v4944_v24 = vpack.c.bf16 %v2825_v22, %v2824_v37  ;;  %v2842_v46 = vld [vmem:[#allocation2 + $0xe50] sm:$0xff] }
 0x7a0   :  { %2672 = vmatprep.mubr.f32.mxu0 %v5363_v35  ;;  %4937 = vmatpush3.bf16.msra.mxu0 %v4936_v12  ;;  %v2843_v35 = vld [vmem:[#allocation2 + $0xe58] sm:$0xff] }
 0x7a1   :  { %4965 = vmatpush3.bf16.msra.mxu1 %v4962_v14  ;;  %4939 = vmatprep.subr.bf16.mxu0 %v4938_v17  ;;  %v4946_v31 = vpack.c.bf16 %v2843_v35, %v2842_v46 }
 0x7a2   :  { %4967 = vmatprep.subr.bf16.mxu1 %v4966_v21 }
 0x7a3   :  { %2673 = vmatmul.mubr.f32.gmra.mrb[78].mxu0 %v5376_v51  ;;  %v2857_v51 = vld [vmem:[#allocation2 + $0xec8] sm:$0xff] }
 0x7a4   :  { %4941 = vmatpush3.bf16.msra.mxu0 %v4940_v43  ;;  %v4974_v40 = vpack.c.bf16 %v2857_v51, %v2856_v30 }
 0x7a5   :  { %4969 = vmatpush3.bf16.msra.mxu1 %v4966_v21  ;;  %4943 = vmatprep.subr.bf16.mxu0 %v4942_v50 }
 0x7a6   :  { %4971 = vmatprep.subr.bf16.mxu1 %v4970_v27 }
 0x7a8   :  { %4945 = vmatpush3.bf16.msra.mxu0 %v4944_v24 }
 0x7a9   :  { %4973 = vmatpush3.bf16.msra.mxu1 %v4970_v27  ;;  %4947 = vmatprep.subr.bf16.mxu0 %v4946_v31 }
 0x7aa   :  { %4975 = vmatprep.subr.bf16.mxu1 %v4974_v40 }
 0x7ac   :  { %4949 = vmatpush3.bf16.msra.mxu0 %v4948_v38 }
 0x7ad   :  { %4977 = vmatpush3.bf16.msra.mxu1 %v4974_v40  ;;  %4951 = vmatprep.subr.bf16.mxu0 %v4950_v45 }
 0x7ae   :  { %4979 = vmatprep.subr.bf16.mxu1 %v4978_v41 }
 0x7b0   :  { %4953 = vmatpush3.bf16.msra.mxu0 %v4952_v42 }
 0x7b1   :  { %4981 = vmatpush3.bf16.msra.mxu1 %v4978_v41  ;;  %4955 = vmatprep.subr.bf16.mxu0 %v4954_v52 }
 0x7b2   :  { %4983 = vmatprep.subr.bf16.mxu1 %v4982_v59 }
 0x7b4   :  { %4957 = vmatpush3.bf16.msra.mxu0 %v4956_v57 }
 0x7b5   :  { %4985 = vmatpush3.bf16.msra.mxu1 %v4982_v59 }
 0x7b6   :  { %4987 = vmatprep.subr.bf16.mxu1 %v4986_v56 }
 0x7b9   :  { %4989 = vmatpush3.bf16.msra.mxu1 %v4986_v56 }
 0x84a   :  { %v3708_v63 = vpop.f32.mrb[64].mxu0 }
 0x84b   :  { %v3709_v1 = vpop.f32.mrb[65].mxu0 }
 0x84c   :  { %v3710_v2 = vadd.f32 %v3709_v1, %v3708_v63 }
 0x84d   :  { %v4206_v39 = vpop.f32.mrb[32].mxu1 }
 0x84e   :  { %v3711_v4 = vpop.f32.mrb[66].mxu0  ;;  %v2497_v6 = vpop.f32.mrb[33].mxu1 }
 0x84f   :  { %v2498_v8 = vadd.f32 %v3710_v2, %v2497_v6  ;;  %v3712_v9 = vpop.f32.mrb[67].mxu0  ;;  %v3154_v6 = vld [vmem:[#allocation4 + $0xa] ss:$0 sm:$0xff] }
 0x850   :  { %v3713_v62 = vadd.f32 %v3712_v9, %v3711_v4 }
 0x851   :  { %v2524_v11 = vmul.f32 %v3146_v7, %v2498_v8 }
 0x852   :  { %v2503_v13 = vadd.f32 %v4206_v39, %v3713_v62  ;;  %v3714_v14 = vpop.f32.mrb[68].mxu0 }
 0x853   :  { %v3715_v15 = vpop.f32.mrb[69].mxu0  ;;  %v2536_v5 = vadd.f32 %v3147_v10, %v2524_v11 }
 0x854   :  { %v2525_v3 = vmul.f32 %v3146_v7, %v2503_v13  ;;  %v3716_v16 = vadd.f32 %v3715_v15, %v3714_v14  ;;  %v3155_v15 = vld [vmem:[#allocation6 + $0xa] ss:$0 sm:$0xff] }
 0x855   :  { %v4209_v12 = vpop.f32.mrb[34].mxu1  ;;  %v2540_v17 = vmax.f32 %v2536_v5, 0.0 }
 0x856   :  { %v3717_v18 = vpop.f32.mrb[70].mxu0  ;;  %v2507_v19 = vpop.f32.mrb[35].mxu1  ;;  %v2537_v21 = vadd.f32 %v3147_v10, %v2525_v3 }
 0x857   :  { %v2508_v20 = vadd.f32 %v3716_v16, %v2507_v19  ;;  %v3718_v29 = vpop.f32.mrb[71].mxu0  ;;  %v2791_v43 = vrot.slane %v2540_v17, 7  ;;  %2928 = vmatprep.mubr.f32.mxu0 %v2540_v17  ;;  %v2803_v26 = vrot.slane %v2540_v17, 1  ;;  %v3163_v16 = vld [vmem:[#allocation6 + $0x9] ss:$0 sm:$0xff] }
 0x858   :  { %v3719_v50 = vadd.f32 %v3718_v29, %v3717_v18  ;;  %v2541_v37 = vmax.f32 %v2537_v21, 0.0 }
 0x859   :  { %v2526_v22 = vmul.f32 %v3146_v7, %v2508_v20  ;;  %3157 = vmatmul.mubr.msk.f32.vlgmr.msra.gmra.mrb[80].mxu0 %vm5171_vm2, %v2791_v43 }
 0x85a   :  { %v2513_v23 = vadd.f32 %v4209_v12, %v3719_v50  ;;  %2933 = vmatprep.mubr.f32.mxu0 %v2541_v37  ;;  %v2792_v24 = vrot.slane %v2541_v37, 7  ;;  %v2804_v27 = vrot.slane %v2541_v37, 1 }
 0x85b   :  { %v2538_v46 = vadd.f32 %v3147_v10, %v2526_v22 }
 0x85c   :  { %v2527_v35 = vmul.f32 %v3146_v7, %v2513_v23  ;;  %v2793_v31 = vsel %vm66_vm1, %v2791_v43, %v2792_v24  ;;  %v2805_v32 = vsel %vm79_vm0, %v2803_v26, %v2804_v27 }
 0x85d   :  { %2934 = vmatmul.mubr.f32.gmra.mrb[82].mxu0 %v2793_v31  ;;  %4280 = vmatprep.mubr.f32.mxu1 %v2805_v32  ;;  %v2542_v33 = vmax.f32 %v2538_v46, 0.0 }
 0x85e   :  { %4281 = vmatmul.mubr.msk.f32.vlgmr.msra.gmra.mrb[40].mxu1 %vm79_vm0, %v2804_v27  ;;  %v2539_v30 = vadd.f32 %v3147_v10, %v2527_v35  ;;  %v3162_v10 = vld [vmem:[#allocation4 + $0x9] ss:$0 sm:$0xff] }
 0x85f   :  { %2938 = vmatprep.mubr.f32.mxu0 %v2542_v33  ;;  %v2794_v38 = vrot.slane %v2542_v33, 7  ;;  %v2806_v44 = vrot.slane %v2542_v33, 1 }
 0x860   :  { %v2543_v51 = vmax.f32 %v2539_v30, 0.0 }
 0x861   :  { %3159 = vmatmul.mubr.msk.f32.gmra.mrb[84].mxu0 %vm5171_vm2, %v2794_v38 }
 0x862   :  { %2943 = vmatprep.mubr.f32.mxu0 %v2543_v51  ;;  %v2795_v40 = vrot.slane %v2543_v51, 7  ;;  %v2807_v0 = vrot.slane %v2543_v51, 1 }
 0x864   :  { %v2796_v45 = vsel %vm66_vm1, %v2794_v38, %v2795_v40  ;;  %v2808_v47 = vsel %vm79_vm0, %v2806_v44, %v2807_v0 }
 0x865   :  { %2944 = vmatmul.mubr.f32.gmra.mrb[86].mxu0 %v2796_v45  ;;  %4283 = vmatprep.mubr.f32.mxu1 %v2808_v47 }
 0x866   :  { %4284 = vmatmul.mubr.msk.f32.gmra.mrb[42].mxu1 %vm79_vm0, %v2807_v0 }
 0x86a   :  { %v3772_v36 = vpop.f32.mrb[72].mxu0 }
 0x86b   :  { %v3773_v48 = vpop.f32.mrb[73].mxu0 }
 0x86c   :  { %v3774_v42 = vadd.f32 %v3773_v48, %v3772_v36 }
 0x86d   :  { %v4244_v49 = vpop.f32.mrb[36].mxu1 }
 0x86e   :  { %v3775_v41 = vpop.f32.mrb[74].mxu0  ;;  %v2744_v25 = vpop.f32.mrb[37].mxu1 }
 0x86f   :  { %v2745_v28 = vadd.f32 %v3774_v42, %v2744_v25  ;;  %v3776_v34 = vpop.f32.mrb[75].mxu0 }
 0x870   :  { %v3777_v52 = vadd.f32 %v3776_v34, %v3775_v41 }
 0x871   :  { %v4247_v53 = vpop.f32.mrb[38].mxu1  ;;  %v2771_v13 = vmul.f32 %v3154_v6, %v2745_v28 }
 0x872   :  { %v2750_v54 = vadd.f32 %v4244_v49, %v3777_v52  ;;  %v3778_v55 = vpop.f32.mrb[76].mxu0  ;;  %v2754_v57 = vpop.f32.mrb[39].mxu1 }
 0x873   :  { %v3779_v58 = vpop.f32.mrb[77].mxu0  ;;  %v2783_v20 = vadd.f32 %v3155_v15, %v2771_v13 }
 0x874   :  { %v3780_v59 = vadd.f32 %v3779_v58, %v3778_v55  ;;  %v2772_v5 = vmul.f32 %v3154_v6, %v2750_v54 }
 0x876   :  { %v2755_v60 = vadd.f32 %v3780_v59, %v2754_v57  ;;  %v3781_v61 = vpop.f32.mrb[78].mxu0  ;;  %v2784_v43 = vadd.f32 %v3155_v15, %v2772_v5 }
 0x877   :  { %v3782_v56 = vpop.f32.mrb[79].mxu0 }
 0x878   :  { %v3783_v63 = vadd.f32 %v3782_v56, %v3781_v61  ;;  %v2773_v35 = vmul.f32 %v3154_v6, %v2755_v60 }
 0x87a   :  { %v2760_v1 = vadd.f32 %v4247_v53, %v3783_v63  ;;  %v2785_v44 = vadd.f32 %v3155_v15, %v2773_v35 }
 0x87c   :  { %v2774_v33 = vmul.f32 %v3154_v6, %v2760_v1 }
 0x87e   :  { %v2786_v45 = vadd.f32 %v3155_v15, %v2774_v33 }
 0x92c   :  { %v3836_v2 = vpop.f32.mrb[80].mxu0 }
 0x92d   :  { %v3837_v39 = vpop.f32.mrb[81].mxu0 }
 0x92e   :  { %v3838_v4 = vadd.f32 %v3837_v39, %v3836_v2 }
 0x930   :  { %v3839_v7 = vpop.f32.mrb[82].mxu0 }
 0x931   :  { %v3840_v8 = vpop.f32.mrb[83].mxu0  ;;  %v4282_v9 = vpop.f32.mrb[40].mxu1 }
 0x932   :  { %v3841_v62 = vadd.f32 %v3840_v8, %v3839_v7  ;;  %v3015_v11 = vpop.f32.mrb[41].mxu1 }
 0x933   :  { %v3016_v14 = vadd.f32 %v3838_v4, %v3015_v11 }
 0x934   :  { %v3021_v3 = vadd.f32 %v4282_v9, %v3841_v62  ;;  %v3842_v12 = vpop.f32.mrb[84].mxu0 }
 0x935   :  { %v3042_v17 = vmul.f32 %v3162_v10, %v3016_v14  ;;  %v3843_v18 = vpop.f32.mrb[85].mxu0 }
 0x936   :  { %v3043_v19 = vmul.f32 %v3162_v10, %v3021_v3  ;;  %v3844_v21 = vadd.f32 %v3843_v18, %v3842_v12 }
 0x937   :  { %v3054_v29 = vadd.f32 %v3163_v16, %v3042_v17 }
 0x938   :  { %v3055_v50 = vadd.f32 %v3163_v16, %v3043_v19  ;;  %v3845_v37 = vpop.f32.mrb[86].mxu0 }
 0x939   :  { %v3058_v22 = vadd.f32 %v3054_v29, %v2783_v20  ;;  %v3846_v23 = vpop.f32.mrb[87].mxu0  ;;  %v4285_v24 = vpop.f32.mrb[42].mxu1 }
 0x93a   :  { %v3059_v26 = vadd.f32 %v3055_v50, %v2784_v43  ;;  %v3847_v27 = vadd.f32 %v3846_v23, %v3845_v37  ;;  %v3025_v46 = vpop.f32.mrb[43].mxu1 }
 0x93b   :  { %v3062_v31 = vmax.f32 %v3058_v22, 0.0  ;;  %v3026_v32 = vadd.f32 %v3844_v21, %v3025_v46 }
 0x93c   :  { %v3063_v30 = vmax.f32 %v3059_v26, 0.0  ;;  %v3031_v38 = vadd.f32 %v4285_v24, %v3847_v27 }
 0x93d   :  { %3066 = vst [vmem:[%s5444_s4] sm:$0xff] %v3062_v31  ;;  %v3044_v51 = vmul.f32 %v3162_v10, %v3026_v32 }
 0x93e   :  { %3067 = vst [vmem:[%s5444_s4 + $0x8] sm:$0xff] %v3063_v30  ;;  %v3045_v40 = vmul.f32 %v3162_v10, %v3031_v38 }
 0x93f   :  { %v3056_v0 = vadd.f32 %v3163_v16, %v3044_v51 }
 0x940   :  { %v3057_v47 = vadd.f32 %v3163_v16, %v3045_v40 }
 0x941   :  { %v3060_v36 = vadd.f32 %v3056_v0, %v2785_v44 }
 0x942   :  { %v3061_v48 = vadd.f32 %v3057_v47, %v2786_v45 }
 0x943   :  { %v3064_v42 = vmax.f32 %v3060_v36, 0.0 }
 0x944   :  { %v3065_v49 = vmax.f32 %v3061_v48, 0.0 }
 0x945   :  { %3068 = vst [vmem:[%s5444_s4 + $0x10] sm:$0xff] %v3064_v42 }
 0x946   :  { %3069 = vst [vmem:[%s5444_s4 + $0x18] sm:$0xff] %v3065_v49 }
 0x947   :  { %3074 = vsyncpa [#allocation3], 1 }
 0x948   :  { %3075 = vsyncpa [#allocation5], 1 }

</bundles_post_ra>
